<compile_context>
chip_gen: v7x
topology: tpu7x:2x2x1
jax: 0.10.0
libtpu: 0.0.40
codegen_flags: <defaults>
</compile_context>

<pallas_src>
import jax
import jax.numpy as jnp
from jax.experimental import pallas as pl
from jax.experimental.pallas import tpu as pltpu


def disc_kernel(x_ref, m1_ref, m2_ref,
                w1_ref, b1_ref, w2_ref, b2_ref, w3_ref, b3_ref,
                o_ref):
    # ---- f1 -> ReLU -> dropout(p=0.5) ----
    # Cast activations to bf16 only at the dot; accumulate in f32 on the MXU.
    h1 = jnp.dot(x_ref[...].astype(jnp.bfloat16), w1_ref[...],
                 preferred_element_type=jnp.float32) + b1_ref[...]
    # m1 holds 0.0 (dropped) or 2.0 (kept, inverted-dropout scale 1/(1-p)).
    h1 = jnp.maximum(h1, 0.0) * m1_ref[...]

    # ---- f2 -> ReLU -> dropout(p=0.5) ----
    h2 = jnp.dot(h1.astype(jnp.bfloat16), w2_ref[...],
                 preferred_element_type=jnp.float32) + b2_ref[...]
    h2 = jnp.maximum(h2, 0.0) * m2_ref[...]

    # ---- logit (N=1): lane-reduce on VPU/XLU, keep the MXU out of it ----
    out = jnp.sum(h2 * w3_ref[...], axis=-1, keepdims=True) + b3_ref[...]
    o_ref[...] = out.astype(o_ref.dtype)


def disc_forward(x, alpha, params, dropout_key, *, tile_b=8):
    """Forward pass of `disc`.  `alpha` only affects the backward pass
    (gradient reversal is identity in forward), so it is unused here."""
    del alpha
    w1, b1, w2, b2, w3, b3 = params
    B, F = x.shape
    H = w1.shape[1]

    # Pad the batch up to a multiple of the tile size.
    Bp = ((B + tile_b - 1) // tile_b) * tile_b
    if Bp != B:
        x = jnp.pad(x, ((0, Bp - B), (0, 0)))

    # Dropout masks, pre-scaled by 1/(1-p) = 2.0 (PyTorch F.dropout default
    # p=0.5, training=True).  Unique per batch row -> unique per grid tile.
    k1, k2 = jax.random.split(dropout_key)
    m1 = jax.random.bernoulli(k1, 0.5, (Bp, H)).astype(jnp.float32) * 2.0
    m2 = jax.random.bernoulli(k2, 0.5, (Bp, H)).astype(jnp.float32) * 2.0

    grid = (Bp // tile_b,)

    flops = 2 * Bp * (F * H + H * H + H)
    bytes_accessed = (
        w1.size * w1.dtype.itemsize + w2.size * w2.dtype.itemsize
        + (b1.size + b2.size + w3.size + b3.size) * 4
        + x.size * 4 + m1.size * 4 + m2.size * 4 + Bp * 4)

    out = pl.pallas_call(
        disc_kernel,
        out_shape=jax.ShapeDtypeStruct((Bp, 1), jnp.float32),
        grid=grid,
        in_specs=[
            pl.BlockSpec((tile_b, F), lambda i: (i, 0)),   # x tile
            pl.BlockSpec((tile_b, H), lambda i: (i, 0)),   # mask 1 tile
            pl.BlockSpec((tile_b, H), lambda i: (i, 0)),   # mask 2 tile
            pl.BlockSpec((F, H), lambda i: (0, 0)),        # W1 (resident)
            pl.BlockSpec((1, H), lambda i: (0, 0)),        # b1
            pl.BlockSpec((H, H), lambda i: (0, 0)),        # W2 (resident)
            pl.BlockSpec((1, H), lambda i: (0, 0)),        # b2
            pl.BlockSpec((1, H), lambda i: (0, 0)),        # W3 row
            pl.BlockSpec((1, 1), lambda i: (0, 0)),        # b3
        ],
        out_specs=pl.BlockSpec((tile_b, 1), lambda i: (i, 0)),
        compiler_params=pltpu.CompilerParams(
            dimension_semantics=("parallel",)),
        cost_estimate=pl.CostEstimate(
            flops=flops, transcendentals=0, bytes_accessed=bytes_accessed),
    )(x, m1, m2,
      w1, b1.reshape(1, -1),
      w2, b2.reshape(1, -1),
      w3.reshape(1, -1), b3.reshape(1, 1))

    return out[:B]


def init_disc_params(key, n_features=256, hidden=1024):
    """Parameter init mimicking torch.nn.Linear's default
    (uniform +/- 1/sqrt(fan_in)).  Weights stored as (in, out);
    W1/W2 stored in bfloat16 (the kernel accumulates in f32)."""
    ks = jax.random.split(key, 6)

    def lin(kw, kb, fan_in, fan_out, wdtype=jnp.float32):
        bound = 1.0 / jnp.sqrt(float(fan_in))
        w = jax.random.uniform(kw, (fan_in, fan_out), jnp.float32, -bound, bound)
        b = jax.random.uniform(kb, (fan_out,), jnp.float32, -bound, bound)
        return w.astype(wdtype), b

    w1, b1 = lin(ks[0], ks[1], n_features, hidden, jnp.bfloat16)
    w2, b2 = lin(ks[2], ks[3], hidden, hidden, jnp.bfloat16)
    w3, b3 = lin(ks[4], ks[5], hidden, 1, jnp.float32)   # tiny, keep f32
    return (w1, b1, w2, b2, w3, b3)


if __name__ == "__main__":
    key = jax.random.PRNGKey(0)
    k_x, k_p, k_drop = jax.random.split(key, 3)

    # model_name == 'alexnet' -> n_features = 256; hidden fixed at 1024 by the module.
    B, N_FEATURES = 16, 256
    x = jax.random.normal(k_x, (B, N_FEATURES), dtype=jnp.float32)
    alpha = 0.5  # gradient-reversal strength; no effect on forward output
    params = init_disc_params(k_p, n_features=N_FEATURES, hidden=1024)

    out = disc_forward(x, alpha, params, k_drop, tile_b=8)
    out = jax.block_until_ready(out)
    assert out.shape == (B, 1) and out.dtype == jnp.float32
    print("KERNEL_OK")
</pallas_src>

<mosaic_0001>
module attributes {stable_mosaic.version = 11 : i64} {
  func.func @disc_kernel(%arg0: i32, %arg1: memref<8x256xf32, #tpu.memory_space<vmem>>, %arg2: memref<8x1024xf32, #tpu.memory_space<vmem>>, %arg3: memref<8x1024xf32, #tpu.memory_space<vmem>>, %arg4: memref<256x1024xbf16, #tpu.memory_space<vmem>>, %arg5: memref<1x1024xf32, #tpu.memory_space<vmem>>, %arg6: memref<1024x1024xbf16, #tpu.memory_space<vmem>>, %arg7: memref<1x1024xf32, #tpu.memory_space<vmem>>, %arg8: memref<1x1024xf32, #tpu.memory_space<vmem>>, %arg9: memref<1x1xf32, #tpu.memory_space<vmem>>, %arg10: memref<8x1xf32, #tpu.memory_space<vmem>>) attributes {dimension_semantics = [#tpu.dimension_semantics<parallel>], iteration_bounds = array<i64: 2>, scalar_prefetch = 0 : i64, scratch_operands = 0 : i64, tpu.core_type = #tpu.core_type<tc>, window_params = [{transform_indices = @transform_0, window_bounds = array<i64: 8, 256>}, {transform_indices = @transform_1, window_bounds = array<i64: 8, 1024>}, {transform_indices = @transform_2, window_bounds = array<i64: 8, 1024>}, {pipeline_mode = #tpu.pipeline_mode<synchronous>, transform_indices = @transform_3, window_bounds = array<i64: 256, 1024>}, {pipeline_mode = #tpu.pipeline_mode<synchronous>, transform_indices = @transform_4, window_bounds = array<i64: 1, 1024>}, {pipeline_mode = #tpu.pipeline_mode<synchronous>, transform_indices = @transform_5, window_bounds = array<i64: 1024, 1024>}, {pipeline_mode = #tpu.pipeline_mode<synchronous>, transform_indices = @transform_6, window_bounds = array<i64: 1, 1024>}, {pipeline_mode = #tpu.pipeline_mode<synchronous>, transform_indices = @transform_7, window_bounds = array<i64: 1, 1024>}, {pipeline_mode = #tpu.pipeline_mode<synchronous>, transform_indices = @transform_8, window_bounds = array<i64: 1, 1>}, {transform_indices = @transform_9, window_bounds = array<i64: 8, 1>}]} {
    %c0 = arith.constant 0 : index
    %c0_0 = arith.constant 0 : index
    %0 = vector.load %arg1[%c0, %c0_0] : memref<8x256xf32, #tpu.memory_space<vmem>>, vector<8x256xf32>
    %1 = arith.truncf %0 : vector<8x256xf32> to vector<8x256xbf16>
    %c0_1 = arith.constant 0 : index
    %c0_2 = arith.constant 0 : index
    %2 = vector.load %arg4[%c0_1, %c0_2] : memref<256x1024xbf16, #tpu.memory_space<vmem>>, vector<256x1024xbf16>
    %cst = arith.constant dense<0.000000e+00> : vector<8x1024xf32>
    %3 = tpu.matmul %1, %2, %cst {dimension_numbers = #tpu.dot_dimension_numbers<[1], [0], [0], [1], [0, 0, 1, 1], [], []>} : vector<8x256xbf16>, vector<256x1024xbf16>, vector<8x1024xf32> -> vector<8x1024xf32>
    %c0_3 = arith.constant 0 : index
    %c0_4 = arith.constant 0 : index
    %4 = vector.load %arg5[%c0_3, %c0_4] : memref<1x1024xf32, #tpu.memory_space<vmem>>, vector<1x1024xf32>
    %5 = vector.broadcast %4 : vector<1x1024xf32> to vector<8x1024xf32>
    %6 = arith.addf %3, %5 : vector<8x1024xf32>
    %cst_5 = arith.constant 0.000000e+00 : f32
    %7 = vector.broadcast %cst_5 : f32 to vector<8x1024xf32>
    %8 = arith.maximumf %6, %7 : vector<8x1024xf32>
    %c0_6 = arith.constant 0 : index
    %c0_7 = arith.constant 0 : index
    %9 = vector.load %arg2[%c0_6, %c0_7] : memref<8x1024xf32, #tpu.memory_space<vmem>>, vector<8x1024xf32>
    %10 = arith.mulf %8, %9 : vector<8x1024xf32>
    %11 = arith.truncf %10 : vector<8x1024xf32> to vector<8x1024xbf16>
    %c0_8 = arith.constant 0 : index
    %c0_9 = arith.constant 0 : index
    %12 = vector.load %arg6[%c0_8, %c0_9] : memref<1024x1024xbf16, #tpu.memory_space<vmem>>, vector<1024x1024xbf16>
    %cst_10 = arith.constant dense<0.000000e+00> : vector<8x1024xf32>
    %13 = tpu.matmul %11, %12, %cst_10 {dimension_numbers = #tpu.dot_dimension_numbers<[1], [0], [0], [1], [0, 0, 1, 1], [], []>} : vector<8x1024xbf16>, vector<1024x1024xbf16>, vector<8x1024xf32> -> vector<8x1024xf32>
    %c0_11 = arith.constant 0 : index
    %c0_12 = arith.constant 0 : index
    %14 = vector.load %arg7[%c0_11, %c0_12] : memref<1x1024xf32, #tpu.memory_space<vmem>>, vector<1x1024xf32>
    %15 = vector.broadcast %14 : vector<1x1024xf32> to vector<8x1024xf32>
    %16 = arith.addf %13, %15 : vector<8x1024xf32>
    %cst_13 = arith.constant 0.000000e+00 : f32
    %17 = vector.broadcast %cst_13 : f32 to vector<8x1024xf32>
    %18 = arith.maximumf %16, %17 : vector<8x1024xf32>
    %c0_14 = arith.constant 0 : index
    %c0_15 = arith.constant 0 : index
    %19 = vector.load %arg3[%c0_14, %c0_15] : memref<8x1024xf32, #tpu.memory_space<vmem>>, vector<8x1024xf32>
    %20 = arith.mulf %18, %19 : vector<8x1024xf32>
    %c0_16 = arith.constant 0 : index
    %c0_17 = arith.constant 0 : index
    %21 = vector.load %arg8[%c0_16, %c0_17] : memref<1x1024xf32, #tpu.memory_space<vmem>>, vector<1x1024xf32>
    %22 = vector.broadcast %21 : vector<1x1024xf32> to vector<8x1024xf32>
    %23 = arith.mulf %20, %22 : vector<8x1024xf32>
    %cst_18 = arith.constant dense<0.000000e+00> : vector<8xf32>
    %24 = vector.multi_reduction <add>, %23, %cst_18 [1] : vector<8x1024xf32> to vector<8xf32>
    %25 = vector.shape_cast %24 : vector<8xf32> to vector<8x1xf32>
    %c0_19 = arith.constant 0 : index
    %c0_20 = arith.constant 0 : index
    %26 = vector.load %arg9[%c0_19, %c0_20] : memref<1x1xf32, #tpu.memory_space<vmem>>, vector<1x1xf32>
    %27 = vector.broadcast %26 : vector<1x1xf32> to vector<8x1xf32>
    %28 = arith.addf %25, %27 : vector<8x1xf32>
    %c0_21 = arith.constant 0 : index
    %c0_22 = arith.constant 0 : index
    %29 = vector.load %arg10[%c0_21, %c0_22] : memref<8x1xf32, #tpu.memory_space<vmem>>, vector<8x1xf32>
    tpu.vector_store %arg10[%c0_21, %c0_22], %28 {strides = array<i32>} : memref<8x1xf32, #tpu.memory_space<vmem>>, vector<8x1xf32>,
    return
  }
  func.func @transform_0(%arg0: i32) -> (i32, i32) {
    %c0_i32 = arith.constant 0 : i32
    %c0_i32_0 = arith.constant 0 : i32
    return %arg0, %c0_i32 : i32, i32
  }
  func.func @transform_1(%arg0: i32) -> (i32, i32) {
    %c0_i32 = arith.constant 0 : i32
    %c0_i32_0 = arith.constant 0 : i32
    return %arg0, %c0_i32 : i32, i32
  }
  func.func @transform_2(%arg0: i32) -> (i32, i32) {
    %c0_i32 = arith.constant 0 : i32
    %c0_i32_0 = arith.constant 0 : i32
    return %arg0, %c0_i32 : i32, i32
  }
  func.func @transform_3(%arg0: i32) -> (i32, i32) {
    %c0_i32 = arith.constant 0 : i32
    %c0_i32_0 = arith.constant 0 : i32
    %c0_i32_1 = arith.constant 0 : i32
    return %c0_i32, %c0_i32_0 : i32, i32
  }
  func.func @transform_4(%arg0: i32) -> (i32, i32) {
    %c0_i32 = arith.constant 0 : i32
    %c0_i32_0 = arith.constant 0 : i32
    %c0_i32_1 = arith.constant 0 : i32
    return %c0_i32, %c0_i32_0 : i32, i32
  }
  func.func @transform_5(%arg0: i32) -> (i32, i32) {
    %c0_i32 = arith.constant 0 : i32
    %c0_i32_0 = arith.constant 0 : i32
    %c0_i32_1 = arith.constant 0 : i32
    return %c0_i32, %c0_i32_0 : i32, i32
  }
  func.func @transform_6(%arg0: i32) -> (i32, i32) {
    %c0_i32 = arith.constant 0 : i32
    %c0_i32_0 = arith.constant 0 : i32
    %c0_i32_1 = arith.constant 0 : i32
    return %c0_i32, %c0_i32_0 : i32, i32
  }
  func.func @transform_7(%arg0: i32) -> (i32, i32) {
    %c0_i32 = arith.constant 0 : i32
    %c0_i32_0 = arith.constant 0 : i32
    %c0_i32_1 = arith.constant 0 : i32
    return %c0_i32, %c0_i32_0 : i32, i32
  }
  func.func @transform_8(%arg0: i32) -> (i32, i32) {
    %c0_i32 = arith.constant 0 : i32
    %c0_i32_0 = arith.constant 0 : i32
    %c0_i32_1 = arith.constant 0 : i32
    return %c0_i32, %c0_i32_0 : i32, i32
  }
  func.func @transform_9(%arg0: i32) -> (i32, i32) {
    %c0_i32 = arith.constant 0 : i32
    %c0_i32_0 = arith.constant 0 : i32
    return %arg0, %c0_i32 : i32, i32
  }
}

</mosaic_0001>

<bundles_post_ra>
// kernel: tpu_custom_call.1
= control target key start
LH: loop header
LB: loop body
LE: loop exit
PB: predicated region body
PF: predicated region fallthrough
CT: control target
= control target key end

     0   :  { %s7222_s0 = inlined_call_operand.hbm [shape: f32[16,256], index: 0, kind: input, shape index: {}]   ;;  %s7223_s1 = inlined_call_operand.hbm [shape: f32[16,1024], index: 1, kind: input, shape index: {}]   ;;  %s7224_s2 = inlined_call_operand.hbm [shape: f32[16,1024], index: 2, kind: input, shape index: {}]   ;;  %s7225_s3 = inlined_call_operand.hbm [shape: bf16[256,1024], index: 3, kind: input, shape index: {}]   ;;  %s7226_s4 = inlined_call_operand.hbm [shape: f32[1,1024], index: 4, kind: input, shape index: {}]   ;;  %s7227_s5 = inlined_call_operand.hbm [shape: bf16[1024,1024], index: 5, kind: input, shape index: {}]   ;;  %s7228_s6 = inlined_call_operand.hbm [shape: f32[1,1024], index: 6, kind: input, shape index: {}]   ;;  %s7229_s7 = inlined_call_operand.hbm [shape: f32[1,1024], index: 7, kind: input, shape index: {}]   ;;  %s7230_s8 = inlined_call_operand.<no memory space> [shape: f32[1,1], index: 8, kind: input, shape index: {}]   ;;  %s7231_s9 = inlined_call_operand.vmem [shape: f32[16,1], index: 9, kind: output, shape index: {}]  }
   0x1   :  { %7248 = sst [smem:[#allocation24_spill]] %s7223_s1  ;;  %v14_v0 = vstv %s7230_s8 }
   0x2   :  { %7249 = sst [smem:[#allocation25_spill]] %s7225_s3  ;;  %15 = vst [vmem:[#allocation2] sm:$0x1] %v14_v0 }
   0x3   :  { %7250 = sst [smem:[#allocation26_spill]] %s7227_s5 }
   0x4   :  { %7251 = sst [smem:[#allocation27_spill]] %s7231_s9 }
   0x5   :  { %16 = vsyncpa [#allocation4], 0 }
   0x6   :  { %18 = vsyncpa [#allocation4 + $0x1], 0 }
   0x7   :  { %19 = vsyncpa [#allocation6], 0 }
   0x8   :  { %21 = vsyncpa [#allocation6 + $0x1], 0 }
   0x9   :  { %22 = vsyncpa [#allocation9], 0 }
   0xa   :  { %23 = vsyncpa [#allocation12], 0 }
   0xb   :  { %24 = vsyncpa [#allocation15], 0  ;;  %s6697_s11 = smov 0   ;;  %s6699_s12 = smov 0  }
   0xc   :  { %s6701_s13 = smov 0   ;;  %s6703_s14 = smov 0  }
   0xd LB: > { %7252 = sst [smem:[#allocation21_spill]] %s6628_s13  ;;  %s6634_s8 = smov [#allocation8]   ;;  %s6632_s14 = sphi %s6703_s14, %s7280_s14   ;;  %s6628_s13 = sphi %s6701_s13, %s7282_s13   ;;  %s6624_s12 = sphi %s6699_s12, %s7284_s12   ;;  %s6620_s11 = sphi %s6697_s11, %s7283_s11  }
   0xe   : > { %s277_s15 = sshll.u32 %s6634_s8, 4  ;;  %s6718_s16 = sadd.s32 4294967295, %s6632_s14   ;;  %s6723_s15 = int_to_ptr.vmem [resolvable:$true] %s277_s15 }
   0xf   : > { %p5521_p0 = scmp.ge.s32.totalorder %s6632_s14, 1  ;;  %p7234_p1 = scmp.eq.s32.totalorder %s6718_s16, 0 }
  0x10   : > { %p265_p2 = scmp.lt.s32.totalorder %s6632_s14, 3  ;;  %s6635_s18 = smov [#allocation11]  }
  0x11   : > { %s301_s19 = sshll.u32 %s6635_s18, 4  ;;  %s7255_s3 = sld [smem:[#allocation25_spill]]  ;;  %s6737_s19 = int_to_ptr.vmem [resolvable:$true] %s301_s19 }
  0x12   : > { %p6725_p3 = pnand %p5521_p0, %p265_p2 }
  0x14   : > { %s7253_s17 = scalar_select %p6725_p3, 1, 0 }
  0x15   : > { %p6275_p4 = pneg %p6725_p3 }
  0x17   : > { %p6733_p5 = pnand %p6275_p4, %p7234_p1  ;;  %s6352_s23 = scalar_lea.hbm %s7255_s3, 16384 }
  0x18   : > { %p6353_p6 = scmp.ne.s32.totalorder %s7255_s3, %s6352_s23  ;;  %p6359_p10 = scmp.lt.u32.totalorder %s6352_s23, %s7255_s3 }
  0x19   : > { %s7254_s20 = scalar_select %p6733_p5, 1, 0 }
  0x1a   : > { %p6747_p7 = pneg %p6733_p5 }
  0x1c   : > { %s7256_s26 = scalar_select %p6747_p7, 1, 0 }
  0x1d   : > { %p6355_p8 = pnand %p6747_p7, %p6353_p6 }
  0x1f   : > { %p6356_p9 = pneg %p6355_p8 }
  0x21   : > { %p6361_p11 = pnand %p6359_p10, %p6356_p9 }
  0x23   : > { %6364 = shalt.err (!%p6361_p11)
}
  0x24   : > { %s6365_s29 = scalar_lea.vmem %s6723_s15, 16384  ;;  %p6373_p2 = scmp.lt.s32.totalorder %s6723_s15, %s6723_s15 }
  0x25   : > { %p6366_p12 = scmp.ne.s32.totalorder %s6723_s15, %s6365_s29  ;;  %p6374_p4 = scmp.lt.s32.totalorder %s6365_s29, %s6365_s29 }
  0x27   : > { %p6368_p13 = pnand %p6366_p12, %p6747_p7  ;;  %p6375_p6 = por %p6374_p4, %p6373_p2 }
  0x29   : > { %p6369_p0 = pneg %p6368_p13 }
  0x2b   : > { %p6376_p8 = pnand %p6375_p6, %p6369_p0 }
  0x2d   : > { %6379 = shalt.err (!%p6376_p8)
}
  0x2e   : > { %s6636_s30 = smov 512   ;;  %s6637_s10 = smov 32  }
  0x2f   : > { %6278 = dma.hbm_to_vmem [thread:$0]  (!%p6733_p5), %s7255_s3, 16384, %s6723_s15, [#allocation9], %s6636_s30, %s6636_s30, %s6637_s10  }
  0x30   : > { %s7257_s5 = sld [smem:[#allocation26_spill]] }
  0x36   : > { %s6380_s23 = scalar_lea.hbm %s7257_s5, 65536 }
  0x37   : > { %p6381_p9 = scmp.ne.s32.totalorder %s7257_s5, %s6380_s23  ;;  %p6387_p12 = scmp.lt.u32.totalorder %s6380_s23, %s7257_s5 }
  0x39   : > { %p6383_p10 = pnand %p6381_p9, %p6747_p7 }
  0x3b   : > { %p6384_p11 = pneg %p6383_p10 }
  0x3d   : > { %p6389_p13 = pnand %p6387_p12, %p6384_p11 }
  0x3f   : > { %6392 = shalt.err (!%p6389_p13)
}
  0x40   : > { %s6393_s15 = scalar_lea.vmem %s6737_s19, 65536  ;;  %p6401_p6 = scmp.lt.s32.totalorder %s6737_s19, %s6737_s19 }
  0x41   : > { %p6394_p0 = scmp.ne.s32.totalorder %s6737_s19, %s6393_s15  ;;  %p6402_p8 = scmp.lt.s32.totalorder %s6393_s15, %s6393_s15 }
  0x43   : > { %p6396_p2 = pnand %p6394_p0, %p6747_p7  ;;  %p6403_p9 = por %p6402_p8, %p6401_p6 }
  0x45   : > { %p6397_p4 = pneg %p6396_p2 }
  0x47   : > { %p6404_p10 = pnand %p6403_p9, %p6397_p4 }
  0x49   : > { %6407 = shalt.err (!%p6404_p10)
}
  0x4a   : > { %6284 = dma.hbm_to_vmem [thread:$0]  (!%p6733_p5), %s7257_s5, 65536, %s6737_s19, [#allocation12], %s6636_s30, %s6636_s30, %s6637_s10  }
  0x4b   : > { %s6792_s18 = sadd.s32 1, %s6632_s14   ;;  %s37_s21 = sadd.s32 1, %s6628_s13 }
  0x4c   : > { %7258 = sst [smem:[#allocation22_spill]] %s6792_s18  ;;  %s34_s22 = ssub.s32 %s6632_s14, %s6792_s18 }
  0x4d   : > { %p44_p11 = scmp.ne.s32.totalorder %s6628_s13, %s6624_s12  ;;  %p35_p12 = scmp.eq.s32.totalorder %s34_s22, 0 }
  0x4e   : > { %p45_p13 = scmp.eq.s32.totalorder %s6632_s14, 0  ;;  %p50_p0 = scmp.ne.s32.totalorder %s6624_s12, %s6620_s11 }
  0x4f   : > { %p6306_p2 = scmp.lt.s32.totalorder %s6632_s14, 2  ;;  %s6813_s19 = sand.u32 1, %s6628_s13  }
  0x50   : > { %s6804_s23 = scalar_select %p35_p12, %s6628_s13, %s37_s21  }
  0x51   : > { %p46_p4 = por %p45_p13, %p44_p11  ;;  %p6808_p6 = por %p7234_p1, %p50_p0 }
  0x52   : > { %7259 = sst [smem:[#allocation23_spill]] %s6804_s23  ;;  %s359_s30 = sand.u32 1, %s6632_s14  }
  0x53   : > { %s7260_s24 = scalar_select %p6808_p6, 1, 0 }
  0x54   : > { %p6816_p8 = pnand %p6306_p2, %p46_p4  ;;  %s7232_s11 = sshll.u32 %s6813_s19, 6 }
  0x55   : > { %s7233_s25 = sshll.u32 %s6632_s14, 10  ;;  %s7262_s1 = sld [smem:[#allocation24_spill]] }
  0x56   : > { %s7261_s10 = scalar_select %p6816_p8, 1, 0 }
  0x57   : > { %s363_s29 = scalar_lea.vmem [#allocation5], %s7232_s11  ;;  %s6833_s21 = scalar_lea.sflag [#allocation6], %s359_s30 }
  0x58   : > { %s371_s8 = sshll.u32 %s363_s29, 4  ;;  %p6839_p10 = pneg %p6816_p8  ;;  %s6831_s8 = int_to_ptr.vmem [resolvable:$true] %s371_s8 }
  0x5a   : > { %s7263_s3 = scalar_select %p6839_p10, 1, 0 }
  0x5b   : > { %s6827_s15 = scalar_lea.hbm %s7262_s1, %s7233_s25  ;;  %s6413_s11 = scalar_lea.hbm %s7262_s1, 2048 }
  0x5c   : > { %s6408_s22 = scalar_lea.hbm %s6827_s15, 1024  ;;  %p6414_p13 = scmp.lt.u32.totalorder %s6827_s15, %s7262_s1 }
  0x5d   : > { %p6409_p9 = scmp.ne.s32.totalorder %s6827_s15, %s6408_s22  ;;  %p6415_p0 = scmp.lt.u32.totalorder %s6413_s11, %s6408_s22 }
  0x5e   : > { %p6417_p4 = scmp.lt.u32.totalorder %s6408_s22, %s6827_s15 }
  0x5f   : > { %p6411_p11 = pnand %p6839_p10, %p6409_p9  ;;  %p6416_p2 = por %p6415_p0, %p6414_p13 }
  0x61   : > { %p6412_p12 = pneg %p6411_p11  ;;  %p6418_p1 = por %p6417_p4, %p6416_p2 }
  0x63   : > { %p6419_p6 = pnand %p6418_p1, %p6412_p12 }
  0x65   : > { %6422 = shalt.err (!%p6419_p6)
}
  0x66   : > { %s6423_s30 = scalar_lea.vmem %s6831_s8, 1024  ;;  %s6638_s27 = smov [#allocation5]  }
  0x67   : > { %p6424_p9 = scmp.ne.s32.totalorder %s6831_s8, %s6423_s30  ;;  %s6428_s28 = sshll.u32 %s6638_s27, 4  ;;  %s6429_s28 = int_to_ptr.vmem [resolvable:$false] %s6428_s28 }
  0x68   : > { %s6430_s25 = scalar_lea.vmem %s6429_s28, 2048  ;;  %p6431_p5 = scmp.lt.s32.totalorder %s6831_s8, %s6429_s28 }
  0x69   : > { %p6426_p11 = pnand %p6424_p9, %p6839_p10  ;;  %p6432_p7 = scmp.lt.s32.totalorder %s6430_s25, %s6423_s30 }
  0x6b   : > { %p6427_p3 = pneg %p6426_p11  ;;  %p6433_p13 = por %p6432_p7, %p6431_p5 }
  0x6d   : > { %p6434_p0 = pnand %p6433_p13, %p6427_p3 }
  0x6f   : > { %6437 = shalt.err (!%p6434_p0)
}
  0x70   : > { %6297 = dma.hbm_to_vmem [thread:$0]  (!%p6816_p8), %s6827_s15, 1024, %s6831_s8, %s6833_s21  }
  0x71   : > { %s7264_s11 = sshll.u32 %s6632_s14, 10  ;;  %s6639_s1 = smov [#allocation10]  }
  0x72   : > { %s6868_s27 = scalar_lea.hbm %s7224_s2, %s7264_s11  ;;  %s291_s28 = sshll.u32 %s6639_s1, 4  ;;  %s292_s28 = int_to_ptr.vmem [resolvable:$true] %s291_s28 }
  0x73   : > { %s6640_s30 = smov [#allocation13]   ;;  %s6438_s13 = scalar_lea.hbm %s7226_s4, 128 }
  0x74   : > { %s315_s25 = sshll.u32 %s6640_s30, 4  ;;  %p6439_p1 = scmp.ne.s32.totalorder %s7226_s4, %s6438_s13  ;;  %s316_s25 = int_to_ptr.vmem [resolvable:$true] %s315_s25 }
  0x75   : > { %p7265_p3 = scmp.ne.s32.totalorder %s7256_s26, 0  ;;  %p6445_p6 = scmp.lt.u32.totalorder %s6438_s13, %s7226_s4 }
  0x77   : > { %p6441_p5 = pnand %p6439_p1, %p7265_p3 }
  0x79   : > { %p6442_p7 = pneg %p6441_p5 }
  0x7b   : > { %p6447_p12 = pnand %p6445_p6, %p6442_p7 }
  0x7d   : > { %6450 = shalt.err (!%p6447_p12)
}
  0x7e   : > { %s6451_s1 = scalar_lea.vmem %s292_s28, 128  ;;  %p6459_p11 = scmp.lt.s32.totalorder %s292_s28, %s292_s28 }
  0x7f   : > { %p6452_p2 = scmp.ne.s32.totalorder %s292_s28, %s6451_s1  ;;  %p6460_p13 = scmp.lt.s32.totalorder %s6451_s1, %s6451_s1 }
  0x81   : > { %p6454_p4 = pnand %p6452_p2, %p7265_p3  ;;  %p6461_p0 = por %p6460_p13, %p6459_p11 }
  0x83   : > { %p6455_p9 = pneg %p6454_p4 }
  0x85   : > { %p6462_p8 = pnand %p6461_p0, %p6455_p9 }
  0x87   : > { %6465 = shalt.err (!%p6462_p8)
}
  0x88   : > { %p7266_p1 = scmp.ne.s32.totalorder %s7254_s20, 0  ;;  %s6466_s23 = scalar_lea.hbm %s7228_s6, 128 }
  0x89   : > { %p6467_p5 = scmp.ne.s32.totalorder %s7228_s6, %s6466_s23  ;;  %p6473_p8 = scmp.lt.u32.totalorder %s6466_s23, %s7228_s6 }
  0x8a   : > { %6281 = dma.hbm_to_vmem [thread:$0]  (!%p7266_p1), %s7226_s4, 128, %s292_s28, [#allocation9]  }
  0x8b   : > { %p6469_p7 = pnand %p6467_p5, %p7265_p3 }
  0x8d   : > { %p6470_p6 = pneg %p6469_p7 }
  0x8f   : > { %p6475_p12 = pnand %p6473_p8, %p6470_p6 }
  0x91   : > { %6478 = shalt.err (!%p6475_p12)
}
  0x92   : > { %s6479_s15 = scalar_lea.vmem %s316_s25, 128  ;;  %p6487_p11 = scmp.lt.s32.totalorder %s316_s25, %s316_s25 }
  0x93   : > { %p6480_p2 = scmp.ne.s32.totalorder %s316_s25, %s6479_s15  ;;  %p6488_p13 = scmp.lt.s32.totalorder %s6479_s15, %s6479_s15 }
  0x95   : > { %p6482_p4 = pnand %p6480_p2, %p7265_p3  ;;  %p6489_p0 = por %p6488_p13, %p6487_p11 }
  0x97   : > { %p6483_p9 = pneg %p6482_p4 }
  0x99   : > { %p6490_p10 = pnand %p6489_p0, %p6483_p9 }
  0x9b   : > { %6493 = shalt.err (!%p6490_p10)
}
  0x9c   : > { %6287 = dma.hbm_to_vmem [thread:$0]  (!%p7266_p1), %s7228_s6, 128, %s316_s25, [#allocation12]  }
  0x9d   : > { %s6641_s1 = smov [#allocation14]   ;;  %s5528_s9 = sshll.u32 %s6813_s19, 4 }
  0x9e   : > { %s326_s5 = sshll.u32 %s6641_s1, 4  ;;  %s6494_s23 = scalar_lea.hbm %s7229_s7, 128  ;;  %s327_s5 = int_to_ptr.vmem [resolvable:$true] %s326_s5 }
  0x9f   : > { %p6495_p10 = scmp.ne.s32.totalorder %s7229_s7, %s6494_s23  ;;  %p6501_p6 = scmp.lt.u32.totalorder %s6494_s23, %s7229_s7 }
  0xa1   : > { %p6497_p5 = pnand %p6495_p10, %p7265_p3 }
  0xa3   : > { %p6498_p7 = pneg %p6497_p5 }
  0xa5   : > { %p6503_p8 = pnand %p6501_p6, %p6498_p7 }
  0xa7   : > { %6506 = shalt.err (!%p6503_p8)
}
  0xa8   : > { %s6507_s25 = scalar_lea.vmem %s327_s5, 128  ;;  %p6515_p9 = scmp.lt.s32.totalorder %s327_s5, %s327_s5 }
  0xa9   : > { %p6508_p12 = scmp.ne.s32.totalorder %s327_s5, %s6507_s25  ;;  %p6516_p11 = scmp.lt.s32.totalorder %s6507_s25, %s6507_s25 }
  0xab   : > { %p6510_p2 = pnand %p6508_p12, %p7265_p3  ;;  %p6517_p13 = por %p6516_p11, %p6515_p9 }
  0xad   : > { %p6511_p4 = pneg %p6510_p2 }
  0xaf   : > { %p6518_p0 = pnand %p6517_p13, %p6511_p4 }
  0xb1   : > { %6521 = shalt.err (!%p6518_p0)
}
  0xb2   : > { %6290 = dma.hbm_to_vmem [thread:$0]  (!%p7266_p1), %s7229_s7, 128, %s327_s5, [#allocation15]  }
  0xb3   : > { %s6190_s8 = sshll.u32 %s6632_s14, 8  ;;  %s344_s18 = scalar_lea.vmem [#allocation3], %s5528_s9 }
  0xb4   : > { %s6929_s13 = scalar_lea.hbm %s7222_s0, %s6190_s8  ;;  %s352_s20 = sshll.u32 %s344_s18, 4  ;;  %s6931_s20 = int_to_ptr.vmem [resolvable:$true] %s352_s20 }
  0xb5   : > { %s7267_s23 = sshll.u32 %s6813_s19, 6  ;;  %s341_s5 = scalar_lea.sflag [#allocation4], %s6813_s19 }
  0xb6   : > { %s6935_s11 = scalar_lea.vmem [#allocation7], %s7267_s23  ;;  %s6522_s14 = scalar_lea.hbm %s6929_s13, 256 }
  0xb7   : > { %s390_s22 = sshll.u32 %s6935_s11, 4  ;;  %p6523_p3 = scmp.ne.s32.totalorder %s6929_s13, %s6522_s14  ;;  %s391_s22 = int_to_ptr.vmem [resolvable:$true] %s390_s22 }
  0xb8   : > { %p7268_p1 = scmp.ne.s32.totalorder %s7263_s3, 0  ;;  %s6527_s25 = scalar_lea.hbm %s7222_s0, 512 }
  0xb9   : > { %p6528_p7 = scmp.lt.u32.totalorder %s6929_s13, %s7222_s0  ;;  %p6529_p6 = scmp.lt.u32.totalorder %s6527_s25, %s6522_s14 }
  0xba   : > { %p6525_p10 = pnand %p6523_p3, %p7268_p1  ;;  %p6531_p12 = scmp.lt.u32.totalorder %s6522_s14, %s6929_s13 }
  0xbb   : > { %p6530_p8 = por %p6529_p6, %p6528_p7 }
  0xbc   : > { %p6526_p5 = pneg %p6525_p10 }
  0xbd   : > { %p6532_p2 = por %p6531_p12, %p6530_p8 }
  0xbf   : > { %p6533_p4 = pnand %p6532_p2, %p6526_p5 }
  0xc1   : > { %6536 = shalt.err (!%p6533_p4)
}
  0xc2   : > { %s6537_s19 = scalar_lea.vmem %s6931_s20, 256  ;;  %s6642_s28 = smov [#allocation3]  }
  0xc3   : > { %p6538_p9 = scmp.ne.s32.totalorder %s6931_s20, %s6537_s19  ;;  %s6542_s8 = sshll.u32 %s6642_s28, 4  ;;  %s6543_s8 = int_to_ptr.vmem [resolvable:$false] %s6542_s8 }
  0xc4   : > { %s6544_s1 = scalar_lea.vmem %s6543_s8, 512  ;;  %p6545_p0 = scmp.lt.s32.totalorder %s6931_s20, %s6543_s8 }
  0xc5   : > { %p6540_p11 = pnand %p6538_p9, %p7268_p1  ;;  %p6546_p3 = scmp.lt.s32.totalorder %s6544_s1, %s6537_s19 }
  0xc7   : > { %p6541_p13 = pneg %p6540_p11  ;;  %p6547_p10 = por %p6546_p3, %p6545_p0 }
  0xc9   : > { %p6548_p7 = pnand %p6547_p10, %p6541_p13 }
  0xcb   : > { %6551 = shalt.err (!%p6548_p7)
}
  0xcc   : > { %p7269_p5 = scmp.ne.s32.totalorder %s7261_s10, 0  ;;  %s6552_s26 = scalar_lea.hbm %s6868_s27, 1024 }
  0xcd   : > { %p6553_p6 = scmp.ne.s32.totalorder %s6868_s27, %s6552_s26  ;;  %s6557_s14 = scalar_lea.hbm %s7224_s2, 2048 }
  0xce   : > { %6294 = dma.hbm_to_vmem [thread:$0]  (!%p7269_p5), %s6929_s13, 256, %s6931_s20, %s341_s5  }
  0xcf   : > { %p6555_p8 = pnand %p6553_p6, %p7268_p1  ;;  %p6558_p2 = scmp.lt.u32.totalorder %s6868_s27, %s7224_s2 }
  0xd0   : > { %p6559_p4 = scmp.lt.u32.totalorder %s6557_s14, %s6552_s26  ;;  %p6561_p11 = scmp.lt.u32.totalorder %s6552_s26, %s6868_s27 }
  0xd1   : > { %p6556_p12 = pneg %p6555_p8 }
  0xd2   : > { %p6560_p9 = por %p6559_p4, %p6558_p2 }
  0xd4   : > { %p6562_p13 = por %p6561_p11, %p6560_p9 }
  0xd6   : > { %p6563_p0 = pnand %p6562_p13, %p6556_p12 }
  0xd8   : > { %6566 = shalt.err (!%p6563_p0)
}
  0xd9   : > { %s6567_s13 = scalar_lea.vmem %s391_s22, 1024  ;;  %s6643_s20 = smov [#allocation7]  }
  0xda   : > { %p6568_p3 = scmp.ne.s32.totalorder %s391_s22, %s6567_s13  ;;  %s6572_s11 = sshll.u32 %s6643_s20, 4  ;;  %s6573_s11 = int_to_ptr.vmem [resolvable:$false] %s6572_s11 }
  0xdb   : > { %s6574_s5 = scalar_lea.vmem %s6573_s11, 2048  ;;  %p6575_p6 = scmp.lt.s32.totalorder %s391_s22, %s6573_s11 }
  0xdc   : > { %p6570_p10 = pnand %p6568_p3, %p7268_p1  ;;  %p6576_p8 = scmp.lt.s32.totalorder %s6574_s5, %s6567_s13 }
  0xde   : > { %p6571_p7 = pneg %p6570_p10  ;;  %p6577_p5 = por %p6576_p8, %p6575_p6 }
  0xe0   : > { %p6578_p2 = pnand %p6577_p5, %p6571_p7 }
  0xe2   : > { %6581 = shalt.err (!%p6578_p2)
}
  0xe3   : > { %p7270_p4 = scmp.ne.s32.totalorder %s7261_s10, 0  ;;  %p7271_p12 = scmp.ne.s32.totalorder %s7253_s17, 0 }
  0xe4   : > { %s401_s3 = sand.u32 (!%p7271_p12), 1, %s6624_s12   ;;  %p7272_p1 = scmp.ne.s32.totalorder (!%p7271_p12), %s7260_s24, 0 }
  0xe5   : > { %6300 = dma.hbm_to_vmem [thread:$0]  (!%p7270_p4), %s6868_s27, 1024, %s391_s22, %s6833_s21  }
  0xe6   : > { %399 = sbr.rel (%p7271_p12) target bundleno = 1361 (0x551), region = 56  ;;  %s5538_s25 = sshll.u32 (!%p7271_p12), %s401_s3, 4 }
  0xe7   : > { %s402_s15 = scalar_lea.sflag (!%p7271_p12), [#allocation4], %s401_s3  ;;  %s6983_s9 = scalar_lea.vmem (!%p7271_p12), [#allocation3], %s5538_s25 }
  0xed   : > { %6599 = dma.done.wait (%p7272_p1), %s402_s15, 256  }
  0xee   : > { %6601 = vsyncadd (%p7272_p1), %s402_s15, 4294967040  ;;  %s410_s10 = sand.u32 1, %s6718_s16   ;;  %s5539_s19 = sshll.u32 %s401_s3, 6 }
  0xef   : > { %s411_s21 = scalar_lea.sflag [#allocation6], %s410_s10  ;;  %s6990_s27 = scalar_lea.vmem [#allocation5], %s5539_s19 }
  0xf0   : > { %6603 = dma.done.wait (%p7272_p1), %s411_s21, 2048  }
  0xf1   : > { %6605 = vsyncadd (%p7272_p1), %s411_s21, 4294965248  ;;  %s6996_s17 = scalar_lea.vmem [#allocation7], %s5539_s19  ;;  %p7273_p5 = scmp.eq.s32.totalorder %s6718_s16, 0 }
  0xf3   : > { %6607 = dma.done.wait (%p7273_p5), [#allocation9], 16512   ;;  %p7274_p9 = pmov %p7273_p5 }
  0xf4   : > { %p7275_p11 = pmov %p7273_p5 }
  0xf5   : > { %6609 = vsyncadd (%p7274_p9), [#allocation9], 4294950784 }
  0xf6   : > { %6611 = dma.done.wait (%p7275_p11), [#allocation12], 65664   ;;  %p7276_p13 = pmov %p7273_p5 }
  0xf7   : > { %p7277_p0 = pmov %p7273_p5 }
  0xf8   : > { %6613 = vsyncadd (%p7276_p13), [#allocation12], 4294901632 }
  0xf9   : > { %6615 = dma.done.wait (%p7277_p0), [#allocation15], 128   ;;  %p7278_p3 = pmov %p7277_p0 }
  0xfa   : > { %v495_v1 = vld [vmem:[#allocation8] sm:$0xff]  ;;  %v496_v18 = vld [vmem:[#allocation8 + $0x8] sm:$0xff]  ;;  %p487_p10 = scmp.lt.s32.totalorder %s6718_s16, 1  ;;  %s7279_s8 = sld [smem:[#allocation27_spill]]  ;;  %vm5362_vm0 = vcmask 7168  }
  0xfb   : > { %6617 = vsyncadd (%p7278_p3), [#allocation15], 4294967168  ;;  %v499_v2 = vld [vmem:[#allocation8 + $0x20] sm:$0xff]  ;;  %v500_v19 = vld [vmem:[#allocation8 + $0x28] sm:$0xff] }
  0xfc   : > { %v503_v3 = vld [vmem:[#allocation8 + $0x40] sm:$0xff]  ;;  %v5548_v4 = vcombine.high %v495_v1, %v499_v2  ;;  %v5547_v5 = vcombine.low %v495_v1, %v499_v2  ;;  %v492_v20 = vld [vmem:[%s6983_s9 + $0x8] sm:$0xff]  ;;  %v5550_v22 = vcombine.high %v496_v18, %v500_v19  ;;  %v5549_v23 = vcombine.low %v496_v18, %v500_v19  ;;  %s7286_s16 = smov (!%p487_p10, %s6718_s16), 1 }
  0xfd   : > { %v507_v6 = vld [vmem:[#allocation8 + $0x60] sm:$0xff]  ;;  %v7011_v24 = vpack.c.bf16 %v492_v20, %v492_v20  ;;  %v504_v25 = vld [vmem:[#allocation8 + $0x48] sm:$0xff]  ;;  %s5546_s24 = sshll.u32 %s7286_s16, 3 }
  0xfe   : > { %v5556_v7 = vcombine.high %v503_v3, %v507_v6  ;;  %v511_v8 = vld [vmem:[#allocation8 + $0x80] sm:$0xff]  ;;  %1305 = vmatprep.subr.bf16.mxu0 %v5548_v4  ;;  %v5555_v10 = vcombine.low %v503_v3, %v507_v6  ;;  %v508_v26 = vld [vmem:[#allocation8 + $0x68] sm:$0xff]  ;;  %1346 = vmatprep.subr.bf16.mxu1 %v5550_v22 }
  0xff   : > { %v515_v9 = vld [vmem:[#allocation8 + $0xa0] sm:$0xff]  ;;  %1306 = vmatpush1.bf16.msra.mxu0 %v5547_v5  ;;  %v5558_v28 = vcombine.high %v504_v25, %v508_v26  ;;  %v512_v29 = vld [vmem:[#allocation8 + $0x88] sm:$0xff]  ;;  %1337 = vmatprep.mubr.bf16.mxu0 %v7011_v24  ;;  %v5557_v33 = vcombine.low %v504_v25, %v508_v26 }
 0x100   : > { %1307 = vmatprep.subr.bf16.mxu0 %v5556_v7  ;;  %v5564_v11 = vcombine.high %v511_v8, %v515_v9  ;;  %v519_v12 = vld [vmem:[#allocation8 + $0xc0] sm:$0xff]  ;;  %v5563_v14 = vcombine.low %v511_v8, %v515_v9  ;;  %v516_v30 = vld [vmem:[#allocation8 + $0xa8] sm:$0xff]  ;;  %1347 = vmatpush1.bf16.msra.mxu1 %v5549_v23  ;;  %s490_s1 = scalar_lea.vmem %s7279_s8, %s5546_s24 }
 0x101   : > { %v523_v13 = vld [vmem:[#allocation8 + $0xe0] sm:$0xff]  ;;  %1378 = vmatprep.mubr.bf16.mxu1 %v7011_v24  ;;  %1348 = vmatprep.subr.bf16.mxu1 %v5558_v28  ;;  %v5566_v35 = vcombine.high %v512_v29, %v516_v30  ;;  %v520_v37 = vld [vmem:[#allocation8 + $0xc8] sm:$0xff]  ;;  %v5565_v41 = vcombine.low %v512_v29, %v516_v30 }
 0x102   : > { %v5572_v15 = vcombine.high %v519_v12, %v523_v13  ;;  %v527_v16 = vld [vmem:[#allocation8 + $0x100] sm:$0xff]  ;;  %v5571_v21 = vcombine.low %v519_v12, %v523_v13  ;;  %v524_v38 = vld [vmem:[#allocation8 + $0xe8] sm:$0xff] }
 0x103   : > { %1308 = vmatpush1.bf16.msra.mxu0 %v5555_v10  ;;  %v531_v17 = vld [vmem:[#allocation8 + $0x120] sm:$0xff]  ;;  %v5574_v43 = vcombine.high %v520_v37, %v524_v38  ;;  %v528_v45 = vld [vmem:[#allocation8 + $0x108] sm:$0xff]  ;;  %v5573_v49 = vcombine.low %v520_v37, %v524_v38 }
 0x104   : > { %1309 = vmatprep.subr.bf16.mxu0 %v5564_v11  ;;  %v5580_v27 = vcombine.high %v527_v16, %v531_v17  ;;  %v535_v31 = vld [vmem:[#allocation8 + $0x140] sm:$0xff]  ;;  %v5579_v34 = vcombine.low %v527_v16, %v531_v17  ;;  %1349 = vmatpush1.bf16.msra.mxu1 %v5557_v33  ;;  %v532_v46 = vld [vmem:[#allocation8 + $0x128] sm:$0xff] }
 0x105   : > { %v539_v32 = vld [vmem:[#allocation8 + $0x160] sm:$0xff]  ;;  %1350 = vmatprep.subr.bf16.mxu1 %v5566_v35  ;;  %v5582_v51 = vcombine.high %v528_v45, %v532_v46  ;;  %v536_v53 = vld [vmem:[#allocation8 + $0x148] sm:$0xff]  ;;  %v5581_v57 = vcombine.low %v528_v45, %v532_v46 }
 0x106   : > { %v5588_v36 = vcombine.high %v535_v31, %v539_v32  ;;  %v543_v39 = vld [vmem:[#allocation8 + $0x180] sm:$0xff]  ;;  %v5587_v42 = vcombine.low %v535_v31, %v539_v32  ;;  %v540_v54 = vld [vmem:[#allocation8 + $0x168] sm:$0xff] }
 0x107   : > { %1310 = vmatpush1.bf16.msra.mxu0 %v5563_v14  ;;  %v547_v40 = vld [vmem:[#allocation8 + $0x1a0] sm:$0xff]  ;;  %v5590_v59 = vcombine.high %v536_v53, %v540_v54  ;;  %v544_v61 = vld [vmem:[#allocation8 + $0x188] sm:$0xff]  ;;  %v5589_v1 = vcombine.low %v536_v53, %v540_v54 }
 0x108   : > { %1311 = vmatprep.subr.bf16.mxu0 %v5572_v15  ;;  %v5596_v44 = vcombine.high %v543_v39, %v547_v40  ;;  %v551_v47 = vld [vmem:[#allocation8 + $0x1c0] sm:$0xff]  ;;  %1351 = vmatpush1.bf16.msra.mxu1 %v5565_v41  ;;  %v5595_v50 = vcombine.low %v543_v39, %v547_v40  ;;  %v548_v62 = vld [vmem:[#allocation8 + $0x1a8] sm:$0xff] }
 0x109   : > { %v555_v48 = vld [vmem:[#allocation8 + $0x1e0] sm:$0xff]  ;;  %1352 = vmatprep.subr.bf16.mxu1 %v5574_v43  ;;  %v5598_v3 = vcombine.high %v544_v61, %v548_v62  ;;  %v552_v5 = vld [vmem:[#allocation8 + $0x1c8] sm:$0xff]  ;;  %v5597_v9 = vcombine.low %v544_v61, %v548_v62 }
 0x10a   : > { %v5604_v52 = vcombine.high %v551_v47, %v555_v48  ;;  %v559_v55 = vld [vmem:[#allocation8 + $0x200] sm:$0xff]  ;;  %v5603_v58 = vcombine.low %v551_v47, %v555_v48  ;;  %v556_v6 = vld [vmem:[#allocation8 + $0x1e8] sm:$0xff] }
 0x10b   : > { %1312 = vmatpush1.bf16.msra.mxu0 %v5571_v21  ;;  %v563_v56 = vld [vmem:[#allocation8 + $0x220] sm:$0xff]  ;;  %v5606_v11 = vcombine.high %v552_v5, %v556_v6  ;;  %v560_v13 = vld [vmem:[#allocation8 + $0x208] sm:$0xff]  ;;  %v5605_v17 = vcombine.low %v552_v5, %v556_v6 }
 0x10c   : > { %1313 = vmatprep.subr.bf16.mxu0 %v5580_v27  ;;  %1353 = vmatpush1.bf16.msra.mxu1 %v5573_v49  ;;  %v5612_v60 = vcombine.high %v559_v55, %v563_v56  ;;  %v567_v63 = vld [vmem:[#allocation8 + $0x240] sm:$0xff]  ;;  %v5611_v2 = vcombine.low %v559_v55, %v563_v56  ;;  %v564_v14 = vld [vmem:[#allocation8 + $0x228] sm:$0xff]  ;;  %v497_v56 = vld [vmem:[#allocation8 + $0x10] sm:$0xff] }
 0x10d   : > { %1354 = vmatprep.subr.bf16.mxu1 %v5582_v51  ;;  %v571_v0 = vld [vmem:[#allocation8 + $0x260] sm:$0xff]  ;;  %v5614_v19 = vcombine.high %v560_v13, %v564_v14  ;;  %v568_v21 = vld [vmem:[#allocation8 + $0x248] sm:$0xff]  ;;  %v5613_v26 = vcombine.low %v560_v13, %v564_v14 }
 0x10e   : > { %v5620_v4 = vcombine.high %v567_v63, %v571_v0  ;;  %v575_v7 = vld [vmem:[#allocation8 + $0x280] sm:$0xff]  ;;  %v5619_v10 = vcombine.low %v567_v63, %v571_v0  ;;  %v572_v22 = vld [vmem:[#allocation8 + $0x268] sm:$0xff] }
 0x10f   : > { %1314 = vmatpush1.bf16.msra.mxu0 %v5579_v34  ;;  %v579_v8 = vld [vmem:[#allocation8 + $0x2a0] sm:$0xff]  ;;  %v5622_v28 = vcombine.high %v568_v21, %v572_v22  ;;  %v576_v30 = vld [vmem:[#allocation8 + $0x288] sm:$0xff]  ;;  %v5621_v34 = vcombine.low %v568_v21, %v572_v22 }
 0x110   : > { %1315 = vmatprep.subr.bf16.mxu0 %v5588_v36  ;;  %1355 = vmatpush1.bf16.msra.mxu1 %v5581_v57  ;;  %v5628_v12 = vcombine.high %v575_v7, %v579_v8  ;;  %v583_v15 = vld [vmem:[#allocation8 + $0x2c0] sm:$0xff]  ;;  %v5627_v18 = vcombine.low %v575_v7, %v579_v8  ;;  %v580_v31 = vld [vmem:[#allocation8 + $0x2a8] sm:$0xff]  ;;  %v501_v57 = vld [vmem:[#allocation8 + $0x30] sm:$0xff] }
 0x111   : > { %1356 = vmatprep.subr.bf16.mxu1 %v5590_v59  ;;  %v587_v16 = vld [vmem:[#allocation8 + $0x2e0] sm:$0xff]  ;;  %v5630_v36 = vcombine.high %v576_v30, %v580_v31  ;;  %v584_v38 = vld [vmem:[#allocation8 + $0x2c8] sm:$0xff]  ;;  %v5552_v0 = vcombine.high %v497_v56, %v501_v57  ;;  %v5551_v6 = vcombine.low %v497_v56, %v501_v57  ;;  %v538_v56 = vld [vmem:[#allocation8 + $0x158] sm:$0xff] }
 0x112   : > { %v5636_v20 = vcombine.high %v583_v15, %v587_v16  ;;  %v591_v23 = vld [vmem:[#allocation8 + $0x300] sm:$0xff]  ;;  %v5635_v27 = vcombine.low %v583_v15, %v587_v16  ;;  %v588_v39 = vld [vmem:[#allocation8 + $0x2e8] sm:$0xff]  ;;  %v498_v16 = vld [vmem:[#allocation8 + $0x18] sm:$0xff] }
 0x113   : > { %1316 = vmatpush1.bf16.msra.mxu0 %v5587_v42  ;;  %v595_v25 = vld [vmem:[#allocation8 + $0x320] sm:$0xff]  ;;  %v5629_v42 = vcombine.low %v576_v30, %v580_v31  ;;  %v592_v46 = vld [vmem:[#allocation8 + $0x308] sm:$0xff]  ;;  %v542_v57 = vld [vmem:[#allocation8 + $0x178] sm:$0xff] }
 0x114   : > { %1317 = vmatprep.subr.bf16.mxu0 %v5596_v44  ;;  %1357 = vmatpush1.bf16.msra.mxu1 %v5589_v1  ;;  %v5644_v29 = vcombine.high %v591_v23, %v595_v25  ;;  %v599_v32 = vld [vmem:[#allocation8 + $0x340] sm:$0xff]  ;;  %v5643_v35 = vcombine.low %v591_v23, %v595_v25  ;;  %v5638_v44 = vcombine.high %v584_v38, %v588_v39  ;;  %v596_v47 = vld [vmem:[#allocation8 + $0x328] sm:$0xff]  ;;  %v505_v1 = vld [vmem:[#allocation8 + $0x50] sm:$0xff] }
 0x115   : > { %1358 = vmatprep.subr.bf16.mxu1 %v5598_v3  ;;  %v603_v33 = vld [vmem:[#allocation8 + $0x360] sm:$0xff]  ;;  %v600_v54 = vld [vmem:[#allocation8 + $0x348] sm:$0xff]  ;;  %v506_v25 = vld [vmem:[#allocation8 + $0x58] sm:$0xff] }
 0x116   : > { %v5652_v37 = vcombine.high %v599_v32, %v603_v33  ;;  %v607_v40 = vld [vmem:[#allocation8 + $0x380] sm:$0xff]  ;;  %v5651_v43 = vcombine.low %v599_v32, %v603_v33  ;;  %v604_v55 = vld [vmem:[#allocation8 + $0x368] sm:$0xff]  ;;  %v514_v33 = vld [vmem:[#allocation8 + $0x98] sm:$0xff] }
 0x117   : > { %1318 = vmatpush1.bf16.msra.mxu0 %v5595_v50  ;;  %v611_v41 = vld [vmem:[#allocation8 + $0x3a0] sm:$0xff]  ;;  %v5637_v50 = vcombine.low %v584_v38, %v588_v39  ;;  %v5654_v61 = vcombine.high %v600_v54, %v604_v55  ;;  %v608_v62 = vld [vmem:[#allocation8 + $0x388] sm:$0xff] }
 0x118   : > { %1319 = vmatprep.subr.bf16.mxu0 %v5604_v52  ;;  %1359 = vmatpush1.bf16.msra.mxu1 %v5597_v9  ;;  %v5660_v45 = vcombine.high %v607_v40, %v611_v41  ;;  %v615_v48 = vld [vmem:[#allocation8 + $0x3c0] sm:$0xff]  ;;  %v5659_v51 = vcombine.low %v607_v40, %v611_v41  ;;  %v5646_v52 = vcombine.high %v592_v46, %v596_v47  ;;  %v612_v63 = vld [vmem:[#allocation8 + $0x3a8] sm:$0xff]  ;;  %v522_v41 = vld [vmem:[#allocation8 + $0xd8] sm:$0xff] }
 0x119   : > { %1360 = vmatprep.subr.bf16.mxu1 %v5606_v11  ;;  %v619_v49 = vld [vmem:[#allocation8 + $0x3e0] sm:$0xff]  ;;  %v5662_v5 = vcombine.high %v608_v62, %v612_v63  ;;  %v616_v7 = vld [vmem:[#allocation8 + $0x3c8] sm:$0xff]  ;;  %v517_v11 = vld [vmem:[#allocation8 + $0xb0] sm:$0xff] }
 0x11a   : > { %v5668_v53 = vcombine.high %v615_v48, %v619_v49  ;;  %v5667_v59 = vcombine.low %v615_v48, %v619_v49  ;;  %v620_v8 = vld [vmem:[#allocation8 + $0x3e8] sm:$0xff]  ;;  %v530_v49 = vld [vmem:[#allocation8 + $0x118] sm:$0xff] }
 0x11b   : > { %1320 = vmatpush1.bf16.msra.mxu0 %v5603_v58  ;;  %v5645_v58 = vcombine.low %v592_v46, %v596_v47  ;;  %v5670_v13 = vcombine.high %v616_v7, %v620_v8 }
 0x11c   : > { %1321 = vmatprep.subr.bf16.mxu0 %v5612_v60  ;;  %1361 = vmatpush1.bf16.msra.mxu1 %v5605_v17  ;;  %v491_v60 = vld [vmem:[%s6983_s9] sm:$0xff]  ;;  %v502_v17 = vld [vmem:[#allocation8 + $0x38] sm:$0xff] }
 0x11d   : > { %1362 = vmatprep.subr.bf16.mxu1 %v5614_v19  ;;  %v7016_v3 = vpack.c.bf16 %v491_v60, %v491_v60  ;;  %v525_v19 = vld [vmem:[#allocation8 + $0xf0] sm:$0xff]  ;;  %v5554_v22 = vcombine.high %v498_v16, %v502_v17 }
 0x11f   : > { %1322 = vmatpush1.bf16.msra.mxu0 %v5611_v2  ;;  %v509_v2 = vld [vmem:[#allocation8 + $0x70] sm:$0xff] }
 0x120   : > { %1323 = vmatprep.subr.bf16.mxu0 %v5620_v4  ;;  %1363 = vmatpush1.bf16.msra.mxu1 %v5613_v26  ;;  %v5653_v4 = vcombine.low %v600_v54, %v604_v55  ;;  %v5560_v9 = vcombine.high %v505_v1, %v509_v2  ;;  %v5559_v14 = vcombine.low %v505_v1, %v509_v2  ;;  %v510_v26 = vld [vmem:[#allocation8 + $0x78] sm:$0xff]  ;;  %v569_v2 = vld [vmem:[#allocation8 + $0x250] sm:$0xff] }
 0x121   : > { %1364 = vmatprep.subr.bf16.mxu1 %v5622_v28  ;;  %v533_v28 = vld [vmem:[#allocation8 + $0x130] sm:$0xff]  ;;  %v5562_v31 = vcombine.high %v506_v25, %v510_v26  ;;  %v550_v1 = vld [vmem:[#allocation8 + $0x1b8] sm:$0xff] }
 0x123   : > { %1324 = vmatpush1.bf16.msra.mxu0 %v5619_v10  ;;  %v513_v10 = vld [vmem:[#allocation8 + $0x90] sm:$0xff] }
 0x124   : > { %1325 = vmatprep.subr.bf16.mxu0 %v5628_v12  ;;  %1365 = vmatpush1.bf16.msra.mxu1 %v5621_v34  ;;  %v5661_v12 = vcombine.low %v608_v62, %v612_v63  ;;  %v5568_v15 = vcombine.high %v513_v10, %v517_v11  ;;  %v5567_v21 = vcombine.low %v513_v10, %v517_v11  ;;  %v518_v34 = vld [vmem:[#allocation8 + $0xb8] sm:$0xff]  ;;  %v577_v11 = vld [vmem:[#allocation8 + $0x290] sm:$0xff] }
 0x125   : > { %1366 = vmatprep.subr.bf16.mxu1 %v5630_v36  ;;  %v541_v36 = vld [vmem:[#allocation8 + $0x170] sm:$0xff]  ;;  %v5570_v39 = vcombine.high %v514_v33, %v518_v34  ;;  %v5594_v62 = vcombine.high %v538_v56, %v542_v57  ;;  %v558_v10 = vld [vmem:[#allocation8 + $0x1f8] sm:$0xff] }
 0x127   : > { %1326 = vmatpush1.bf16.msra.mxu0 %v5627_v18  ;;  %v521_v18 = vld [vmem:[#allocation8 + $0xd0] sm:$0xff] }
 0x128   : > { %1327 = vmatprep.subr.bf16.mxu0 %v5636_v20  ;;  %1367 = vmatpush1.bf16.msra.mxu1 %v5629_v42  ;;  %v5669_v20 = vcombine.low %v616_v7, %v620_v8  ;;  %v5576_v23 = vcombine.high %v521_v18, %v525_v19  ;;  %v5575_v30 = vcombine.low %v521_v18, %v525_v19  ;;  %v526_v42 = vld [vmem:[#allocation8 + $0xf8] sm:$0xff]  ;;  %v585_v19 = vld [vmem:[#allocation8 + $0x2d0] sm:$0xff] }
 0x129   : > { %1368 = vmatprep.subr.bf16.mxu1 %v5638_v44  ;;  %v549_v44 = vld [vmem:[#allocation8 + $0x1b0] sm:$0xff]  ;;  %v5578_v47 = vcombine.high %v522_v41, %v526_v42  ;;  %v566_v18 = vld [vmem:[#allocation8 + $0x238] sm:$0xff] }
 0x12b   : > { %1328 = vmatpush1.bf16.msra.mxu0 %v5635_v27  ;;  %v529_v27 = vld [vmem:[#allocation8 + $0x110] sm:$0xff] }
 0x12c   : > { %1329 = vmatprep.subr.bf16.mxu0 %v5644_v29  ;;  %1369 = vmatpush1.bf16.msra.mxu1 %v5637_v50  ;;  %v5553_v29 = vcombine.low %v498_v16, %v502_v17  ;;  %v5584_v32 = vcombine.high %v529_v27, %v533_v28  ;;  %v5583_v38 = vcombine.low %v529_v27, %v533_v28  ;;  %v553_v50 = vld [vmem:[#allocation8 + $0x1d0] sm:$0xff]  ;;  %v562_v17 = vld [vmem:[#allocation8 + $0x218] sm:$0xff] }
 0x12d   : > { %1370 = vmatprep.subr.bf16.mxu1 %v5646_v52  ;;  %v5577_v52 = vcombine.low %v522_v41, %v526_v42  ;;  %v574_v27 = vld [vmem:[#allocation8 + $0x278] sm:$0xff]  ;;  %v593_v28 = vld [vmem:[#allocation8 + $0x310] sm:$0xff] }
 0x12e   : > { %v586_v42 = vld [vmem:[#allocation8 + $0x2d8] sm:$0xff] }
 0x12f   : > { %1330 = vmatpush1.bf16.msra.mxu0 %v5643_v35  ;;  %v537_v35 = vld [vmem:[#allocation8 + $0x150] sm:$0xff] }
 0x130   : > { %1331 = vmatprep.subr.bf16.mxu0 %v5652_v37  ;;  %1371 = vmatpush1.bf16.msra.mxu1 %v5645_v58  ;;  %v5561_v37 = vcombine.low %v506_v25, %v510_v26  ;;  %v5592_v40 = vcombine.high %v537_v35, %v541_v36  ;;  %v5591_v46 = vcombine.low %v537_v35, %v541_v36  ;;  %v561_v58 = vld [vmem:[#allocation8 + $0x210] sm:$0xff]  ;;  %v570_v26 = vld [vmem:[#allocation8 + $0x258] sm:$0xff] }
 0x131   : > { %1372 = vmatprep.subr.bf16.mxu1 %v5654_v61  ;;  %v582_v35 = vld [vmem:[#allocation8 + $0x2b8] sm:$0xff]  ;;  %v601_v36 = vld [vmem:[#allocation8 + $0x350] sm:$0xff] }
 0x133   : > { %1332 = vmatpush1.bf16.msra.mxu0 %v5651_v43  ;;  %v545_v43 = vld [vmem:[#allocation8 + $0x190] sm:$0xff] }
 0x134   : > { %1333 = vmatprep.subr.bf16.mxu0 %v5660_v45  ;;  %1373 = vmatpush1.bf16.msra.mxu1 %v5653_v4  ;;  %v5569_v45 = vcombine.low %v514_v33, %v518_v34  ;;  %v5600_v48 = vcombine.high %v545_v43, %v549_v44  ;;  %v573_v4 = vld [vmem:[#allocation8 + $0x270] sm:$0xff]  ;;  %v578_v34 = vld [vmem:[#allocation8 + $0x298] sm:$0xff] }
 0x135   : > { %1374 = vmatprep.subr.bf16.mxu1 %v5662_v5  ;;  %v5593_v5 = vcombine.low %v538_v56, %v542_v57  ;;  %v5624_v8 = vcombine.high %v569_v2, %v573_v4  ;;  %v602_v57 = vld [vmem:[#allocation8 + $0x358] sm:$0xff] }
 0x137   : > { %1334 = vmatpush1.bf16.msra.mxu0 %v5659_v51  ;;  %v557_v51 = vld [vmem:[#allocation8 + $0x1f0] sm:$0xff] }
 0x138   : > { %1335 = vmatprep.subr.bf16.mxu0 %v5668_v53  ;;  %1375 = vmatpush1.bf16.msra.mxu1 %v5661_v12  ;;  %v5599_v53 = vcombine.low %v545_v43, %v549_v44  ;;  %v5608_v55 = vcombine.high %v553_v50, %v557_v51  ;;  %v5607_v61 = vcombine.low %v553_v50, %v557_v51  ;;  %v581_v12 = vld [vmem:[#allocation8 + $0x2b0] sm:$0xff]  ;;  %v590_v43 = vld [vmem:[#allocation8 + $0x2f8] sm:$0xff] }
 0x139   : > { %1376 = vmatprep.subr.bf16.mxu1 %v5670_v13  ;;  %v5632_v16 = vcombine.high %v577_v11, %v581_v12  ;;  %v609_v44 = vld [vmem:[#allocation8 + $0x390] sm:$0xff]  ;;  %v598_v50 = vld [vmem:[#allocation8 + $0x338] sm:$0xff] }
 0x13a   : > { %v617_v51 = vld [vmem:[#allocation8 + $0x3d0] sm:$0xff] }
 0x13b   : > { %1336 = vmatpush1.bf16.msra.mxu0 %v5667_v59  ;;  %v565_v59 = vld [vmem:[#allocation8 + $0x230] sm:$0xff] }
 0x13c   : > { %1387 = vmatprep.subr.bf16.mxu0 %v5552_v0  ;;  %1377 = vmatpush1.bf16.msra.mxu1 %v5669_v20  ;;  %v5616_v63 = vcombine.high %v561_v58, %v565_v59  ;;  %v546_v0 = vld [vmem:[#allocation8 + $0x198] sm:$0xff]  ;;  %v589_v20 = vld [vmem:[#allocation8 + $0x2f0] sm:$0xff] }
 0x13d   : > { %1428 = vmatprep.subr.bf16.mxu1 %v5554_v22  ;;  %v5602_v7 = vcombine.high %v546_v0, %v550_v1  ;;  %v5601_v13 = vcombine.low %v546_v0, %v550_v1  ;;  %v5631_v22 = vcombine.low %v577_v11, %v581_v12  ;;  %v5640_v25 = vcombine.high %v585_v19, %v589_v20  ;;  %v610_v0 = vld [vmem:[#allocation8 + $0x398] sm:$0xff]  ;;  %v1517_v12 = vld [vmem:[#allocation11 + $0x80] sm:$0xff] }
 0x13e   : > { %1338 = vmatmul.mubr.bf16.vlgmr.msra.gmra.mrb[0].mxu0 %v7016_v3  ;;  %v614_v1 = vld [vmem:[#allocation8 + $0x3b8] sm:$0xff] }
 0x13f   : > { %1388 = vmatpush1.bf16.msra.mxu0 %v5551_v6  ;;  %1419 = vmatprep.mubr.bf16.mxu0 %v7011_v24  ;;  %v5615_v6 = vcombine.low %v561_v58, %v565_v59  ;;  %v606_v58 = vld [vmem:[#allocation8 + $0x378] sm:$0xff]  ;;  %v1501_v59 = vld [vmem:[#allocation11] sm:$0xff] }
 0x140   : > { %1389 = vmatprep.subr.bf16.mxu0 %v5560_v9  ;;  %1379 = vmatmul.mubr.bf16.vlgmr.msra.gmra.mrb[0].mxu1 %v7016_v3  ;;  %v554_v9 = vld [vmem:[#allocation8 + $0x1d8] sm:$0xff] }
 0x141   : > { %1429 = vmatpush1.bf16.msra.mxu1 %v5553_v29  ;;  %1460 = vmatprep.mubr.bf16.mxu1 %v7011_v24  ;;  %v534_v24 = vld [vmem:[#allocation8 + $0x138] sm:$0xff]  ;;  %v597_v29 = vld [vmem:[#allocation8 + $0x330] sm:$0xff] }
 0x142   : > { %1430 = vmatprep.subr.bf16.mxu1 %v5562_v31  ;;  %v5586_v54 = vcombine.high %v530_v49, %v534_v24  ;;  %v5585_v60 = vcombine.low %v530_v49, %v534_v24  ;;  %v5639_v31 = vcombine.low %v585_v19, %v589_v20  ;;  %v5648_v33 = vcombine.high %v593_v28, %v597_v29  ;;  %v594_v24 = vld [vmem:[#allocation8 + $0x318] sm:$0xff]  ;;  %v1525_v20 = vld [vmem:[#allocation11 + $0xc0] sm:$0xff] }
 0x143   : > { %1390 = vmatpush1.bf16.msra.mxu0 %v5559_v14  ;;  %v5623_v14 = vcombine.low %v569_v2, %v573_v4  ;;  %v1509_v4 = vld [vmem:[#allocation11 + $0x40] sm:$0xff] }
 0x144   : > { %1391 = vmatprep.subr.bf16.mxu0 %v5568_v15  ;;  %v5610_v15 = vcombine.high %v554_v9, %v558_v10 }
 0x145   : > { %1431 = vmatpush1.bf16.msra.mxu1 %v5561_v37  ;;  %v605_v37 = vld [vmem:[#allocation8 + $0x370] sm:$0xff] }
 0x146   : > { %1432 = vmatprep.subr.bf16.mxu1 %v5570_v39  ;;  %v5647_v39 = vcombine.low %v593_v28, %v597_v29  ;;  %v5656_v41 = vcombine.high %v601_v36, %v605_v37  ;;  %v1533_v29 = vld [vmem:[#allocation11 + $0x100] sm:$0xff] }
 0x147   : > { %1392 = vmatpush1.bf16.msra.mxu0 %v5567_v21  ;;  %v5609_v21 = vcombine.low %v554_v9, %v558_v10  ;;  %v618_v9 = vld [vmem:[#allocation8 + $0x3d8] sm:$0xff] }
 0x148   : > { %1393 = vmatprep.subr.bf16.mxu0 %v5576_v23  ;;  %v5618_v23 = vcombine.high %v562_v17, %v566_v18  ;;  %v622_v10 = vld [vmem:[#allocation8 + $0x3f8] sm:$0xff] }
 0x149   : > { %1433 = vmatpush1.bf16.msra.mxu1 %v5569_v45  ;;  %v613_v45 = vld [vmem:[#allocation8 + $0x3b0] sm:$0xff] }
 0x14a   : > { %1434 = vmatprep.subr.bf16.mxu1 %v5578_v47  ;;  %v5655_v47 = vcombine.low %v601_v36, %v605_v37  ;;  %v5664_v49 = vcombine.high %v609_v44, %v613_v45  ;;  %v1541_v37 = vld [vmem:[#allocation11 + $0x140] sm:$0xff] }
 0x14b   : > { %1394 = vmatpush1.bf16.msra.mxu0 %v5575_v30  ;;  %v5617_v30 = vcombine.low %v562_v17, %v566_v18  ;;  %v1502_v17 = vld [vmem:[#allocation11 + $0x8] sm:$0xff] }
 0x14c   : > { %1395 = vmatprep.subr.bf16.mxu0 %v5584_v32  ;;  %v5626_v32 = vcombine.high %v570_v26, %v574_v27  ;;  %v1506_v18 = vld [vmem:[#allocation11 + $0x28] sm:$0xff] }
 0x14d   : > { %1435 = vmatpush1.bf16.msra.mxu1 %v5577_v52  ;;  %v621_v52 = vld [vmem:[#allocation8 + $0x3f0] sm:$0xff] }
 0x14e   : > { %1436 = vmatprep.subr.bf16.mxu1 %v5586_v54  ;;  %v5663_v54 = vcombine.low %v609_v44, %v613_v45  ;;  %v5672_v56 = vcombine.high %v617_v51, %v621_v52  ;;  %v1549_v45 = vld [vmem:[#allocation11 + $0x180] sm:$0xff] }
 0x14f   : > { %1396 = vmatpush1.bf16.msra.mxu0 %v5583_v38  ;;  %v5625_v38 = vcombine.low %v570_v26, %v574_v27  ;;  %v1510_v26 = vld [vmem:[#allocation11 + $0x48] sm:$0xff] }
 0x150   : > { %1397 = vmatprep.subr.bf16.mxu0 %v5592_v40  ;;  %v5634_v40 = vcombine.high %v578_v34, %v582_v35  ;;  %v1514_v27 = vld [vmem:[#allocation11 + $0x68] sm:$0xff] }
 0x151   : > { %1437 = vmatpush1.bf16.msra.mxu1 %v5585_v60  ;;  %v1505_v60 = vld [vmem:[#allocation11 + $0x20] sm:$0xff] }
 0x152   : > { %1438 = vmatprep.subr.bf16.mxu1 %v5594_v62  ;;  %v5671_v62 = vcombine.low %v617_v51, %v621_v52  ;;  %v5676_v2 = vcombine.high %v1501_v59, %v1505_v60  ;;  %v1557_v51 = vld [vmem:[#allocation11 + $0x1c0] sm:$0xff] }
 0x153   : > { %1398 = vmatpush1.bf16.msra.mxu0 %v5591_v46  ;;  %v5633_v46 = vcombine.low %v578_v34, %v582_v35  ;;  %v1518_v34 = vld [vmem:[#allocation11 + $0x88] sm:$0xff]  ;;  %v1561_v52 = vld [vmem:[#allocation11 + $0x1e0] sm:$0xff] }
 0x154   : > { %1399 = vmatprep.subr.bf16.mxu0 %v5600_v48  ;;  %v5642_v48 = vcombine.high %v586_v42, %v590_v43  ;;  %v1522_v35 = vld [vmem:[#allocation11 + $0xa8] sm:$0xff] }
 0x155   : > { %1439 = vmatpush1.bf16.msra.mxu1 %v5593_v5  ;;  %v1513_v5 = vld [vmem:[#allocation11 + $0x60] sm:$0xff] }
 0x156   : > { %1440 = vmatprep.subr.bf16.mxu1 %v5602_v7  ;;  %v5666_v7 = vcombine.high %v610_v0, %v614_v1  ;;  %v5684_v11 = vcombine.high %v1509_v4, %v1513_v5 }
 0x157   : > { %1400 = vmatpush1.bf16.msra.mxu0 %v5599_v53  ;;  %v5641_v53 = vcombine.low %v586_v42, %v590_v43  ;;  %v1526_v42 = vld [vmem:[#allocation11 + $0xc8] sm:$0xff] }
 0x158   : > { %1401 = vmatprep.subr.bf16.mxu0 %v5608_v55  ;;  %v5650_v55 = vcombine.high %v594_v24, %v598_v50  ;;  %v1530_v43 = vld [vmem:[#allocation11 + $0xe8] sm:$0xff] }
 0x159   : > { %1441 = vmatpush1.bf16.msra.mxu1 %v5601_v13  ;;  %v1521_v13 = vld [vmem:[#allocation11 + $0xa0] sm:$0xff] }
 0x15a   : > { %1442 = vmatprep.subr.bf16.mxu1 %v5610_v15  ;;  %v5674_v15 = vcombine.high %v618_v9, %v622_v10  ;;  %v5692_v19 = vcombine.high %v1517_v12, %v1521_v13 }
 0x15b   : > { %1402 = vmatpush1.bf16.msra.mxu0 %v5607_v61  ;;  %v5649_v61 = vcombine.low %v594_v24, %v598_v50  ;;  %v1538_v24 = vld [vmem:[#allocation11 + $0x128] sm:$0xff] }
 0x15c   : > { %1403 = vmatprep.subr.bf16.mxu0 %v5616_v63  ;;  %v5658_v63 = vcombine.high %v602_v57, %v606_v58 }
 0x15d   : > { %1443 = vmatpush1.bf16.msra.mxu1 %v5609_v21  ;;  %v1529_v21 = vld [vmem:[#allocation11 + $0xe0] sm:$0xff] }
 0x15e   : > { %1444 = vmatprep.subr.bf16.mxu1 %v5618_v23  ;;  %v5678_v23 = vcombine.high %v1502_v17, %v1506_v18  ;;  %v5700_v28 = vcombine.high %v1525_v20, %v1529_v21 }
 0x15f   : > { %1404 = vmatpush1.bf16.msra.mxu0 %v5615_v6  ;;  %v5657_v6 = vcombine.low %v602_v57, %v606_v58  ;;  %v1546_v57 = vld [vmem:[#allocation11 + $0x168] sm:$0xff]  ;;  %v5732_v58 = vcombine.high %v1557_v51, %v1561_v52 }
 0x160   : > { %1405 = vmatprep.subr.bf16.mxu0 %v5624_v8  ;;  %v5675_v8 = vcombine.low %v1501_v59, %v1505_v60  ;;  %v1565_v59 = vld [vmem:[#allocation11 + $0x200] sm:$0xff] }
 0x161   : > { %1445 = vmatpush1.bf16.msra.mxu1 %v5617_v30  ;;  %v1537_v30 = vld [vmem:[#allocation11 + $0x120] sm:$0xff] }
 0x162   : > { %1446 = vmatprep.subr.bf16.mxu1 %v5626_v32  ;;  %v5686_v32 = vcombine.high %v1510_v26, %v1514_v27  ;;  %v5708_v36 = vcombine.high %v1533_v29, %v1537_v30  ;;  %v1569_v60 = vld [vmem:[#allocation11 + $0x220] sm:$0xff] }
 0x163   : > { %1406 = vmatpush1.bf16.msra.mxu0 %v5623_v14  ;;  %v5665_v14 = vcombine.low %v610_v0, %v614_v1  ;;  %v1554_v0 = vld [vmem:[#allocation11 + $0x1a8] sm:$0xff]  ;;  %v5731_v1 = vcombine.low %v1557_v51, %v1561_v52 }
 0x164   : > { %1407 = vmatprep.subr.bf16.mxu0 %v5632_v16  ;;  %v5683_v16 = vcombine.low %v1509_v4, %v1513_v5  ;;  %v7024_v4 = vld [vmem:[#allocation11 + $0x400] sm:$0xff] }
 0x165   : > { %1447 = vmatpush1.bf16.msra.mxu1 %v5625_v38  ;;  %v1545_v38 = vld [vmem:[#allocation11 + $0x160] sm:$0xff] }
 0x166   : > { %1448 = vmatprep.subr.bf16.mxu1 %v5634_v40  ;;  %v5694_v40 = vcombine.high %v1518_v34, %v1522_v35  ;;  %v5716_v44 = vcombine.high %v1541_v37, %v1545_v38  ;;  %v7026_v5 = vld [vmem:[#allocation11 + $0x420] sm:$0xff] }
 0x167   : > { %1408 = vmatpush1.bf16.msra.mxu0 %v5631_v22  ;;  %v5673_v22 = vcombine.low %v618_v9, %v622_v10  ;;  %v7030_v9 = vld [vmem:[#allocation11 + $0x428] sm:$0xff] }
 0x168   : > { %1409 = vmatprep.subr.bf16.mxu0 %v5640_v25  ;;  %v5691_v25 = vcombine.low %v1517_v12, %v1521_v13 }
 0x169   : > { %1449 = vmatpush1.bf16.msra.mxu1 %v5633_v46  ;;  %v1553_v46 = vld [vmem:[#allocation11 + $0x1a0] sm:$0xff] }
 0x16a   : > { %1450 = vmatprep.subr.bf16.mxu1 %v5642_v48  ;;  %v5702_v48 = vcombine.high %v1526_v42, %v1530_v43  ;;  %v5724_v50 = vcombine.high %v1549_v45, %v1553_v46 }
 0x16b   : > { %1410 = vmatpush1.bf16.msra.mxu0 %v5639_v31  ;;  %v5677_v31 = vcombine.low %v1502_v17, %v1506_v18  ;;  %v1581_v18 = vld [vmem:[#allocation11 + $0x280] sm:$0xff] }
 0x16c   : > { %1411 = vmatprep.subr.bf16.mxu0 %v5648_v33  ;;  %v5699_v33 = vcombine.low %v1525_v20, %v1529_v21 }
 0x16d   : > { %1451 = vmatpush1.bf16.msra.mxu1 %v5641_v53  ;;  %v5701_v53 = vcombine.low %v1526_v42, %v1530_v43  ;;  %v1605_v43 = vld [vmem:[#allocation11 + $0x340] sm:$0xff] }
 0x16e   : > { %1452 = vmatprep.subr.bf16.mxu1 %v5650_v55  ;;  %v5723_v55 = vcombine.low %v1549_v45, %v1553_v46 }
 0x16f   : > { %1412 = vmatpush1.bf16.msra.mxu0 %v5647_v39  ;;  %v5685_v39 = vcombine.low %v1510_v26, %v1514_v27  ;;  %v1589_v27 = vld [vmem:[#allocation11 + $0x2c0] sm:$0xff] }
 0x170   : > { %1413 = vmatprep.subr.bf16.mxu0 %v5656_v41  ;;  %v5707_v41 = vcombine.low %v1533_v29, %v1537_v30 }
 0x171   : > { %1453 = vmatpush1.bf16.msra.mxu1 %v5649_v61 }
 0x172   : > { %1454 = vmatprep.subr.bf16.mxu1 %v5658_v63  ;;  %v1550_v63 = vld [vmem:[#allocation11 + $0x188] sm:$0xff] }
 0x173   : > { %1414 = vmatpush1.bf16.msra.mxu0 %v5655_v47  ;;  %v5693_v47 = vcombine.low %v1518_v34, %v1522_v35  ;;  %v5726_v13 = vcombine.high %v1550_v63, %v1554_v0  ;;  %v5725_v20 = vcombine.low %v1550_v63, %v1554_v0  ;;  %v1597_v35 = vld [vmem:[#allocation11 + $0x300] sm:$0xff]  ;;  %v1610_v63 = vld [vmem:[#allocation11 + $0x368] sm:$0xff] }
 0x174   : > { %1415 = vmatprep.subr.bf16.mxu0 %v5664_v49  ;;  %v1534_v49 = vld [vmem:[#allocation11 + $0x108] sm:$0xff] }
 0x175   : > { %1455 = vmatpush1.bf16.msra.mxu1 %v5657_v6  ;;  %v5709_v61 = vcombine.low %v1534_v49, %v1538_v24  ;;  %v7028_v6 = vld [vmem:[#allocation11 + $0x408] sm:$0xff] }
 0x176   : > { %1456 = vmatprep.subr.bf16.mxu1 %v5666_v7  ;;  %v1573_v7 = vld [vmem:[#allocation11 + $0x240] sm:$0xff]  ;;  %v5805_v12 = vcombine.low %v7028_v6, %v7030_v9 }
 0x177   : > { %1416 = vmatpush1.bf16.msra.mxu0 %v5663_v54  ;;  %v5710_v54 = vcombine.high %v1534_v49, %v1538_v24  ;;  %v1613_v24 = vld [vmem:[#allocation11 + $0x380] sm:$0xff] }
 0x178   : > { %1417 = vmatprep.subr.bf16.mxu0 %v5672_v56  ;;  %v1542_v56 = vld [vmem:[#allocation11 + $0x148] sm:$0xff] }
 0x179   : > { %1457 = vmatpush1.bf16.msra.mxu1 %v5665_v14  ;;  %v5717_v10 = vcombine.low %v1542_v56, %v1546_v57  ;;  %v5739_v14 = vcombine.low %v1565_v59, %v1569_v60 }
 0x17a   : > { %1458 = vmatprep.subr.bf16.mxu1 %v5674_v15  ;;  %v1558_v15 = vld [vmem:[#allocation11 + $0x1c8] sm:$0xff] }
 0x17b   : > { %1418 = vmatpush1.bf16.msra.mxu0 %v5671_v62  ;;  %v5718_v62 = vcombine.high %v1542_v56, %v1546_v57  ;;  %v1621_v57 = vld [vmem:[#allocation11 + $0x3c0] sm:$0xff] }
 0x17c   : > { %4615 = vmatprep.subr.bf16.mxu0 %v5676_v2  ;;  %v5740_v2 = vcombine.high %v1565_v59, %v1569_v60 }
 0x17d   : > { %1459 = vmatpush1.bf16.msra.mxu1 %v5673_v22 }
 0x17e   : > { %1420 = vmatmul.mubr.bf16.vlgmr.msra.gmra.mrb[4].mxu0 %v7016_v3  ;;  %4779 = vmatprep.subr.bf16.mxu1 %v5678_v23  ;;  %v1566_v23 = vld [vmem:[#allocation11 + $0x208] sm:$0xff] }
 0x17f   : > { %4616 = vmatpush1.bf16.msra.mxu0 %v5675_v8  ;;  %v1577_v8 = vld [vmem:[#allocation11 + $0x260] sm:$0xff] }
 0x180   : > { %4617 = vmatprep.subr.bf16.mxu0 %v5684_v11  ;;  %1461 = vmatmul.mubr.bf16.vlgmr.msra.gmra.mrb[4].mxu1 %v7016_v3  ;;  %v5715_v3 = vcombine.low %v1541_v37, %v1545_v38  ;;  %v5803_v11 = vcombine.low %v7024_v4, %v7026_v5  ;;  %v5748_v17 = vcombine.high %v1573_v7, %v1577_v8 }
 0x181   : > { %4780 = vmatpush1.bf16.msra.mxu1 %v5677_v31  ;;  %v5747_v22 = vcombine.low %v1573_v7, %v1577_v8  ;;  %v1614_v8 = vld [vmem:[#allocation11 + $0x388] sm:$0xff] }
 0x182   : > { %4781 = vmatprep.subr.bf16.mxu1 %v5686_v32  ;;  %v1574_v32 = vld [vmem:[#allocation11 + $0x248] sm:$0xff] }
 0x183   : > { %4618 = vmatpush1.bf16.msra.mxu0 %v5683_v16  ;;  %v1562_v16 = vld [vmem:[#allocation11 + $0x1e8] sm:$0xff] }
 0x184   : > { %4619 = vmatprep.subr.bf16.mxu0 %v5692_v19  ;;  %v1585_v19 = vld [vmem:[#allocation11 + $0x2a0] sm:$0xff]  ;;  %v5734_v21 = vcombine.high %v1558_v15, %v1562_v16  ;;  %v5733_v29 = vcombine.low %v1558_v15, %v1562_v16  ;;  %v1622_v16 = vld [vmem:[#allocation11 + $0x3c8] sm:$0xff] }
 0x185   : > { %4782 = vmatpush1.bf16.msra.mxu1 %v5685_v39  ;;  %v5756_v26 = vcombine.high %v1581_v18, %v1585_v19  ;;  %v5755_v31 = vcombine.low %v1581_v18, %v1585_v19 }
 0x186   : > { %4783 = vmatprep.subr.bf16.mxu1 %v5694_v40  ;;  %v1582_v40 = vld [vmem:[#allocation11 + $0x288] sm:$0xff] }
 0x187   : > { %4620 = vmatpush1.bf16.msra.mxu0 %v5691_v25  ;;  %v1570_v25 = vld [vmem:[#allocation11 + $0x228] sm:$0xff] }
 0x188   : > { %4621 = vmatprep.subr.bf16.mxu0 %v5700_v28  ;;  %v1593_v28 = vld [vmem:[#allocation11 + $0x2e0] sm:$0xff]  ;;  %v5742_v30 = vcombine.high %v1566_v23, %v1570_v25  ;;  %v5741_v37 = vcombine.low %v1566_v23, %v1570_v25 }
 0x189   : > { %4784 = vmatpush1.bf16.msra.mxu1 %v5693_v47  ;;  %v5764_v34 = vcombine.high %v1589_v27, %v1593_v28  ;;  %v5763_v39 = vcombine.low %v1589_v27, %v1593_v28 }
 0x18a   : > { %4785 = vmatprep.subr.bf16.mxu1 %v5702_v48  ;;  %v1590_v48 = vld [vmem:[#allocation11 + $0x2c8] sm:$0xff] }
 0x18b   : > { %4622 = vmatpush1.bf16.msra.mxu0 %v5699_v33  ;;  %v1578_v33 = vld [vmem:[#allocation11 + $0x268] sm:$0xff] }
 0x18c   : > { %4623 = vmatprep.subr.bf16.mxu0 %v5708_v36  ;;  %v1601_v36 = vld [vmem:[#allocation11 + $0x320] sm:$0xff]  ;;  %v5750_v38 = vcombine.high %v1574_v32, %v1578_v33  ;;  %v5749_v45 = vcombine.low %v1574_v32, %v1578_v33  ;;  %v1477_v33 = vld [vmem:[%s6990_s27] sm:$0xff] }
 0x18d   : > { %4786 = vmatpush1.bf16.msra.mxu1 %v5701_v53  ;;  %v5772_v42 = vcombine.high %v1597_v35, %v1601_v36  ;;  %v5771_v47 = vcombine.low %v1597_v35, %v1601_v36 }
 0x18e   : > { %4787 = vmatprep.subr.bf16.mxu1 %v5710_v54  ;;  %v1598_v54 = vld [vmem:[#allocation11 + $0x308] sm:$0xff] }
 0x18f   : > { %4624 = vmatpush1.bf16.msra.mxu0 %v5707_v41  ;;  %v1586_v41 = vld [vmem:[#allocation11 + $0x2a8] sm:$0xff] }
 0x190   : > { %4625 = vmatprep.subr.bf16.mxu0 %v5716_v44  ;;  %v1609_v44 = vld [vmem:[#allocation11 + $0x360] sm:$0xff]  ;;  %v5758_v46 = vcombine.high %v1582_v40, %v1586_v41  ;;  %v5757_v51 = vcombine.low %v1582_v40, %v1586_v41 }
 0x191   : > { %4788 = vmatpush1.bf16.msra.mxu1 %v5709_v61  ;;  %v5780_v49 = vcombine.high %v1605_v43, %v1609_v44  ;;  %v5779_v53 = vcombine.low %v1605_v43, %v1609_v44  ;;  %v1637_v41 = vld [vmem:[#allocation11 + $0x440] sm:$0xff] }
 0x192   : > { %4789 = vmatprep.subr.bf16.mxu1 %v5718_v62  ;;  %v1606_v62 = vld [vmem:[#allocation11 + $0x348] sm:$0xff]  ;;  %v1641_v44 = vld [vmem:[#allocation11 + $0x460] sm:$0xff] }
 0x193   : > { %4626 = vmatpush1.bf16.msra.mxu0 %v5715_v3  ;;  %v1594_v3 = vld [vmem:[#allocation11 + $0x2e8] sm:$0xff] }
 0x194   : > { %4627 = vmatprep.subr.bf16.mxu0 %v5724_v50  ;;  %v1617_v50 = vld [vmem:[#allocation11 + $0x3a0] sm:$0xff]  ;;  %v5766_v52 = vcombine.high %v1590_v48, %v1594_v3  ;;  %v5765_v59 = vcombine.low %v1590_v48, %v1594_v3  ;;  %v5812_v3 = vcombine.high %v1637_v41, %v1641_v44 }
 0x195   : > { %4790 = vmatpush1.bf16.msra.mxu1 %v5717_v10  ;;  %v5788_v56 = vcombine.high %v1613_v24, %v1617_v50  ;;  %v5787_v61 = vcombine.low %v1613_v24, %v1617_v50  ;;  %v1618_v10 = vld [vmem:[#allocation11 + $0x3a8] sm:$0xff]  ;;  %v1645_v24 = vld [vmem:[#allocation11 + $0x480] sm:$0xff] }
 0x196   : > { %4791 = vmatprep.subr.bf16.mxu1 %v5726_v13  ;;  %v5804_v13 = vcombine.high %v7024_v4, %v7026_v5  ;;  %v5790_v15 = vcombine.high %v1614_v8, %v1618_v10  ;;  %v5789_v18 = vcombine.low %v1614_v8, %v1618_v10  ;;  %v1480_v4 = vld [vmem:[%s6990_s27 + $0x18] sm:$0xff]  ;;  %v1665_v10 = vld [vmem:[#allocation11 + $0x520] sm:$0xff] }
 0x197   : > { %4628 = vmatpush1.bf16.msra.mxu0 %v5723_v55  ;;  %v1602_v55 = vld [vmem:[#allocation11 + $0x328] sm:$0xff] }
 0x198   : > { %4629 = vmatprep.subr.bf16.mxu0 %v5732_v58  ;;  %v1625_v58 = vld [vmem:[#allocation11 + $0x3e0] sm:$0xff]  ;;  %v5774_v60 = vcombine.high %v1598_v54, %v1602_v55 }
 0x199   : > { %4792 = vmatpush1.bf16.msra.mxu1 %v5725_v20  ;;  %v5796_v0 = vcombine.high %v1621_v57, %v1625_v58  ;;  %v5795_v7 = vcombine.low %v1621_v57, %v1625_v58 }
 0x19a   : > { %4793 = vmatprep.subr.bf16.mxu1 %v5734_v21  ;;  %v5806_v21 = vcombine.high %v7028_v6, %v7030_v9 }
 0x19b   : > { %4630 = vmatpush1.bf16.msra.mxu0 %v5731_v1  ;;  %v5773_v1 = vcombine.low %v1598_v54, %v1602_v55  ;;  %v5811_v55 = vcombine.low %v1637_v41, %v1641_v44  ;;  %v1685_v41 = vld [vmem:[#allocation11 + $0x5c0] sm:$0xff]  ;;  %v1686_v44 = vld [vmem:[#allocation11 + $0x5c8] sm:$0xff] }
 0x19c   : > { %4631 = vmatprep.subr.bf16.mxu0 %v5740_v2  ;;  %v5782_v2 = vcombine.high %v1606_v62, %v1610_v63 }
 0x19d   : > { %4794 = vmatpush1.bf16.msra.mxu1 %v5733_v29 }
 0x19e   : > { %4795 = vmatprep.subr.bf16.mxu1 %v5742_v30 }
 0x19f   : > { %4632 = vmatpush1.bf16.msra.mxu0 %v5739_v14  ;;  %v5781_v14 = vcombine.low %v1606_v62, %v1610_v63 }
 0x1a0   : > { %4633 = vmatprep.subr.bf16.mxu0 %v5748_v17  ;;  %v1626_v17 = vld [vmem:[#allocation11 + $0x3e8] sm:$0xff] }
 0x1a1   : > { %4796 = vmatpush1.bf16.msra.mxu1 %v5741_v37  ;;  %v5798_v19 = vcombine.high %v1622_v16, %v1626_v17  ;;  %v5797_v20 = vcombine.low %v1622_v16, %v1626_v17  ;;  %v1478_v37 = vld [vmem:[%s6990_s27 + $0x8] sm:$0xff] }
 0x1a2   : > { %4797 = vmatprep.subr.bf16.mxu1 %v5750_v38 }
 0x1a3   : > { %4634 = vmatpush1.bf16.msra.mxu0 %v5747_v22  ;;  %v625_v22 = vlaneseq }
 0x1a4   : > { %4635 = vmatprep.subr.bf16.mxu0 %v5756_v26  ;;  %v7045_v26 = vld [vmem:[#allocation10] sm:$0xff] }
 0x1a5   : > { %4798 = vmatpush1.bf16.msra.mxu1 %v5749_v45  ;;  %v7040_v23 = vshrl.u32 %v625_v22, 7  ;;  %v1638_v45 = vld [vmem:[#allocation11 + $0x448] sm:$0xff] }
 0x1a6   : > { %4799 = vmatprep.subr.bf16.mxu1 %v5758_v46  ;;  %v1642_v46 = vld [vmem:[#allocation11 + $0x468] sm:$0xff] }
 0x1a7   : > { %4636 = vmatpush1.bf16.msra.mxu0 %v5755_v31  ;;  %v7043_v25 = vsub.s32 0, %v7040_v23  ;;  %v7048_v27 = vsub.s32 1, %v7040_v23  ;;  %v1670_v22 = vld [vmem:[#allocation11 + $0x548] sm:$0xff] }
 0x1a8   : > { %4637 = vmatprep.subr.bf16.mxu0 %v5764_v34 }
 0x1a9   : > { %4800 = vmatpush1.bf16.msra.mxu1 %v5757_v51  ;;  %v628_v28 = vrot.slane %v7045_v26, %v7043_v25  ;;  %v632_v29 = vrot.slane %v7045_v26, %v7048_v27  ;;  %v1649_v51 = vld [vmem:[#allocation11 + $0x4a0] sm:$0xff] }
 0x1aa   : > { %4801 = vmatprep.subr.bf16.mxu1 %v5766_v52  ;;  %v1646_v52 = vld [vmem:[#allocation11 + $0x488] sm:$0xff]  ;;  %v5820_v58 = vcombine.high %v1645_v24, %v1649_v51  ;;  %v5819_v6 = vcombine.low %v1645_v24, %v1649_v51  ;;  %v1697_v51 = vld [vmem:[#allocation11 + $0x620] sm:$0xff] }
 0x1ab   : > { %4638 = vmatpush1.bf16.msra.mxu0 %v5763_v39 }
 0x1ac   : > { %4639 = vmatprep.subr.bf16.mxu0 %v5772_v42  ;;  %v7057_v42 = vsub.s32 3, %v7040_v23 }
 0x1ad   : > { %4802 = vmatpush1.bf16.msra.mxu1 %v5765_v59 }
 0x1ae   : > { %4803 = vmatprep.subr.bf16.mxu1 %v5774_v60  ;;  %v640_v50 = vrot.slane %v7045_v26, %v7057_v42  ;;  %v1653_v60 = vld [vmem:[#allocation11 + $0x4c0] sm:$0xff] }
 0x1af   : > { %4640 = vmatpush1.bf16.msra.mxu0 %v5771_v47 }
 0x1b0   : > { %4641 = vmatprep.subr.bf16.mxu0 %v5780_v49  ;;  %v5814_v49 = vcombine.high %v1638_v45, %v1642_v46 }
 0x1b1   : > { %4804 = vmatpush1.bf16.msra.mxu1 %v5773_v1  ;;  %v1658_v1 = vld [vmem:[#allocation11 + $0x4e8] sm:$0xff] }
 0x1b2   : > { %4805 = vmatprep.subr.bf16.mxu1 %v5782_v2 }
 0x1b3   : > { %4642 = vmatpush1.bf16.msra.mxu0 %v5779_v53  ;;  %v1650_v53 = vld [vmem:[#allocation11 + $0x4a8] sm:$0xff] }
 0x1b4   : > { %4643 = vmatprep.subr.bf16.mxu0 %v5788_v56  ;;  %v5813_v56 = vcombine.low %v1638_v45, %v1642_v46  ;;  %v5822_v59 = vcombine.high %v1646_v52, %v1650_v53  ;;  %v5821_v9 = vcombine.low %v1646_v52, %v1650_v53  ;;  %v1690_v45 = vld [vmem:[#allocation11 + $0x5e8] sm:$0xff] }
 0x1b5   : > { %4806 = vmatpush1.bf16.msra.mxu1 %v5781_v14  ;;  %v1666_v14 = vld [vmem:[#allocation11 + $0x528] sm:$0xff]  ;;  %v5862_v24 = vcombine.high %v1686_v44, %v1690_v45 }
 0x1b6   : > { %4807 = vmatprep.subr.bf16.mxu1 %v5790_v15  ;;  %v1694_v52 = vld [vmem:[#allocation11 + $0x608] sm:$0xff] }
 0x1b7   : > { %4644 = vmatpush1.bf16.msra.mxu0 %v5787_v61  ;;  %v1657_v61 = vld [vmem:[#allocation11 + $0x4e0] sm:$0xff]  ;;  %v1698_v53 = vld [vmem:[#allocation11 + $0x628] sm:$0xff] }
 0x1b8   : > { %4645 = vmatprep.subr.bf16.mxu0 %v5796_v0  ;;  %v1654_v0 = vld [vmem:[#allocation11 + $0x4c8] sm:$0xff]  ;;  %v5827_v16 = vcombine.low %v1653_v60, %v1657_v61 }
 0x1b9   : > { %4808 = vmatpush1.bf16.msra.mxu1 %v5789_v18  ;;  %v5830_v2 = vcombine.high %v1654_v0, %v1658_v1  ;;  %v5829_v17 = vcombine.low %v1654_v0, %v1658_v1  ;;  %v5869_v0 = vcombine.low %v1694_v52, %v1698_v53 }
 0x1ba   : > { %4809 = vmatprep.subr.bf16.mxu1 %v5798_v19 }
 0x1bb   : > { %4646 = vmatpush1.bf16.msra.mxu0 %v5795_v7  ;;  %v1661_v7 = vld [vmem:[#allocation11 + $0x500] sm:$0xff] }
 0x1bc   : > { %4656 = vmatprep.subr.bf16.mxu0 %v5804_v13  ;;  %v1662_v13 = vld [vmem:[#allocation11 + $0x508] sm:$0xff]  ;;  %v5836_v18 = vcombine.high %v1661_v7, %v1665_v10 }
 0x1bd   : > { %4810 = vmatpush1.bf16.msra.mxu1 %v5797_v20  ;;  %v5838_v19 = vcombine.high %v1662_v13, %v1666_v14  ;;  %v1669_v20 = vld [vmem:[#allocation11 + $0x540] sm:$0xff] }
 0x1be   : > { %4820 = vmatprep.subr.bf16.mxu1 %v5806_v21  ;;  %v1673_v21 = vld [vmem:[#allocation11 + $0x560] sm:$0xff] }
 0x211   : > { %v1339_v30 = vpop.f32.mrb[0].mxu0 }
 0x212   : > { %v1340_v31 = vadd.f32 %v1339_v30, %v628_v28  ;;  %v1341_v32 = vpop.f32.mrb[1].mxu0  ;;  %v1674_v28 = vld [vmem:[#allocation11 + $0x568] sm:$0xff]  ;;  %v5837_v30 = vcombine.low %v1662_v13, %v1666_v14  ;;  %v1721_v13 = vld [vmem:[#allocation11 + $0x6e0] sm:$0xff] }
 0x213   : > { %v1342_v34 = vadd.f32 %v1341_v32, %v632_v29  ;;  %v1343_v35 = vpop.f32.mrb[2].mxu0  ;;  %v7069_v54 = vpop.f32.mrb[0].mxu1  ;;  %v5835_v29 = vcombine.low %v1661_v7, %v1665_v10  ;;  %v5846_v32 = vcombine.high %v1670_v22, %v1674_v28  ;;  %v1717_v10 = vld [vmem:[#allocation11 + $0x6c0] sm:$0xff]  ;;  %v1718_v14 = vld [vmem:[#allocation11 + $0x6c8] sm:$0xff] }
 0x214   : > { %v1469_v36 = vmax.f32 %v1340_v31, 0.0  ;;  %v1344_v38 = vpop.f32.mrb[3].mxu0  ;;  %v1382_v57 = vpop.f32.mrb[1].mxu1  ;;  %v5844_v31 = vcombine.high %v1669_v20, %v1673_v21  ;;  %v1678_v35 = vld [vmem:[#allocation11 + $0x588] sm:$0xff] }
 0x215   : > { %v1470_v39 = vmax.f32 %v1342_v34, 0.0  ;;  %v1383_v62 = vadd.f32 %v1382_v57, %v640_v50  ;;  %v1384_v63 = vpop.f32.mrb[2].mxu1  ;;  %v1681_v34 = vld [vmem:[#allocation11 + $0x5a0] sm:$0xff]  ;;  %v5845_v38 = vcombine.low %v1670_v22, %v1674_v28  ;;  %v1726_v28 = vld [vmem:[#allocation11 + $0x708] sm:$0xff] }
 0x216   : > { %v1485_v40 = vmul.f32 %v1477_v33, %v1469_v36  ;;  %v1385_v5 = vpop.f32.mrb[3].mxu1  ;;  %v1677_v33 = vld [vmem:[#allocation11 + $0x580] sm:$0xff]  ;;  %v1682_v36 = vld [vmem:[#allocation11 + $0x5a8] sm:$0xff] }
 0x217   : > { %v1486_v43 = vmul.f32 %v1478_v37, %v1470_v39  ;;  %v5843_v37 = vcombine.low %v1669_v20, %v1673_v21  ;;  %v5852_v39 = vcombine.high %v1677_v33, %v1681_v34  ;;  %v5851_v46 = vcombine.low %v1677_v33, %v1681_v34  ;;  %v1693_v50 = vld [vmem:[#allocation11 + $0x600] sm:$0xff] }
 0x218   : > { %v7061_v48 = vpack.c.bf16 %v1485_v40, %v1485_v40  ;;  %v5854_v40 = vcombine.high %v1678_v35, %v1682_v36  ;;  %v5868_v57 = vcombine.high %v1693_v50, %v1697_v51  ;;  %v5867_v63 = vcombine.low %v1693_v50, %v1697_v51  ;;  %v1709_v5 = vld [vmem:[#allocation11 + $0x680] sm:$0xff] }
 0x219   : > { %v7059_v47 = vpack.c.bf16 %v1486_v43, %v1486_v43  ;;  %v1689_v43 = vld [vmem:[#allocation11 + $0x5e0] sm:$0xff] }
 0x21a   : > { %v1725_v21 = vld [vmem:[#allocation11 + $0x700] sm:$0xff] }
 0x21b   : > { %4647 = vmatprep.mubr.bf16.mxu0 %v7059_v47  ;;  %4811 = vmatprep.mubr.bf16.mxu1 %v7059_v47  ;;  %v1729_v22 = vld [vmem:[#allocation11 + $0x720] sm:$0xff] }
 0x21c   : > { %4648 = vmatmul.mubr.bf16.vlgmr.msra.gmra.mrb[8].mxu0 %v7061_v48  ;;  %4812 = vmatmul.mubr.bf16.vlgmr.msra.gmra.mrb[8].mxu1 %v7061_v48  ;;  %v5900_v33 = vcombine.high %v1725_v21, %v1729_v22 }
 0x21d   : > { %4657 = vmatpush1.bf16.msra.mxu0 %v5803_v11  ;;  %4821 = vmatpush1.bf16.msra.mxu1 %v5805_v12  ;;  %v1472_v11 = vmax.f32 %v1383_v62, 0.0  ;;  %v5828_v12 = vcombine.high %v1653_v60, %v1657_v61  ;;  %v1705_v60 = vld [vmem:[#allocation11 + $0x660] sm:$0xff]  ;;  %v1702_v61 = vld [vmem:[#allocation11 + $0x648] sm:$0xff] }
 0x21e   : > { %4658 = vmatprep.subr.bf16.mxu0 %v5812_v3  ;;  %4822 = vmatprep.subr.bf16.mxu1 %v5814_v49  ;;  %v5853_v3 = vcombine.low %v1678_v35, %v1682_v36  ;;  %v5860_v49 = vcombine.high %v1685_v41, %v1689_v43  ;;  %v1706_v62 = vld [vmem:[#allocation11 + $0x668] sm:$0xff]  ;;  %v1733_v35 = vld [vmem:[#allocation11 + $0x740] sm:$0xff] }
 0x21f   : > { %v1488_v8 = vmul.f32 %v1480_v4, %v1472_v11  ;;  %v5878_v4 = vcombine.high %v1702_v61, %v1706_v62  ;;  %v1713_v11 = vld [vmem:[#allocation11 + $0x6a0] sm:$0xff] }
 0x220   : > { %v5884_v7 = vcombine.high %v1709_v5, %v1713_v11  ;;  %v1737_v36 = vld [vmem:[#allocation11 + $0x760] sm:$0xff] }
 0x221   : > { %4659 = vmatpush1.bf16.msra.mxu0 %v5811_v55  ;;  %4823 = vmatpush1.bf16.msra.mxu1 %v5813_v56  ;;  %v7078_v15 = vpack.c.bf16 %v1488_v8, %v1488_v8  ;;  %v5859_v55 = vcombine.low %v1685_v41, %v1689_v43  ;;  %v5861_v56 = vcombine.low %v1686_v44, %v1690_v45  ;;  %v1741_v45 = vld [vmem:[#allocation11 + $0x780] sm:$0xff] }
 0x222   : > { %4660 = vmatprep.subr.bf16.mxu0 %v5820_v58  ;;  %4824 = vmatprep.subr.bf16.mxu1 %v5822_v59  ;;  %v5870_v58 = vcombine.high %v1694_v52, %v1698_v53  ;;  %v1701_v59 = vld [vmem:[#allocation11 + $0x640] sm:$0xff]  ;;  %v5908_v43 = vcombine.high %v1733_v35, %v1737_v36  ;;  %v5907_v51 = vcombine.low %v1733_v35, %v1737_v36 }
 0x223   : > { %4688 = vmatprep.mubr.bf16.mxu0 %v7078_v15  ;;  %4852 = vmatprep.mubr.bf16.mxu1 %v7078_v15  ;;  %v5876_v1 = vcombine.high %v1701_v59, %v1705_v60  ;;  %v1773_v36 = vld [vmem:[#allocation11 + $0x880] sm:$0xff] }
 0x225   : > { %4661 = vmatpush1.bf16.msra.mxu0 %v5819_v6  ;;  %4825 = vmatpush1.bf16.msra.mxu1 %v5821_v9  ;;  %v1710_v6 = vld [vmem:[#allocation11 + $0x688] sm:$0xff] }
 0x226   : > { %4662 = vmatprep.subr.bf16.mxu0 %v5828_v12  ;;  %4826 = vmatprep.subr.bf16.mxu1 %v5830_v2  ;;  %v1714_v9 = vld [vmem:[#allocation11 + $0x6a8] sm:$0xff]  ;;  %v5875_v12 = vcombine.low %v1701_v59, %v1705_v60  ;;  %v5877_v2 = vcombine.low %v1702_v61, %v1706_v62 }
 0x227   : > { %v5886_v8 = vcombine.high %v1710_v6, %v1714_v9  ;;  %v1754_v59 = vld [vmem:[#allocation11 + $0x7e8] sm:$0xff] }
 0x228   : > { %v1479_v62 = vld [vmem:[%s6990_s27 + $0x10] sm:$0xff] }
 0x229   : > { %4663 = vmatpush1.bf16.msra.mxu0 %v5827_v16  ;;  %4827 = vmatpush1.bf16.msra.mxu1 %v5829_v17  ;;  %v1722_v16 = vld [vmem:[#allocation11 + $0x6e8] sm:$0xff]  ;;  %v5883_v17 = vcombine.low %v1709_v5, %v1713_v11  ;;  %v1757_v5 = vld [vmem:[#allocation11 + $0x800] sm:$0xff] }
 0x22a   : > { %4664 = vmatprep.subr.bf16.mxu0 %v5836_v18  ;;  %4828 = vmatprep.subr.bf16.mxu1 %v5838_v19  ;;  %v5885_v18 = vcombine.low %v1710_v6, %v1714_v9  ;;  %v5892_v19 = vcombine.high %v1717_v10, %v1721_v13  ;;  %v5894_v20 = vcombine.high %v1718_v14, %v1722_v16  ;;  %v1761_v6 = vld [vmem:[#allocation11 + $0x820] sm:$0xff]  ;;  %v1758_v9 = vld [vmem:[#allocation11 + $0x808] sm:$0xff] }
 0x22d   : > { %4665 = vmatpush1.bf16.msra.mxu0 %v5835_v29  ;;  %4829 = vmatpush1.bf16.msra.mxu1 %v5837_v30  ;;  %v1730_v29 = vld [vmem:[#allocation11 + $0x728] sm:$0xff]  ;;  %v7083_v30 = vsub.s32 2, %v7040_v23 }
 0x22e   : > { %4666 = vmatprep.subr.bf16.mxu0 %v5844_v31  ;;  %4830 = vmatprep.subr.bf16.mxu1 %v5846_v32  ;;  %v5891_v31 = vcombine.low %v1717_v10, %v1721_v13  ;;  %v5893_v32 = vcombine.low %v1718_v14, %v1722_v16  ;;  %v5902_v34 = vcombine.high %v1726_v28, %v1730_v29  ;;  %v1482_v10 = vld [vmem:[%s6990_s27 + $0x28] sm:$0xff] }
 0x22f   : > { %v5901_v41 = vcombine.low %v1726_v28, %v1730_v29  ;;  %v1770_v28 = vld [vmem:[#allocation11 + $0x868] sm:$0xff] }
 0x231   : > { %4667 = vmatpush1.bf16.msra.mxu0 %v5843_v37  ;;  %4831 = vmatpush1.bf16.msra.mxu1 %v5845_v38  ;;  %v1734_v37 = vld [vmem:[#allocation11 + $0x748] sm:$0xff] }
 0x232   : > { %4668 = vmatprep.subr.bf16.mxu0 %v5852_v39  ;;  %4832 = vmatprep.subr.bf16.mxu1 %v5854_v40  ;;  %v1738_v38 = vld [vmem:[#allocation11 + $0x768] sm:$0xff]  ;;  %v636_v39 = vrot.slane %v7045_v26, %v7083_v30  ;;  %v5899_v40 = vcombine.low %v1725_v21, %v1729_v22  ;;  %v1769_v21 = vld [vmem:[#allocation11 + $0x860] sm:$0xff] }
 0x233   : > { %v5910_v44 = vcombine.high %v1734_v37, %v1738_v38  ;;  %v5909_v52 = vcombine.low %v1734_v37, %v1738_v38  ;;  %v1766_v22 = vld [vmem:[#allocation11 + $0x848] sm:$0xff]  ;;  %v1777_v37 = vld [vmem:[#allocation11 + $0x8a0] sm:$0xff] }
 0x234   : > { %v1381_v50 = vadd.f32 %v7069_v54, %v636_v39  ;;  %v5942_v35 = vcombine.high %v1766_v22, %v1770_v28  ;;  %v1774_v38 = vld [vmem:[#allocation11 + $0x888] sm:$0xff] }
 0x235   : > { %4669 = vmatpush1.bf16.msra.mxu0 %v5851_v46  ;;  %4833 = vmatpush1.bf16.msra.mxu1 %v5853_v3  ;;  %v1745_v46 = vld [vmem:[#allocation11 + $0x7a0] sm:$0xff]  ;;  %v1742_v3 = vld [vmem:[#allocation11 + $0x788] sm:$0xff] }
 0x236   : > { %4670 = vmatprep.subr.bf16.mxu0 %v5860_v49  ;;  %4834 = vmatprep.subr.bf16.mxu1 %v5862_v24  ;;  %v1746_v49 = vld [vmem:[#allocation11 + $0x7a8] sm:$0xff]  ;;  %v7088_v24 = vsub.s32 5, %v7040_v23  ;;  %v5916_v53 = vcombine.high %v1741_v45, %v1745_v46  ;;  %v1471_v61 = vmax.f32 %v1381_v50, 0.0  ;;  %v5915_v54 = vcombine.low %v1741_v45, %v1745_v46 }
 0x237   : > { %v1778_v39 = vld [vmem:[#allocation11 + $0x8a8] sm:$0xff]  ;;  %v5948_v46 = vcombine.high %v1773_v36, %v1777_v37 }
 0x238   : > { %v648_v60 = vrot.slane %v7045_v26, %v7088_v24 }
 0x239   : > { %4671 = vmatpush1.bf16.msra.mxu0 %v5859_v55  ;;  %4835 = vmatpush1.bf16.msra.mxu1 %v5861_v56  ;;  %v5918_v55 = vcombine.high %v1742_v3, %v1746_v49  ;;  %v1749_v56 = vld [vmem:[#allocation11 + $0x7c0] sm:$0xff] }
 0x23a   : > { %4672 = vmatprep.subr.bf16.mxu0 %v5868_v57  ;;  %4836 = vmatprep.subr.bf16.mxu1 %v5870_v58  ;;  %v1753_v57 = vld [vmem:[#allocation11 + $0x7e0] sm:$0xff]  ;;  %v1750_v58 = vld [vmem:[#allocation11 + $0x7c8] sm:$0xff] }
 0x23b   : > { %v5923_v14 = vcombine.low %v1749_v56, %v1753_v57  ;;  %v5925_v16 = vcombine.low %v1750_v58, %v1754_v59 }
 0x23d   : > { %4673 = vmatpush1.bf16.msra.mxu0 %v5867_v63  ;;  %4837 = vmatpush1.bf16.msra.mxu1 %v5869_v0  ;;  %v5917_v63 = vcombine.low %v1742_v3, %v1746_v49  ;;  %v5950_v3 = vcombine.high %v1774_v38, %v1778_v39  ;;  %v1781_v49 = vld [vmem:[#allocation11 + $0x8c0] sm:$0xff] }
 0x23e   : > { %4674 = vmatprep.subr.bf16.mxu0 %v5876_v1  ;;  %4838 = vmatprep.subr.bf16.mxu1 %v5878_v4  ;;  %v5924_v1 = vcombine.high %v1749_v56, %v1753_v57  ;;  %v5926_v4 = vcombine.high %v1750_v58, %v1754_v59  ;;  %v5947_v56 = vcombine.low %v1773_v36, %v1777_v37  ;;  %v1821_v37 = vld [vmem:[#allocation11 + $0xa00] sm:$0xff] }
 0x23f   : > { %v5949_v57 = vcombine.low %v1774_v38, %v1778_v39  ;;  %v1825_v38 = vld [vmem:[#allocation11 + $0xa20] sm:$0xff]  ;;  %v1822_v39 = vld [vmem:[#allocation11 + $0xa08] sm:$0xff] }
 0x241   : > { %4675 = vmatpush1.bf16.msra.mxu0 %v5875_v12  ;;  %4839 = vmatpush1.bf16.msra.mxu1 %v5877_v2  ;;  %v1762_v12 = vld [vmem:[#allocation11 + $0x828] sm:$0xff] }
 0x242   : > { %4676 = vmatprep.subr.bf16.mxu0 %v5884_v7  ;;  %4840 = vmatprep.subr.bf16.mxu1 %v5886_v8  ;;  %v1487_v8 = vmul.f32 %v1479_v62, %v1471_v61  ;;  %v1793_v61 = vld [vmem:[#allocation11 + $0x920] sm:$0xff]  ;;  %v1790_v62 = vld [vmem:[#allocation11 + $0x908] sm:$0xff] }
 0x245   : > { %4677 = vmatpush1.bf16.msra.mxu0 %v5883_v17  ;;  %4841 = vmatpush1.bf16.msra.mxu1 %v5885_v18  ;;  %v5932_v18 = vcombine.high %v1757_v5, %v1761_v6 }
 0x246   : > { %4678 = vmatprep.subr.bf16.mxu0 %v5892_v19  ;;  %4842 = vmatprep.subr.bf16.mxu1 %v5894_v20  ;;  %v5934_v19 = vcombine.high %v1758_v9, %v1762_v12  ;;  %v1765_v20 = vld [vmem:[#allocation11 + $0x840] sm:$0xff] }
 0x249   : > { %4679 = vmatpush1.bf16.msra.mxu0 %v5891_v31  ;;  %4843 = vmatpush1.bf16.msra.mxu1 %v5893_v32  ;;  %v7097_v31 = vpack.c.bf16 %v1487_v8, %v1487_v8  ;;  %v5931_v32 = vcombine.low %v1757_v5, %v1761_v6  ;;  %v1801_v6 = vld [vmem:[#allocation11 + $0x960] sm:$0xff] }
 0x24a   : > { %4680 = vmatprep.subr.bf16.mxu0 %v5900_v33  ;;  %4844 = vmatprep.subr.bf16.mxu1 %v5902_v34  ;;  %v5933_v33 = vcombine.low %v1758_v9, %v1762_v12  ;;  %v5940_v34 = vcombine.high %v1765_v20, %v1769_v21  ;;  %v1798_v9 = vld [vmem:[#allocation11 + $0x948] sm:$0xff] }
 0x24b   : > { %v1802_v12 = vld [vmem:[#allocation11 + $0x968] sm:$0xff] }
 0x24d   : > { %4681 = vmatpush1.bf16.msra.mxu0 %v5899_v40  ;;  %4845 = vmatpush1.bf16.msra.mxu1 %v5901_v41 }
 0x24e   : > { %4682 = vmatprep.subr.bf16.mxu0 %v5908_v43  ;;  %4846 = vmatprep.subr.bf16.mxu1 %v5910_v44  ;;  %v5939_v43 = vcombine.low %v1765_v20, %v1769_v21  ;;  %v5941_v44 = vcombine.low %v1766_v22, %v1770_v28  ;;  %v1813_v22 = vld [vmem:[#allocation11 + $0x9c0] sm:$0xff] }
 0x24f   : > { %v1817_v28 = vld [vmem:[#allocation11 + $0x9e0] sm:$0xff] }
 0x251   : > { %4683 = vmatpush1.bf16.msra.mxu0 %v5907_v51  ;;  %4847 = vmatpush1.bf16.msra.mxu1 %v5909_v52  ;;  %v7094_v0 = vpop.f32.mrb[4].mxu0  ;;  %v1785_v51 = vld [vmem:[#allocation11 + $0x8e0] sm:$0xff]  ;;  %v1782_v52 = vld [vmem:[#allocation11 + $0x8c8] sm:$0xff] }
 0x252   : > { %4684 = vmatprep.subr.bf16.mxu0 %v5916_v53  ;;  %4848 = vmatprep.subr.bf16.mxu1 %v5918_v55  ;;  %v1423_v11 = vpop.f32.mrb[5].mxu0  ;;  %v1786_v53 = vld [vmem:[#allocation11 + $0x8e8] sm:$0xff]  ;;  %v5956_v58 = vcombine.high %v1781_v49, %v1785_v51 }
 0x253   : > { %v1424_v2 = vadd.f32 %v1423_v11, %v648_v60  ;;  %v1425_v7 = vpop.f32.mrb[6].mxu0  ;;  %v7103_v41 = vpop.f32.mrb[4].mxu1  ;;  %v5958_v59 = vcombine.high %v1782_v52, %v1786_v53  ;;  %v1789_v60 = vld [vmem:[#allocation11 + $0x900] sm:$0xff] }
 0x254   : > { %v1426_v13 = vpop.f32.mrb[7].mxu0  ;;  %v7105_v45 = vpop.f32.mrb[5].mxu1  ;;  %v1797_v11 = vld [vmem:[#allocation11 + $0x940] sm:$0xff] }
 0x255   : > { %4685 = vmatpush1.bf16.msra.mxu0 %v5915_v54  ;;  %4849 = vmatpush1.bf16.msra.mxu1 %v5917_v63  ;;  %v1474_v17 = vmax.f32 %v1424_v2, 0.0  ;;  %v1466_v50 = vpop.f32.mrb[6].mxu1  ;;  %v1794_v54 = vld [vmem:[#allocation11 + $0x928] sm:$0xff]  ;;  %v5955_v63 = vcombine.low %v1781_v49, %v1785_v51  ;;  %v5963_v2 = vcombine.low %v1789_v60, %v1793_v61  ;;  %v5972_v8 = vcombine.high %v1797_v11, %v1801_v6  ;;  %v1805_v13 = vld [vmem:[#allocation11 + $0x980] sm:$0xff] }
 0x256   : > { %4686 = vmatprep.subr.bf16.mxu0 %v5924_v1  ;;  %4850 = vmatprep.subr.bf16.mxu1 %v5926_v4  ;;  %v1467_v55 = vpop.f32.mrb[7].mxu1  ;;  %v5957_v1 = vcombine.low %v1782_v52, %v1786_v53  ;;  %v5964_v4 = vcombine.high %v1789_v60, %v1793_v61  ;;  %v5966_v5 = vcombine.high %v1790_v62, %v1794_v54  ;;  %v1829_v50 = vld [vmem:[#allocation11 + $0xa40] sm:$0xff]  ;;  %v1830_v52 = vld [vmem:[#allocation11 + $0xa48] sm:$0xff] }
 0x257   : > { %v1490_v29 = vmul.f32 %v1482_v10, %v1474_v17  ;;  %v5965_v7 = vcombine.low %v1790_v62, %v1794_v54  ;;  %v5974_v10 = vcombine.high %v1798_v9, %v1802_v12  ;;  %v1810_v17 = vld [vmem:[#allocation11 + $0x9a8] sm:$0xff]  ;;  %v1833_v51 = vld [vmem:[#allocation11 + $0xa60] sm:$0xff]  ;;  %v5995_v55 = vcombine.low %v1821_v37, %v1825_v38 }
 0x258   : > { %v1834_v53 = vld [vmem:[#allocation11 + $0xa68] sm:$0xff]  ;;  %v1841_v60 = vld [vmem:[#allocation11 + $0xaa0] sm:$0xff]  ;;  %v6003_v54 = vcombine.low %v1829_v50, %v1833_v51 }
 0x259   : > { %4687 = vmatpush1.bf16.msra.mxu0 %v5923_v14  ;;  %4851 = vmatpush1.bf16.msra.mxu1 %v5925_v16  ;;  %v7099_v40 = vpack.c.bf16 %v1490_v29, %v1490_v29  ;;  %v1809_v14 = vld [vmem:[#allocation11 + $0x9a0] sm:$0xff]  ;;  %v1806_v16 = vld [vmem:[#allocation11 + $0x988] sm:$0xff] }
 0x25a   : > { %4697 = vmatprep.subr.bf16.mxu0 %v5932_v18  ;;  %4861 = vmatprep.subr.bf16.mxu1 %v5934_v19  ;;  %v5971_v18 = vcombine.low %v1797_v11, %v1801_v6  ;;  %v5973_v19 = vcombine.low %v1798_v9, %v1802_v12  ;;  %v5980_v20 = vcombine.high %v1805_v13, %v1809_v14  ;;  %v1814_v29 = vld [vmem:[#allocation11 + $0x9c8] sm:$0xff]  ;;  %v1849_v11 = vld [vmem:[#allocation11 + $0xae0] sm:$0xff] }
 0x25b   : > { %v5982_v21 = vcombine.high %v1806_v16, %v1810_v17  ;;  %v1838_v61 = vld [vmem:[#allocation11 + $0xa88] sm:$0xff] }
 0x25c   : > { %4689 = vmatmul.mubr.bf16.vlgmr.msra.gmra.mrb[8].mxu0 %v7097_v31  ;;  %4853 = vmatmul.mubr.bf16.vlgmr.msra.gmra.mrb[8].mxu1 %v7097_v31  ;;  %v1842_v62 = vld [vmem:[#allocation11 + $0xaa8] sm:$0xff] }
 0x25d   : > { %4698 = vmatpush1.bf16.msra.mxu0 %v5931_v32  ;;  %4862 = vmatpush1.bf16.msra.mxu1 %v5933_v33  ;;  %v1818_v32 = vld [vmem:[#allocation11 + $0x9e8] sm:$0xff]  ;;  %v5979_v33 = vcombine.low %v1805_v13, %v1809_v14  ;;  %v1857_v13 = vld [vmem:[#allocation11 + $0xb20] sm:$0xff] }
 0x25e   : > { %4699 = vmatprep.subr.bf16.mxu0 %v5940_v34  ;;  %4863 = vmatprep.subr.bf16.mxu1 %v5942_v35  ;;  %v5981_v34 = vcombine.low %v1806_v16, %v1810_v17  ;;  %v5988_v35 = vcombine.high %v1813_v22, %v1817_v28  ;;  %v5990_v36 = vcombine.high %v1814_v29, %v1818_v32  ;;  %v1846_v6 = vld [vmem:[#allocation11 + $0xac8] sm:$0xff]  ;;  %v7110_v17 = vsub.s32 4, %v7040_v23 }
 0x25f   : > { %4729 = vmatprep.mubr.bf16.mxu0 %v7099_v40  ;;  %4893 = vmatprep.mubr.bf16.mxu1 %v7099_v40  ;;  %v1850_v9 = vld [vmem:[#allocation11 + $0xae8] sm:$0xff] }
 0x260   : > { %v1854_v14 = vld [vmem:[#allocation11 + $0xb08] sm:$0xff] }
 0x261   : > { %4700 = vmatpush1.bf16.msra.mxu0 %v5939_v43  ;;  %4864 = vmatpush1.bf16.msra.mxu1 %v5941_v44  ;;  %v1826_v43 = vld [vmem:[#allocation11 + $0xa28] sm:$0xff]  ;;  %v5987_v44 = vcombine.low %v1813_v22, %v1817_v28  ;;  %v1861_v22 = vld [vmem:[#allocation11 + $0xb40] sm:$0xff] }
 0x262   : > { %4701 = vmatprep.subr.bf16.mxu0 %v5948_v46  ;;  %4865 = vmatprep.subr.bf16.mxu1 %v5950_v3  ;;  %v5989_v46 = vcombine.low %v1814_v29, %v1818_v32  ;;  %v5996_v3 = vcombine.high %v1821_v37, %v1825_v38  ;;  %v5998_v49 = vcombine.high %v1822_v39, %v1826_v43  ;;  %v1858_v16 = vld [vmem:[#allocation11 + $0xb28] sm:$0xff]  ;;  %v1865_v28 = vld [vmem:[#allocation11 + $0xb60] sm:$0xff] }
 0x263   : > { %v1862_v29 = vld [vmem:[#allocation11 + $0xb48] sm:$0xff]  ;;  %v6036_v37 = vcombine.high %v1861_v22, %v1865_v28 }
 0x264   : > { %v1866_v32 = vld [vmem:[#allocation11 + $0xb68] sm:$0xff] }
 0x265   : > { %4702 = vmatpush1.bf16.msra.mxu0 %v5947_v56  ;;  %4866 = vmatpush1.bf16.msra.mxu1 %v5949_v57  ;;  %v5997_v56 = vcombine.low %v1822_v39, %v1826_v43  ;;  %v6004_v57 = vcombine.high %v1829_v50, %v1833_v51  ;;  %v6038_v38 = vcombine.high %v1862_v29, %v1866_v32  ;;  %v1869_v39 = vld [vmem:[#allocation11 + $0xb80] sm:$0xff] }
 0x266   : > { %4703 = vmatprep.subr.bf16.mxu0 %v5956_v58  ;;  %4867 = vmatprep.subr.bf16.mxu1 %v5958_v59  ;;  %v6006_v58 = vcombine.high %v1830_v52, %v1834_v53  ;;  %v1837_v59 = vld [vmem:[#allocation11 + $0xa80] sm:$0xff]  ;;  %v6035_v50 = vcombine.low %v1861_v22, %v1865_v28  ;;  %v6037_v51 = vcombine.low %v1862_v29, %v1866_v32  ;;  %v1902_v32 = vld [vmem:[#allocation11 + $0xc88] sm:$0xff] }
 0x267   : > { %v6011_v12 = vcombine.low %v1837_v59, %v1841_v60  ;;  %v1873_v43 = vld [vmem:[#allocation11 + $0xba0] sm:$0xff] }
 0x268   : > { %v1901_v28 = vld [vmem:[#allocation11 + $0xc80] sm:$0xff] }
 0x269   : > { %4704 = vmatpush1.bf16.msra.mxu0 %v5955_v63  ;;  %4868 = vmatpush1.bf16.msra.mxu1 %v5957_v1  ;;  %v6005_v63 = vcombine.low %v1830_v52, %v1834_v53  ;;  %v6012_v1 = vcombine.high %v1837_v59, %v1841_v60  ;;  %v6044_v52 = vcombine.high %v1869_v39, %v1873_v43  ;;  %v1905_v29 = vld [vmem:[#allocation11 + $0xca0] sm:$0xff] }
 0x26a   : > { %4705 = vmatprep.subr.bf16.mxu0 %v5964_v4  ;;  %4869 = vmatprep.subr.bf16.mxu1 %v5966_v5  ;;  %v6014_v4 = vcombine.high %v1838_v61, %v1842_v62  ;;  %v1845_v5 = vld [vmem:[#allocation11 + $0xac0] sm:$0xff] }
 0x26d   : > { %4706 = vmatpush1.bf16.msra.mxu0 %v5963_v2  ;;  %4870 = vmatpush1.bf16.msra.mxu1 %v5965_v7  ;;  %v6013_v2 = vcombine.low %v1838_v61, %v1842_v62  ;;  %v6020_v7 = vcombine.high %v1845_v5, %v1849_v11 }
 0x26e   : > { %4707 = vmatprep.subr.bf16.mxu0 %v5972_v8  ;;  %4871 = vmatprep.subr.bf16.mxu1 %v5974_v10  ;;  %v6022_v8 = vcombine.high %v1846_v6, %v1850_v9  ;;  %v1853_v10 = vld [vmem:[#allocation11 + $0xb00] sm:$0xff] }
 0x271   : > { %4708 = vmatpush1.bf16.msra.mxu0 %v5971_v18  ;;  %4872 = vmatpush1.bf16.msra.mxu1 %v5973_v19  ;;  %v6019_v18 = vcombine.low %v1845_v5, %v1849_v11  ;;  %v6021_v19 = vcombine.low %v1846_v6, %v1850_v9  ;;  %v1890_v5 = vld [vmem:[#allocation11 + $0xc28] sm:$0xff]  ;;  %v1484_v9 = vld [vmem:[%s6990_s27 + $0x38] sm:$0xff] }
 0x272   : > { %4709 = vmatprep.subr.bf16.mxu0 %v5980_v20  ;;  %4873 = vmatprep.subr.bf16.mxu1 %v5982_v21  ;;  %v6028_v20 = vcombine.high %v1853_v10, %v1857_v13  ;;  %v6030_v21 = vcombine.high %v1854_v14, %v1858_v16 }
 0x275   : > { %4710 = vmatpush1.bf16.msra.mxu0 %v5979_v33  ;;  %4874 = vmatpush1.bf16.msra.mxu1 %v5981_v34  ;;  %v7113_v33 = vsub.s32 7, %v7040_v23  ;;  %v644_v34 = vrot.slane %v7045_v26, %v7110_v17 }
 0x276   : > { %4711 = vmatprep.subr.bf16.mxu0 %v5988_v35  ;;  %4875 = vmatprep.subr.bf16.mxu1 %v5990_v36  ;;  %v6027_v35 = vcombine.low %v1853_v10, %v1857_v13  ;;  %v6029_v36 = vcombine.low %v1854_v14, %v1858_v16  ;;  %v1897_v10 = vld [vmem:[#allocation11 + $0xc60] sm:$0xff]  ;;  %v1894_v13 = vld [vmem:[#allocation11 + $0xc48] sm:$0xff] }
 0x277   : > { %v1898_v14 = vld [vmem:[#allocation11 + $0xc68] sm:$0xff] }
 0x278   : > { %v6070_v22 = vcombine.high %v1894_v13, %v1898_v14 }
 0x279   : > { %4712 = vmatpush1.bf16.msra.mxu0 %v5987_v44  ;;  %4876 = vmatpush1.bf16.msra.mxu1 %v5989_v46  ;;  %v1870_v44 = vld [vmem:[#allocation11 + $0xb88] sm:$0xff] }
 0x27a   : > { %4713 = vmatprep.subr.bf16.mxu0 %v5996_v3  ;;  %4877 = vmatprep.subr.bf16.mxu1 %v5998_v49  ;;  %v1874_v46 = vld [vmem:[#allocation11 + $0xba8] sm:$0xff]  ;;  %v656_v3 = vrot.slane %v7045_v26, %v7113_v33  ;;  %v1422_v49 = vadd.f32 %v7094_v0, %v644_v34  ;;  %v1481_v26 = vld [vmem:[%s6990_s27 + $0x20] sm:$0xff]  ;;  %v6043_v0 = vcombine.low %v1869_v39, %v1873_v43  ;;  %v1909_v43 = vld [vmem:[#allocation11 + $0xcc0] sm:$0xff] }
 0x27b   : > { %v6046_v53 = vcombine.high %v1870_v44, %v1874_v46  ;;  %v6045_v61 = vcombine.low %v1870_v44, %v1874_v46  ;;  %v1906_v34 = vld [vmem:[#allocation11 + $0xca8] sm:$0xff]  ;;  %v1913_v44 = vld [vmem:[#allocation11 + $0xce0] sm:$0xff] }
 0x27c   : > { %v1465_v59 = vadd.f32 %v7105_v45, %v656_v3  ;;  %v1473_v60 = vmax.f32 %v1422_v49, 0.0  ;;  %v6078_v39 = vcombine.high %v1902_v32, %v1906_v34  ;;  %v1910_v46 = vld [vmem:[#allocation11 + $0xcc8] sm:$0xff]  ;;  %v6075_v49 = vcombine.low %v1901_v28, %v1905_v29 }
 0x27d   : > { %4714 = vmatpush1.bf16.msra.mxu0 %v5995_v55  ;;  %4878 = vmatpush1.bf16.msra.mxu1 %v5997_v56  ;;  %v1877_v55 = vld [vmem:[#allocation11 + $0xbc0] sm:$0xff]  ;;  %v1914_v3 = vld [vmem:[#allocation11 + $0xce8] sm:$0xff] }
 0x27e   : > { %4715 = vmatprep.subr.bf16.mxu0 %v6004_v57  ;;  %4879 = vmatprep.subr.bf16.mxu1 %v6006_v58  ;;  %v1881_v56 = vld [vmem:[#allocation11 + $0xbe0] sm:$0xff]  ;;  %v1878_v57 = vld [vmem:[#allocation11 + $0xbc8] sm:$0xff]  ;;  %v1476_v11 = vmax.f32 %v1465_v59, 0.0  ;;  %v1489_v6 = vmul.f32 %v1481_v26, %v1473_v60  ;;  %v6085_v59 = vcombine.low %v1910_v46, %v1914_v3 }
 0x27f   : > { %v1882_v58 = vld [vmem:[#allocation11 + $0xbe8] sm:$0xff]  ;;  %v6052_v62 = vcombine.high %v1877_v55, %v1881_v56  ;;  %v6051_v45 = vcombine.low %v1877_v55, %v1881_v56  ;;  %v1921_v55 = vld [vmem:[#allocation11 + $0xd20] sm:$0xff] }
 0x280   : > { %v1492_v16 = vmul.f32 %v1484_v9, %v1476_v11  ;;  %v1918_v56 = vld [vmem:[#allocation11 + $0xd08] sm:$0xff]  ;;  %v1933_v11 = vld [vmem:[#allocation11 + $0xd80] sm:$0xff] }
 0x281   : > { %4716 = vmatpush1.bf16.msra.mxu0 %v6003_v54  ;;  %4880 = vmatpush1.bf16.msra.mxu1 %v6005_v63  ;;  %v6054_v54 = vcombine.high %v1878_v57, %v1882_v58  ;;  %v1885_v63 = vld [vmem:[#allocation11 + $0xc00] sm:$0xff]  ;;  %v1934_v9 = vld [vmem:[#allocation11 + $0xd88] sm:$0xff] }
 0x282   : > { %4717 = vmatprep.subr.bf16.mxu0 %v6012_v1  ;;  %4881 = vmatprep.subr.bf16.mxu1 %v6014_v4  ;;  %v1889_v1 = vld [vmem:[#allocation11 + $0xc20] sm:$0xff]  ;;  %v1886_v4 = vld [vmem:[#allocation11 + $0xc08] sm:$0xff] }
 0x285   : > { %4718 = vmatpush1.bf16.msra.mxu0 %v6011_v12  ;;  %4882 = vmatpush1.bf16.msra.mxu1 %v6013_v2  ;;  %v6053_v12 = vcombine.low %v1878_v57, %v1882_v58  ;;  %v6060_v2 = vcombine.high %v1885_v63, %v1889_v1  ;;  %v1922_v57 = vld [vmem:[#allocation11 + $0xd28] sm:$0xff]  ;;  %v6083_v58 = vcombine.low %v1909_v43, %v1913_v44 }
 0x286   : > { %4719 = vmatprep.subr.bf16.mxu0 %v6020_v7  ;;  %4883 = vmatprep.subr.bf16.mxu1 %v6022_v8  ;;  %v6062_v7 = vcombine.high %v1886_v4, %v1890_v5  ;;  %v1893_v8 = vld [vmem:[#allocation11 + $0xc40] sm:$0xff]  ;;  %v6094_v26 = vcombine.high %v1918_v56, %v1922_v57 }
 0x289   : > { %4720 = vmatpush1.bf16.msra.mxu0 %v6019_v18  ;;  %4884 = vmatpush1.bf16.msra.mxu1 %v6021_v19  ;;  %v7123_v18 = vpack.c.bf16 %v1489_v6, %v1489_v6  ;;  %v6059_v19 = vcombine.low %v1885_v63, %v1889_v1  ;;  %v6093_v1 = vcombine.low %v1918_v56, %v1922_v57  ;;  %v1937_v6 = vld [vmem:[#allocation11 + $0xda0] sm:$0xff]  ;;  %v1966_v56 = vld [vmem:[#allocation11 + $0xe88] sm:$0xff] }
 0x28a   : > { %4721 = vmatprep.subr.bf16.mxu0 %v6028_v20  ;;  %4885 = vmatprep.subr.bf16.mxu1 %v6030_v21  ;;  %v6061_v20 = vcombine.low %v1886_v4, %v1890_v5  ;;  %v6068_v21 = vcombine.high %v1893_v8, %v1897_v10  ;;  %v1970_v57 = vld [vmem:[#allocation11 + $0xea8] sm:$0xff] }
 0x28d   : > { %4722 = vmatpush1.bf16.msra.mxu0 %v6027_v35  ;;  %4886 = vmatpush1.bf16.msra.mxu1 %v6029_v36  ;;  %v7125_v35 = vpack.c.bf16 %v1492_v16, %v1492_v16  ;;  %v6067_v36 = vcombine.low %v1893_v8, %v1897_v10  ;;  %v1941_v10 = vld [vmem:[#allocation11 + $0xdc0] sm:$0xff]  ;;  %v1946_v16 = vld [vmem:[#allocation11 + $0xde8] sm:$0xff] }
 0x28e   : > { %4723 = vmatprep.subr.bf16.mxu0 %v6036_v37  ;;  %4887 = vmatprep.subr.bf16.mxu1 %v6038_v38  ;;  %v6069_v37 = vcombine.low %v1894_v13, %v1898_v14  ;;  %v6076_v38 = vcombine.high %v1901_v28, %v1905_v29  ;;  %v1945_v13 = vld [vmem:[#allocation11 + $0xde0] sm:$0xff]  ;;  %v1942_v14 = vld [vmem:[#allocation11 + $0xdc8] sm:$0xff] }
 0x28f   : > { %v1949_v28 = vld [vmem:[#allocation11 + $0xe00] sm:$0xff] }
 0x290   : > { %v1953_v29 = vld [vmem:[#allocation11 + $0xe20] sm:$0xff] }
 0x291   : > { %4724 = vmatpush1.bf16.msra.mxu0 %v6035_v50  ;;  %4888 = vmatpush1.bf16.msra.mxu1 %v6037_v51  ;;  %v6077_v50 = vcombine.low %v1902_v32, %v1906_v34  ;;  %v6084_v51 = vcombine.high %v1909_v43, %v1913_v44  ;;  %v1950_v32 = vld [vmem:[#allocation11 + $0xe08] sm:$0xff]  ;;  %v1957_v43 = vld [vmem:[#allocation11 + $0xe40] sm:$0xff] }
 0x292   : > { %4725 = vmatprep.subr.bf16.mxu0 %v6044_v52  ;;  %4889 = vmatprep.subr.bf16.mxu1 %v6046_v53  ;;  %v6086_v52 = vcombine.high %v1910_v46, %v1914_v3  ;;  %v1917_v53 = vld [vmem:[#allocation11 + $0xd00] sm:$0xff]  ;;  %v1954_v34 = vld [vmem:[#allocation11 + $0xe28] sm:$0xff] }
 0x293   : > { %v6092_v60 = vcombine.high %v1917_v53, %v1921_v55  ;;  %v6091_v63 = vcombine.low %v1917_v53, %v1921_v55  ;;  %v1961_v44 = vld [vmem:[#allocation11 + $0xe60] sm:$0xff]  ;;  %v1958_v46 = vld [vmem:[#allocation11 + $0xe48] sm:$0xff] }
 0x294   : > { %v1962_v3 = vld [vmem:[#allocation11 + $0xe68] sm:$0xff]  ;;  %v1965_v53 = vld [vmem:[#allocation11 + $0xe80] sm:$0xff] }
 0x295   : > { %4726 = vmatpush1.bf16.msra.mxu0 %v6043_v0  ;;  %4890 = vmatpush1.bf16.msra.mxu1 %v6045_v61  ;;  %v1925_v0 = vld [vmem:[#allocation11 + $0xd40] sm:$0xff] }
 0x296   : > { %4727 = vmatprep.subr.bf16.mxu0 %v6052_v62  ;;  %4891 = vmatprep.subr.bf16.mxu1 %v6054_v54  ;;  %v1929_v61 = vld [vmem:[#allocation11 + $0xd60] sm:$0xff]  ;;  %v1926_v62 = vld [vmem:[#allocation11 + $0xd48] sm:$0xff] }
 0x297   : > { %v1930_v54 = vld [vmem:[#allocation11 + $0xd68] sm:$0xff]  ;;  %v6100_v4 = vcombine.high %v1925_v0, %v1929_v61  ;;  %v1969_v55 = vld [vmem:[#allocation11 + $0xea0] sm:$0xff] }
 0x298   : > { %v6102_v5 = vcombine.high %v1926_v62, %v1930_v54 }
 0x299   : > { %4728 = vmatpush1.bf16.msra.mxu0 %v6051_v45  ;;  %4892 = vmatpush1.bf16.msra.mxu1 %v6053_v12  ;;  %v1938_v45 = vld [vmem:[#allocation11 + $0xda8] sm:$0xff]  ;;  %v6099_v12 = vcombine.low %v1925_v0, %v1929_v61  ;;  %v1973_v0 = vld [vmem:[#allocation11 + $0xec0] sm:$0xff] }
 0x29a   : > { %4738 = vmatprep.subr.bf16.mxu0 %v6060_v2  ;;  %4902 = vmatprep.subr.bf16.mxu1 %v6062_v7  ;;  %v6101_v2 = vcombine.low %v1926_v62, %v1930_v54  ;;  %v6108_v7 = vcombine.high %v1933_v11, %v1937_v6  ;;  %v6110_v8 = vcombine.high %v1934_v9, %v1938_v45  ;;  %v1977_v61 = vld [vmem:[#allocation11 + $0xee0] sm:$0xff]  ;;  %v1974_v62 = vld [vmem:[#allocation11 + $0xec8] sm:$0xff] }
 0x29b   : > { %v1978_v54 = vld [vmem:[#allocation11 + $0xee8] sm:$0xff] }
 0x29c   : > { %4730 = vmatmul.mubr.bf16.vlgmr.msra.gmra.mrb[8].mxu0 %v7123_v18  ;;  %4894 = vmatmul.mubr.bf16.vlgmr.msra.gmra.mrb[8].mxu1 %v7123_v18 }
 0x29d   : > { %4739 = vmatpush1.bf16.msra.mxu0 %v6059_v19  ;;  %4903 = vmatpush1.bf16.msra.mxu1 %v6061_v20  ;;  %v6107_v19 = vcombine.low %v1933_v11, %v1937_v6  ;;  %v6109_v20 = vcombine.low %v1934_v9, %v1938_v45  ;;  %v1981_v11 = vld [vmem:[#allocation11 + $0xf00] sm:$0xff]  ;;  %v1982_v9 = vld [vmem:[#allocation11 + $0xf08] sm:$0xff] }
 0x29e   : > { %4740 = vmatprep.subr.bf16.mxu0 %v6068_v21  ;;  %4904 = vmatprep.subr.bf16.mxu1 %v6070_v22  ;;  %v6116_v21 = vcombine.high %v1941_v10, %v1945_v13  ;;  %v6118_v22 = vcombine.high %v1942_v14, %v1946_v16  ;;  %v1985_v6 = vld [vmem:[#allocation11 + $0xf20] sm:$0xff]  ;;  %v1986_v45 = vld [vmem:[#allocation11 + $0xf28] sm:$0xff] }
 0x29f   : > { %4770 = vmatprep.mubr.bf16.mxu0 %v7125_v35  ;;  %4934 = vmatprep.mubr.bf16.mxu1 %v7125_v35 }
 0x2a1   : > { %4741 = vmatpush1.bf16.msra.mxu0 %v6067_v36  ;;  %4905 = vmatpush1.bf16.msra.mxu1 %v6069_v37  ;;  %v6115_v36 = vcombine.low %v1941_v10, %v1945_v13  ;;  %v6117_v37 = vcombine.low %v1942_v14, %v1946_v16  ;;  %v6158_v10 = vcombine.high %v1982_v9, %v1986_v45  ;;  %v1989_v13 = vld [vmem:[#allocation11 + $0xf40] sm:$0xff]  ;;  %v1990_v16 = vld [vmem:[#allocation11 + $0xf48] sm:$0xff] }
 0x2a2   : > { %4742 = vmatprep.subr.bf16.mxu0 %v6076_v38  ;;  %4906 = vmatprep.subr.bf16.mxu1 %v6078_v39  ;;  %v6124_v38 = vcombine.high %v1949_v28, %v1953_v29  ;;  %v6126_v39 = vcombine.high %v1950_v32, %v1954_v34  ;;  %v1993_v14 = vld [vmem:[#allocation11 + $0xf60] sm:$0xff] }
 0x2a5   : > { %4743 = vmatpush1.bf16.msra.mxu0 %v6075_v49  ;;  %4907 = vmatpush1.bf16.msra.mxu1 %v6077_v50  ;;  %v6123_v49 = vcombine.low %v1949_v28, %v1953_v29  ;;  %v6125_v50 = vcombine.low %v1950_v32, %v1954_v34  ;;  %v6164_v29 = vcombine.high %v1989_v13, %v1993_v14  ;;  %v1997_v32 = vld [vmem:[#allocation11 + $0xf80] sm:$0xff] }
 0x2a6   : > { %4744 = vmatprep.subr.bf16.mxu0 %v6084_v51  ;;  %4908 = vmatprep.subr.bf16.mxu1 %v6086_v52  ;;  %v6132_v51 = vcombine.high %v1957_v43, %v1961_v44  ;;  %v6134_v52 = vcombine.high %v1958_v46, %v1962_v3  ;;  %v2001_v34 = vld [vmem:[#allocation11 + $0xfa0] sm:$0xff] }
 0x2a9   : > { %4745 = vmatpush1.bf16.msra.mxu0 %v6083_v58  ;;  %4909 = vmatpush1.bf16.msra.mxu1 %v6085_v59  ;;  %v6131_v58 = vcombine.low %v1957_v43, %v1961_v44  ;;  %v6133_v59 = vcombine.low %v1958_v46, %v1962_v3  ;;  %v6172_v44 = vcombine.high %v1997_v32, %v2001_v34  ;;  %v2005_v3 = vld [vmem:[#allocation11 + $0xfc0] sm:$0xff] }
 0x2aa   : > { %4746 = vmatprep.subr.bf16.mxu0 %v6092_v60  ;;  %4910 = vmatprep.subr.bf16.mxu1 %v6094_v26  ;;  %v6140_v60 = vcombine.high %v1965_v53, %v1969_v55  ;;  %v6142_v26 = vcombine.high %v1966_v56, %v1970_v57 }
 0x2ad   : > { %4747 = vmatpush1.bf16.msra.mxu0 %v6091_v63  ;;  %4911 = vmatpush1.bf16.msra.mxu1 %v6093_v1  ;;  %v6139_v63 = vcombine.low %v1965_v53, %v1969_v55  ;;  %v6141_v1 = vcombine.low %v1966_v56, %v1970_v57  ;;  %v1483_v56 = vld [vmem:[%s6990_s27 + $0x30] sm:$0xff] }
 0x2ae   : > { %4748 = vmatprep.subr.bf16.mxu0 %v6100_v4  ;;  %4912 = vmatprep.subr.bf16.mxu1 %v6102_v5  ;;  %v6148_v4 = vcombine.high %v1973_v0, %v1977_v61  ;;  %v6150_v5 = vcombine.high %v1974_v62, %v1978_v54 }
 0x2b1   : > { %4749 = vmatpush1.bf16.msra.mxu0 %v6099_v12  ;;  %4913 = vmatpush1.bf16.msra.mxu1 %v6101_v2  ;;  %v6147_v12 = vcombine.low %v1973_v0, %v1977_v61  ;;  %v6149_v2 = vcombine.low %v1974_v62, %v1978_v54 }
 0x2b2   : > { %4750 = vmatprep.subr.bf16.mxu0 %v6108_v7  ;;  %4914 = vmatprep.subr.bf16.mxu1 %v6110_v8  ;;  %v7132_v7 = vsub.s32 6, %v7040_v23  ;;  %v6156_v8 = vcombine.high %v1981_v11, %v1985_v6 }
 0x2b5   : > { %4751 = vmatpush1.bf16.msra.mxu0 %v6107_v19  ;;  %4915 = vmatpush1.bf16.msra.mxu1 %v6109_v20  ;;  %v1994_v19 = vld [vmem:[#allocation11 + $0xf68] sm:$0xff]  ;;  %v6155_v20 = vcombine.low %v1981_v11, %v1985_v6  ;;  %v1516_v11 = vld [vmem:[#allocation11 + $0x78] sm:$0xff] }
 0x2b6   : > { %4752 = vmatprep.subr.bf16.mxu0 %v6116_v21  ;;  %4916 = vmatprep.subr.bf16.mxu1 %v6118_v22  ;;  %v6157_v21 = vcombine.low %v1982_v9, %v1986_v45  ;;  %v6351_v22 = vld [vmem:[#allocation10] sm:$0xff]  ;;  %v6166_v23 = vcombine.high %v1990_v16, %v1994_v19 }
 0x2b7   : > { %v652_v28 = vrot.slane %v6351_v22, %v7132_v7  ;;  %v1527_v22 = vld [vmem:[#allocation11 + $0xd0] sm:$0xff] }
 0x2b9   : > { %4753 = vmatpush1.bf16.msra.mxu0 %v6115_v36  ;;  %4917 = vmatpush1.bf16.msra.mxu1 %v6117_v37  ;;  %v1998_v36 = vld [vmem:[#allocation11 + $0xf88] sm:$0xff]  ;;  %v1463_v43 = vadd.f32 %v7103_v41, %v652_v28  ;;  %v1507_v41 = vld [vmem:[#allocation11 + $0x30] sm:$0xff] }
 0x2ba   : > { %4754 = vmatprep.subr.bf16.mxu0 %v6124_v38  ;;  %4918 = vmatprep.subr.bf16.mxu1 %v6126_v39  ;;  %v2002_v37 = vld [vmem:[#allocation11 + $0xfa8] sm:$0xff]  ;;  %v6163_v38 = vcombine.low %v1989_v13, %v1993_v14  ;;  %v6165_v39 = vcombine.low %v1990_v16, %v1994_v19  ;;  %v1520_v13 = vld [vmem:[#allocation11 + $0x98] sm:$0xff]  ;;  %v1531_v28 = vld [vmem:[#allocation11 + $0xf0] sm:$0xff] }
 0x2bb   : > { %v6174_v46 = vcombine.high %v1998_v36, %v2002_v37  ;;  %v6173_v53 = vcombine.low %v1998_v36, %v2002_v37  ;;  %v1475_v55 = vmax.f32 %v1463_v43, 0.0  ;;  %v1524_v14 = vld [vmem:[#allocation11 + $0xb8] sm:$0xff]  ;;  %v5704_v36 = vcombine.high %v1527_v22, %v1531_v28 }
 0x2bc   : > { %v1540_v43 = vld [vmem:[#allocation11 + $0x138] sm:$0xff] }
 0x2bd   : > { %4755 = vmatpush1.bf16.msra.mxu0 %v6123_v49  ;;  %4919 = vmatpush1.bf16.msra.mxu1 %v6125_v50  ;;  %v2009_v49 = vld [vmem:[#allocation11 + $0xfe0] sm:$0xff]  ;;  %v2006_v50 = vld [vmem:[#allocation11 + $0xfc8] sm:$0xff]  ;;  %v1491_v62 = vmul.f32 %v1483_v56, %v1475_v55 }
 0x2be   : > { %4756 = vmatprep.subr.bf16.mxu0 %v6132_v51  ;;  %4920 = vmatprep.subr.bf16.mxu1 %v6134_v52  ;;  %v2010_v51 = vld [vmem:[#allocation11 + $0xfe8] sm:$0xff]  ;;  %v6171_v52 = vcombine.low %v1997_v32, %v2001_v34  ;;  %v6180_v57 = vcombine.high %v2005_v3, %v2009_v49  ;;  %v6179_v0 = vcombine.low %v2005_v3, %v2009_v49 }
 0x2bf   : > { %v6181_v61 = vcombine.low %v2006_v50, %v2010_v51  ;;  %v7137_v9 = vpack.c.bf16 %v1491_v62, %v1491_v62  ;;  %v5697_v34 = vcombine.low %v1520_v13, %v1524_v14 }
 0x2c1   : > { %4757 = vmatpush1.bf16.msra.mxu0 %v6131_v58  ;;  %4921 = vmatpush1.bf16.msra.mxu1 %v6133_v59  ;;  %v6182_v58 = vcombine.high %v2006_v50, %v2010_v51  ;;  %v1503_v59 = vld [vmem:[#allocation11 + $0x10] sm:$0xff] }
 0x2c2   : > { %4758 = vmatprep.subr.bf16.mxu0 %v6140_v60  ;;  %4922 = vmatprep.subr.bf16.mxu1 %v6142_v26  ;;  %v1504_v60 = vld [vmem:[#allocation11 + $0x18] sm:$0xff]  ;;  %v5680_v54 = vcombine.high %v1503_v59, %v1507_v41  ;;  %v5679_v6 = vcombine.low %v1503_v59, %v1507_v41  ;;  %v1543_v50 = vld [vmem:[#allocation11 + $0x150] sm:$0xff] }
 0x2c3   : > { %v1508_v26 = vld [vmem:[#allocation11 + $0x38] sm:$0xff]  ;;  %v1547_v51 = vld [vmem:[#allocation11 + $0x170] sm:$0xff] }
 0x2c4   : > { %v5681_v45 = vcombine.low %v1504_v60, %v1508_v26  ;;  %v1551_v59 = vld [vmem:[#allocation11 + $0x190] sm:$0xff] }
 0x2c5   : > { %4759 = vmatpush1.bf16.msra.mxu0 %v6139_v63  ;;  %4923 = vmatpush1.bf16.msra.mxu1 %v6141_v1  ;;  %v5682_v63 = vcombine.high %v1504_v60, %v1508_v26  ;;  %v1511_v1 = vld [vmem:[#allocation11 + $0x50] sm:$0xff]  ;;  %v1552_v60 = vld [vmem:[#allocation11 + $0x198] sm:$0xff] }
 0x2c6   : > { %4760 = vmatprep.subr.bf16.mxu0 %v6148_v4  ;;  %4924 = vmatprep.subr.bf16.mxu1 %v6150_v5  ;;  %v1515_v4 = vld [vmem:[#allocation11 + $0x70] sm:$0xff]  ;;  %v1512_v5 = vld [vmem:[#allocation11 + $0x58] sm:$0xff] }
 0x2c7   : > { %v5687_v16 = vcombine.low %v1511_v1, %v1515_v4  ;;  %v5689_v19 = vcombine.low %v1512_v5, %v1516_v11  ;;  %v1555_v41 = vld [vmem:[#allocation11 + $0x1b0] sm:$0xff]  ;;  %v1556_v26 = vld [vmem:[#allocation11 + $0x1b8] sm:$0xff] }
 0x2c8   : > { %v5728_v62 = vcombine.high %v1551_v59, %v1555_v41 }
 0x2c9   : > { %4761 = vmatpush1.bf16.msra.mxu0 %v6147_v12  ;;  %4925 = vmatpush1.bf16.msra.mxu1 %v6149_v2  ;;  %v5688_v12 = vcombine.high %v1511_v1, %v1515_v4  ;;  %v5690_v2 = vcombine.high %v1512_v5, %v1516_v11  ;;  %v1563_v1 = vld [vmem:[#allocation11 + $0x1f0] sm:$0xff]  ;;  %v1560_v4 = vld [vmem:[#allocation11 + $0x1d8] sm:$0xff]  ;;  %v5727_v11 = vcombine.low %v1551_v59, %v1555_v41 }
 0x2ca   : > { %4762 = vmatprep.subr.bf16.mxu0 %v6156_v8  ;;  %4926 = vmatprep.subr.bf16.mxu1 %v6158_v10  ;;  %v1519_v8 = vld [vmem:[#allocation11 + $0x90] sm:$0xff]  ;;  %v1564_v5 = vld [vmem:[#allocation11 + $0x1f8] sm:$0xff] }
 0x2cb   : > { %v1523_v10 = vld [vmem:[#allocation11 + $0xb0] sm:$0xff]  ;;  %v1600_v41 = vld [vmem:[#allocation11 + $0x318] sm:$0xff] }
 0x2cc   : > { %v5695_v32 = vcombine.low %v1519_v8, %v1523_v10  ;;  %v1603_v59 = vld [vmem:[#allocation11 + $0x330] sm:$0xff] }
 0x2cd   : > { %4763 = vmatpush1.bf16.msra.mxu0 %v6155_v20  ;;  %4927 = vmatpush1.bf16.msra.mxu1 %v6157_v21  ;;  %v5696_v20 = vcombine.high %v1519_v8, %v1523_v10  ;;  %v5698_v21 = vcombine.high %v1520_v13, %v1524_v14  ;;  %v1571_v8 = vld [vmem:[#allocation11 + $0x230] sm:$0xff]  ;;  %v1568_v10 = vld [vmem:[#allocation11 + $0x218] sm:$0xff] }
 0x2ce   : > { %4764 = vmatprep.subr.bf16.mxu0 %v6164_v29  ;;  %4928 = vmatprep.subr.bf16.mxu1 %v6166_v23  ;;  %v1528_v29 = vld [vmem:[#allocation11 + $0xd8] sm:$0xff] }
 0x2cf   : > { %v1532_v23 = vld [vmem:[#allocation11 + $0xf8] sm:$0xff] }
 0x2d0   : > { %v5706_v37 = vcombine.high %v1528_v29, %v1532_v23  ;;  %v1572_v13 = vld [vmem:[#allocation11 + $0x238] sm:$0xff] }
 0x2d1   : > { %4765 = vmatpush1.bf16.msra.mxu0 %v6163_v38  ;;  %4929 = vmatpush1.bf16.msra.mxu1 %v6165_v39  ;;  %v1535_v38 = vld [vmem:[#allocation11 + $0x110] sm:$0xff] }
 0x2d2   : > { %4766 = vmatprep.subr.bf16.mxu0 %v6172_v44  ;;  %4930 = vmatprep.subr.bf16.mxu1 %v6174_v46  ;;  %v1539_v39 = vld [vmem:[#allocation11 + $0x130] sm:$0xff]  ;;  %v5703_v44 = vcombine.low %v1527_v22, %v1531_v28  ;;  %v5705_v46 = vcombine.low %v1528_v29, %v1532_v23  ;;  %v1576_v28 = vld [vmem:[#allocation11 + $0x258] sm:$0xff] }
 0x2d3   : > { %v5712_v3 = vcombine.high %v1535_v38, %v1539_v39  ;;  %v5711_v55 = vcombine.low %v1535_v38, %v1539_v39  ;;  %v1579_v22 = vld [vmem:[#allocation11 + $0x270] sm:$0xff]  ;;  %v1580_v29 = vld [vmem:[#allocation11 + $0x278] sm:$0xff] }
 0x2d4   : > { %v1587_v38 = vld [vmem:[#allocation11 + $0x2b0] sm:$0xff]  ;;  %v1584_v39 = vld [vmem:[#allocation11 + $0x298] sm:$0xff] }
 0x2d5   : > { %4767 = vmatpush1.bf16.msra.mxu0 %v6171_v52  ;;  %4931 = vmatpush1.bf16.msra.mxu1 %v6173_v53  ;;  %v1544_v52 = vld [vmem:[#allocation11 + $0x158] sm:$0xff] }
 0x2d6   : > { %4768 = vmatprep.subr.bf16.mxu0 %v6180_v57  ;;  %4932 = vmatprep.subr.bf16.mxu1 %v6182_v58  ;;  %v1548_v53 = vld [vmem:[#allocation11 + $0x178] sm:$0xff]  ;;  %v5720_v57 = vcombine.high %v1543_v50, %v1547_v51 }
 0x2d7   : > { %v5722_v58 = vcombine.high %v1544_v52, %v1548_v53 }
 0x2d9   : > { %4769 = vmatpush1.bf16.msra.mxu0 %v6179_v0  ;;  %4933 = vmatpush1.bf16.msra.mxu1 %v6181_v61  ;;  %v5719_v0 = vcombine.low %v1543_v50, %v1547_v51  ;;  %v5721_v61 = vcombine.low %v1544_v52, %v1548_v53  ;;  %v1595_v50 = vld [vmem:[#allocation11 + $0x2f0] sm:$0xff]  ;;  %v1592_v51 = vld [vmem:[#allocation11 + $0x2d8] sm:$0xff] }
 0x2da   : > { %4943 = vmatprep.subr.bf16.mxu0 %v5680_v54  ;;  %5107 = vmatprep.subr.bf16.mxu1 %v5682_v63  ;;  %v5730_v54 = vcombine.high %v1552_v60, %v1556_v26  ;;  %v1559_v63 = vld [vmem:[#allocation11 + $0x1d0] sm:$0xff]  ;;  %v1596_v52 = vld [vmem:[#allocation11 + $0x2f8] sm:$0xff] }
 0x2db   : > { %v5735_v14 = vcombine.low %v1559_v63, %v1563_v1 }
 0x2dc   : > { %4771 = vmatmul.mubr.bf16.vlgmr.msra.gmra.mrb[8].mxu0 %v7137_v9  ;;  %4935 = vmatmul.mubr.bf16.vlgmr.msra.gmra.mrb[8].mxu1 %v7137_v9 }
 0x2dd   : > { %4944 = vmatpush1.bf16.msra.mxu0 %v5679_v6  ;;  %4975 = vmatprep.mubr.bf16.mxu0 %v7059_v47  ;;  %v5729_v6 = vcombine.low %v1552_v60, %v1556_v26  ;;  %v1604_v60 = vld [vmem:[#allocation11 + $0x338] sm:$0xff] }
 0x2de   : > { %5108 = vmatpush1.bf16.msra.mxu1 %v5681_v45  ;;  %5139 = vmatprep.mubr.bf16.mxu1 %v7059_v47  ;;  %v1536_v47 = vld [vmem:[#allocation11 + $0x118] sm:$0xff]  ;;  %v5736_v45 = vcombine.high %v1559_v63, %v1563_v1  ;;  %v1611_v63 = vld [vmem:[#allocation11 + $0x370] sm:$0xff] }
 0x2df   : > { %4945 = vmatprep.subr.bf16.mxu0 %v5688_v12  ;;  %5109 = vmatprep.subr.bf16.mxu1 %v5690_v2  ;;  %v5714_v49 = vcombine.high %v1536_v47, %v1540_v43  ;;  %v5713_v56 = vcombine.low %v1536_v47, %v1540_v43  ;;  %v5738_v12 = vcombine.high %v1560_v4, %v1564_v5  ;;  %v1567_v2 = vld [vmem:[#allocation11 + $0x210] sm:$0xff]  ;;  %v1588_v47 = vld [vmem:[#allocation11 + $0x2b8] sm:$0xff] }
 0x2e0   : > { %v5743_v23 = vcombine.low %v1567_v2, %v1571_v8  ;;  %v1608_v1 = vld [vmem:[#allocation11 + $0x358] sm:$0xff] }
 0x2e1   : > { %4946 = vmatpush1.bf16.msra.mxu0 %v5687_v16  ;;  %v5737_v16 = vcombine.low %v1560_v4, %v1564_v5  ;;  %v1612_v4 = vld [vmem:[#allocation11 + $0x378] sm:$0xff] }
 0x2e2   : > { %5110 = vmatpush1.bf16.msra.mxu1 %v5689_v19  ;;  %4947 = vmatprep.subr.bf16.mxu0 %v5696_v20  ;;  %v5744_v19 = vcombine.high %v1567_v2, %v1571_v8  ;;  %v5746_v20 = vcombine.high %v1568_v10, %v1572_v13  ;;  %v1619_v2 = vld [vmem:[#allocation11 + $0x3b0] sm:$0xff]  ;;  %v1616_v8 = vld [vmem:[#allocation11 + $0x398] sm:$0xff] }
 0x2e3   : > { %5111 = vmatprep.subr.bf16.mxu1 %v5698_v21  ;;  %v1575_v21 = vld [vmem:[#allocation11 + $0x250] sm:$0xff] }
 0x2e4   : > { %v5751_v43 = vcombine.low %v1575_v21, %v1579_v22 }
 0x2e5   : > { %4948 = vmatpush1.bf16.msra.mxu0 %v5695_v32  ;;  %v5745_v32 = vcombine.low %v1568_v10, %v1572_v13  ;;  %v1620_v10 = vld [vmem:[#allocation11 + $0x3b8] sm:$0xff] }
 0x2e6   : > { %5112 = vmatpush1.bf16.msra.mxu1 %v5697_v34  ;;  %4949 = vmatprep.subr.bf16.mxu0 %v5704_v36  ;;  %v5752_v34 = vcombine.high %v1575_v21, %v1579_v22  ;;  %v5754_v36 = vcombine.high %v1576_v28, %v1580_v29  ;;  %v1627_v21 = vld [vmem:[#allocation11 + $0x3f0] sm:$0xff]  ;;  %v1624_v22 = vld [vmem:[#allocation11 + $0x3d8] sm:$0xff] }
 0x2e7   : > { %5113 = vmatprep.subr.bf16.mxu1 %v5706_v37  ;;  %v1583_v37 = vld [vmem:[#allocation11 + $0x290] sm:$0xff] }
 0x2e8   : > { %v5759_v53 = vcombine.low %v1583_v37, %v1587_v38 }
 0x2e9   : > { %4950 = vmatpush1.bf16.msra.mxu0 %v5703_v44  ;;  %v5753_v44 = vcombine.low %v1576_v28, %v1580_v29  ;;  %v1628_v28 = vld [vmem:[#allocation11 + $0x3f8] sm:$0xff] }
 0x2ea   : > { %5114 = vmatpush1.bf16.msra.mxu1 %v5705_v46  ;;  %4951 = vmatprep.subr.bf16.mxu0 %v5712_v3  ;;  %v5760_v46 = vcombine.high %v1583_v37, %v1587_v38  ;;  %v5762_v3 = vcombine.high %v1584_v39, %v1588_v47  ;;  %v1635_v37 = vld [vmem:[#allocation11 + $0x430] sm:$0xff]  ;;  %v1632_v38 = vld [vmem:[#allocation11 + $0x418] sm:$0xff] }
 0x2eb   : > { %5115 = vmatprep.subr.bf16.mxu1 %v5714_v49  ;;  %v1591_v49 = vld [vmem:[#allocation11 + $0x2d0] sm:$0xff] }
 0x2ec   : > { %v5767_v26 = vcombine.low %v1591_v49, %v1595_v50 }
 0x2ed   : > { %4952 = vmatpush1.bf16.msra.mxu0 %v5711_v55  ;;  %v5761_v55 = vcombine.low %v1584_v39, %v1588_v47  ;;  %v1636_v39 = vld [vmem:[#allocation11 + $0x438] sm:$0xff] }
 0x2ee   : > { %5116 = vmatpush1.bf16.msra.mxu1 %v5713_v56  ;;  %4953 = vmatprep.subr.bf16.mxu0 %v5720_v57  ;;  %v5768_v56 = vcombine.high %v1591_v49, %v1595_v50  ;;  %v5770_v57 = vcombine.high %v1592_v51, %v1596_v52  ;;  %v1643_v49 = vld [vmem:[#allocation11 + $0x470] sm:$0xff] }
 0x2ef   : > { %5117 = vmatprep.subr.bf16.mxu1 %v5722_v58  ;;  %v1599_v58 = vld [vmem:[#allocation11 + $0x310] sm:$0xff] }
 0x2f0   : > { %v5775_v5 = vcombine.low %v1599_v58, %v1603_v59 }
 0x2f1   : > { %4954 = vmatpush1.bf16.msra.mxu0 %v5719_v0  ;;  %v5769_v0 = vcombine.low %v1592_v51, %v1596_v52  ;;  %v1640_v51 = vld [vmem:[#allocation11 + $0x458] sm:$0xff] }
 0x2f2   : > { %5118 = vmatpush1.bf16.msra.mxu1 %v5721_v61  ;;  %4955 = vmatprep.subr.bf16.mxu0 %v5728_v62  ;;  %v5776_v61 = vcombine.high %v1599_v58, %v1603_v59  ;;  %v5778_v62 = vcombine.high %v1600_v41, %v1604_v60  ;;  %v1644_v52 = vld [vmem:[#allocation11 + $0x478] sm:$0xff] }
 0x2f3   : > { %5119 = vmatprep.subr.bf16.mxu1 %v5730_v54  ;;  %v1607_v54 = vld [vmem:[#allocation11 + $0x350] sm:$0xff]  ;;  %v5818_v58 = vcombine.high %v1640_v51, %v1644_v52  ;;  %v1648_v59 = vld [vmem:[#allocation11 + $0x498] sm:$0xff] }
 0x2f4   : > { %v5783_v13 = vcombine.low %v1607_v54, %v1611_v63 }
 0x2f5   : > { %4956 = vmatpush1.bf16.msra.mxu0 %v5727_v11  ;;  %v5777_v11 = vcombine.low %v1600_v41, %v1604_v60  ;;  %v1652_v41 = vld [vmem:[#allocation11 + $0x4b8] sm:$0xff] }
 0x2f6   : > { %5120 = vmatpush1.bf16.msra.mxu1 %v5729_v6  ;;  %4957 = vmatprep.subr.bf16.mxu0 %v5736_v45  ;;  %v5784_v6 = vcombine.high %v1607_v54, %v1611_v63  ;;  %v5786_v45 = vcombine.high %v1608_v1, %v1612_v4  ;;  %v1659_v54 = vld [vmem:[#allocation11 + $0x4f0] sm:$0xff]  ;;  %v1656_v63 = vld [vmem:[#allocation11 + $0x4d8] sm:$0xff] }
 0x2f7   : > { %5121 = vmatprep.subr.bf16.mxu1 %v5738_v12  ;;  %v1615_v12 = vld [vmem:[#allocation11 + $0x390] sm:$0xff] }
 0x2f8   : > { %v5791_v29 = vcombine.low %v1615_v12, %v1619_v2 }
 0x2f9   : > { %4958 = vmatpush1.bf16.msra.mxu0 %v5735_v14  ;;  %v5785_v14 = vcombine.low %v1608_v1, %v1612_v4  ;;  %v1660_v1 = vld [vmem:[#allocation11 + $0x4f8] sm:$0xff] }
 0x2fa   : > { %5122 = vmatpush1.bf16.msra.mxu1 %v5737_v16  ;;  %4959 = vmatprep.subr.bf16.mxu0 %v5744_v19  ;;  %v5792_v16 = vcombine.high %v1615_v12, %v1619_v2  ;;  %v5794_v19 = vcombine.high %v1616_v8, %v1620_v10  ;;  %v1664_v12 = vld [vmem:[#allocation11 + $0x518] sm:$0xff] }
 0x2fb   : > { %5123 = vmatprep.subr.bf16.mxu1 %v5746_v20  ;;  %v1623_v20 = vld [vmem:[#allocation11 + $0x3d0] sm:$0xff]  ;;  %v1668_v2 = vld [vmem:[#allocation11 + $0x538] sm:$0xff] }
 0x2fc   : > { %v5799_v47 = vcombine.low %v1623_v20, %v1627_v21 }
 0x2fd   : > { %4960 = vmatpush1.bf16.msra.mxu0 %v5743_v23  ;;  %v5793_v23 = vcombine.low %v1616_v8, %v1620_v10  ;;  %v5833_v8 = vcombine.low %v1656_v63, %v1660_v1 }
 0x2fe   : > { %5124 = vmatpush1.bf16.msra.mxu1 %v5745_v32  ;;  %4961 = vmatprep.subr.bf16.mxu0 %v5752_v34  ;;  %v5800_v32 = vcombine.high %v1623_v20, %v1627_v21  ;;  %v5802_v34 = vcombine.high %v1624_v22, %v1628_v28  ;;  %v1676_v20 = vld [vmem:[#allocation11 + $0x578] sm:$0xff] }
 0x2ff   : > { %5125 = vmatprep.subr.bf16.mxu1 %v5754_v36  ;;  %v1631_v36 = vld [vmem:[#allocation11 + $0x410] sm:$0xff] }
 0x300   : > { %v5807_v50 = vcombine.low %v1631_v36, %v1635_v37 }
 0x301   : > { %4962 = vmatpush1.bf16.msra.mxu0 %v5751_v43  ;;  %v5801_v43 = vcombine.low %v1624_v22, %v1628_v28  ;;  %v5841_v22 = vcombine.low %v1664_v12, %v1668_v2 }
 0x302   : > { %5126 = vmatpush1.bf16.msra.mxu1 %v5753_v44  ;;  %4963 = vmatprep.subr.bf16.mxu0 %v5760_v46  ;;  %v5808_v44 = vcombine.high %v1631_v36, %v1635_v37  ;;  %v5810_v46 = vcombine.high %v1632_v38, %v1636_v39  ;;  %v1684_v36 = vld [vmem:[#allocation11 + $0x5b8] sm:$0xff] }
 0x303   : > { %5127 = vmatprep.subr.bf16.mxu1 %v5762_v3  ;;  %v1639_v3 = vld [vmem:[#allocation11 + $0x450] sm:$0xff] }
 0x304   : > { %v5815_v60 = vcombine.low %v1639_v3, %v1643_v49 }
 0x305   : > { %4964 = vmatpush1.bf16.msra.mxu0 %v5759_v53  ;;  %v5809_v53 = vcombine.low %v1632_v38, %v1636_v39 }
 0x306   : > { %5128 = vmatpush1.bf16.msra.mxu1 %v5761_v55  ;;  %4965 = vmatprep.subr.bf16.mxu0 %v5768_v56  ;;  %v5816_v55 = vcombine.high %v1639_v3, %v1643_v49  ;;  %v1647_v56 = vld [vmem:[#allocation11 + $0x490] sm:$0xff]  ;;  %v1692_v3 = vld [vmem:[#allocation11 + $0x5f8] sm:$0xff] }
 0x307   : > { %5129 = vmatprep.subr.bf16.mxu1 %v5770_v57  ;;  %v1651_v57 = vld [vmem:[#allocation11 + $0x4b0] sm:$0xff] }
 0x308   : > { %v5823_v4 = vcombine.low %v1647_v56, %v1651_v57 }
 0x309   : > { %4966 = vmatpush1.bf16.msra.mxu0 %v5767_v26  ;;  %v5817_v26 = vcombine.low %v1640_v51, %v1644_v52 }
 0x30a   : > { %5130 = vmatpush1.bf16.msra.mxu1 %v5769_v0  ;;  %4967 = vmatprep.subr.bf16.mxu0 %v5776_v61  ;;  %v5824_v0 = vcombine.high %v1647_v56, %v1651_v57  ;;  %v5826_v61 = vcombine.high %v1648_v59, %v1652_v41  ;;  %v1696_v56 = vld [vmem:[#allocation11 + $0x618] sm:$0xff] }
 0x30b   : > { %5131 = vmatprep.subr.bf16.mxu1 %v5778_v62  ;;  %v1655_v62 = vld [vmem:[#allocation11 + $0x4d0] sm:$0xff]  ;;  %v1700_v57 = vld [vmem:[#allocation11 + $0x638] sm:$0xff] }
 0x30d   : > { %4968 = vmatpush1.bf16.msra.mxu0 %v5775_v5  ;;  %v5832_v5 = vcombine.high %v1655_v62, %v1659_v54 }
 0x30e   : > { %5132 = vmatpush1.bf16.msra.mxu1 %v5777_v11  ;;  %4969 = vmatprep.subr.bf16.mxu0 %v5784_v6  ;;  %v5834_v11 = vcombine.high %v1656_v63, %v1660_v1  ;;  %v1663_v6 = vld [vmem:[#allocation11 + $0x510] sm:$0xff]  ;;  %v5873_v63 = vcombine.low %v1696_v56, %v1700_v57 }
 0x30f   : > { %5133 = vmatprep.subr.bf16.mxu1 %v5786_v45  ;;  %v1667_v45 = vld [vmem:[#allocation11 + $0x530] sm:$0xff] }
 0x310   : > { %v5840_v10 = vcombine.high %v1663_v6, %v1667_v45  ;;  %v5839_v21 = vcombine.low %v1663_v6, %v1667_v45  ;;  %v1716_v6 = vld [vmem:[#allocation11 + $0x6b8] sm:$0xff] }
 0x311   : > { %4970 = vmatpush1.bf16.msra.mxu0 %v5783_v13  ;;  %v5842_v13 = vcombine.high %v1664_v12, %v1668_v2 }
 0x312   : > { %5134 = vmatpush1.bf16.msra.mxu1 %v5785_v14  ;;  %4971 = vmatprep.subr.bf16.mxu0 %v5792_v16  ;;  %v1671_v14 = vld [vmem:[#allocation11 + $0x550] sm:$0xff] }
 0x313   : > { %5135 = vmatprep.subr.bf16.mxu1 %v5794_v19  ;;  %v1675_v16 = vld [vmem:[#allocation11 + $0x570] sm:$0xff]  ;;  %v1672_v19 = vld [vmem:[#allocation11 + $0x558] sm:$0xff] }
 0x314   : > { %v5848_v28 = vcombine.high %v1671_v14, %v1675_v16  ;;  %v5847_v37 = vcombine.low %v1671_v14, %v1675_v16  ;;  %v5849_v38 = vcombine.low %v1672_v19, %v1676_v20  ;;  %v1724_v14 = vld [vmem:[#allocation11 + $0x6f8] sm:$0xff] }
 0x315   : > { %4972 = vmatpush1.bf16.msra.mxu0 %v5791_v29  ;;  %v5850_v29 = vcombine.high %v1672_v19, %v1676_v20 }
 0x316   : > { %5136 = vmatpush1.bf16.msra.mxu1 %v5793_v23  ;;  %4973 = vmatprep.subr.bf16.mxu0 %v5800_v32  ;;  %v1679_v23 = vld [vmem:[#allocation11 + $0x590] sm:$0xff] }
 0x317   : > { %5137 = vmatprep.subr.bf16.mxu1 %v5802_v34  ;;  %v1683_v32 = vld [vmem:[#allocation11 + $0x5b0] sm:$0xff]  ;;  %v1680_v34 = vld [vmem:[#allocation11 + $0x598] sm:$0xff] }
 0x318   : > { %v5856_v39 = vcombine.high %v1679_v23, %v1683_v32  ;;  %v5855_v49 = vcombine.low %v1679_v23, %v1683_v32  ;;  %v1732_v23 = vld [vmem:[#allocation11 + $0x738] sm:$0xff] }
 0x319   : > { %4974 = vmatpush1.bf16.msra.mxu0 %v5799_v47  ;;  %v5858_v47 = vcombine.high %v1680_v34, %v1684_v36 }
 0x31a   : > { %5138 = vmatpush1.bf16.msra.mxu1 %v5801_v43  ;;  %4984 = vmatprep.subr.bf16.mxu0 %v5808_v44  ;;  %v1687_v43 = vld [vmem:[#allocation11 + $0x5d0] sm:$0xff] }
 0x31b   : > { %5148 = vmatprep.subr.bf16.mxu1 %v5810_v46  ;;  %v1691_v44 = vld [vmem:[#allocation11 + $0x5f0] sm:$0xff]  ;;  %v1688_v46 = vld [vmem:[#allocation11 + $0x5d8] sm:$0xff] }
 0x31c   : > { %4976 = vmatmul.mubr.bf16.vlgmr.msra.gmra.mrb[12].mxu0 %v7061_v48  ;;  %v5864_v51 = vcombine.high %v1687_v43, %v1691_v44  ;;  %v5866_v52 = vcombine.high %v1688_v46, %v1692_v3 }
 0x31d   : > { %5140 = vmatmul.mubr.bf16.vlgmr.msra.gmra.mrb[12].mxu1 %v7061_v48  ;;  %4985 = vmatpush1.bf16.msra.mxu0 %v5807_v50  ;;  %v5825_v48 = vcombine.low %v1648_v59, %v1652_v41  ;;  %v5857_v50 = vcombine.low %v1680_v34, %v1684_v36  ;;  %v5865_v59 = vcombine.low %v1688_v46, %v1692_v3 }
 0x31e   : > { %5016 = vmatprep.mubr.bf16.mxu0 %v7078_v15  ;;  %5149 = vmatpush1.bf16.msra.mxu1 %v5809_v53  ;;  %v1695_v53 = vld [vmem:[#allocation11 + $0x610] sm:$0xff] }
 0x31f   : > { %5180 = vmatprep.mubr.bf16.mxu1 %v7078_v15  ;;  %4986 = vmatprep.subr.bf16.mxu0 %v5816_v55  ;;  %v5831_v15 = vcombine.low %v1655_v62, %v1659_v54  ;;  %v1699_v55 = vld [vmem:[#allocation11 + $0x630] sm:$0xff]  ;;  %v1708_v62 = vld [vmem:[#allocation11 + $0x678] sm:$0xff] }
 0x320   : > { %5150 = vmatprep.subr.bf16.mxu1 %v5818_v58  ;;  %v5863_v58 = vcombine.low %v1687_v43, %v1691_v44  ;;  %v5872_v41 = vcombine.high %v1695_v53, %v1699_v55  ;;  %v5871_v54 = vcombine.low %v1695_v53, %v1699_v55  ;;  %v1740_v43 = vld [vmem:[#allocation11 + $0x778] sm:$0xff] }
 0x321   : > { %4987 = vmatpush1.bf16.msra.mxu0 %v5815_v60  ;;  %v5874_v60 = vcombine.high %v1696_v56, %v1700_v57  ;;  %v1748_v53 = vld [vmem:[#allocation11 + $0x7b8] sm:$0xff] }
 0x322   : > { %5151 = vmatpush1.bf16.msra.mxu1 %v5817_v26  ;;  %4988 = vmatprep.subr.bf16.mxu0 %v5824_v0  ;;  %v1703_v26 = vld [vmem:[#allocation11 + $0x650] sm:$0xff] }
 0x323   : > { %5152 = vmatprep.subr.bf16.mxu1 %v5826_v61  ;;  %v1707_v0 = vld [vmem:[#allocation11 + $0x670] sm:$0xff]  ;;  %v1704_v61 = vld [vmem:[#allocation11 + $0x658] sm:$0xff] }
 0x324   : > { %v5880_v1 = vcombine.high %v1703_v26, %v1707_v0  ;;  %v5879_v45 = vcombine.low %v1703_v26, %v1707_v0  ;;  %v5881_v12 = vcombine.low %v1704_v61, %v1708_v62  ;;  %v1756_v26 = vld [vmem:[#allocation11 + $0x7f8] sm:$0xff] }
 0x325   : > { %4989 = vmatpush1.bf16.msra.mxu0 %v5823_v4  ;;  %v5882_v4 = vcombine.high %v1704_v61, %v1708_v62 }
 0x326   : > { %5153 = vmatpush1.bf16.msra.mxu1 %v5825_v48  ;;  %4990 = vmatprep.subr.bf16.mxu0 %v5832_v5  ;;  %v1711_v48 = vld [vmem:[#allocation11 + $0x690] sm:$0xff] }
 0x327   : > { %5154 = vmatprep.subr.bf16.mxu1 %v5834_v11  ;;  %v1715_v5 = vld [vmem:[#allocation11 + $0x6b0] sm:$0xff]  ;;  %v1712_v11 = vld [vmem:[#allocation11 + $0x698] sm:$0xff] }
 0x328   : > { %v5888_v2 = vcombine.high %v1711_v48, %v1715_v5  ;;  %v5887_v16 = vcombine.low %v1711_v48, %v1715_v5  ;;  %v5889_v19 = vcombine.low %v1712_v11, %v1716_v6  ;;  %v1764_v48 = vld [vmem:[#allocation11 + $0x838] sm:$0xff] }
 0x329   : > { %4991 = vmatpush1.bf16.msra.mxu0 %v5831_v15  ;;  %v5890_v15 = vcombine.high %v1712_v11, %v1716_v6 }
 0x32a   : > { %5155 = vmatpush1.bf16.msra.mxu1 %v5833_v8  ;;  %4992 = vmatprep.subr.bf16.mxu0 %v5840_v10  ;;  %v1719_v8 = vld [vmem:[#allocation11 + $0x6d0] sm:$0xff] }
 0x32b   : > { %5156 = vmatprep.subr.bf16.mxu1 %v5842_v13  ;;  %v1723_v10 = vld [vmem:[#allocation11 + $0x6f0] sm:$0xff]  ;;  %v1720_v13 = vld [vmem:[#allocation11 + $0x6d8] sm:$0xff] }
 0x32c   : > { %v5896_v20 = vcombine.high %v1719_v8, %v1723_v10  ;;  %v5895_v32 = vcombine.low %v1719_v8, %v1723_v10  ;;  %v5897_v34 = vcombine.low %v1720_v13, %v1724_v14  ;;  %v1768_v8 = vld [vmem:[#allocation11 + $0x858] sm:$0xff] }
 0x32d   : > { %4993 = vmatpush1.bf16.msra.mxu0 %v5839_v21  ;;  %v5898_v21 = vcombine.high %v1720_v13, %v1724_v14  ;;  %v1772_v10 = vld [vmem:[#allocation11 + $0x878] sm:$0xff] }
 0x32e   : > { %5157 = vmatpush1.bf16.msra.mxu1 %v5841_v22  ;;  %4994 = vmatprep.subr.bf16.mxu0 %v5848_v28  ;;  %v1727_v22 = vld [vmem:[#allocation11 + $0x710] sm:$0xff] }
 0x32f   : > { %5158 = vmatprep.subr.bf16.mxu1 %v5850_v29  ;;  %v1731_v28 = vld [vmem:[#allocation11 + $0x730] sm:$0xff]  ;;  %v1728_v29 = vld [vmem:[#allocation11 + $0x718] sm:$0xff] }
 0x330   : > { %v5904_v36 = vcombine.high %v1727_v22, %v1731_v28  ;;  %v5903_v44 = vcombine.low %v1727_v22, %v1731_v28  ;;  %v5905_v46 = vcombine.low %v1728_v29, %v1732_v23  ;;  %v1780_v22 = vld [vmem:[#allocation11 + $0x8b8] sm:$0xff] }
 0x331   : > { %4995 = vmatpush1.bf16.msra.mxu0 %v5847_v37  ;;  %v5906_v37 = vcombine.high %v1728_v29, %v1732_v23  ;;  %v5945_v29 = vcombine.low %v1768_v8, %v1772_v10 }
 0x332   : > { %5159 = vmatpush1.bf16.msra.mxu1 %v5849_v38  ;;  %4996 = vmatprep.subr.bf16.mxu0 %v5856_v39  ;;  %v1735_v38 = vld [vmem:[#allocation11 + $0x750] sm:$0xff] }
 0x333   : > { %5160 = vmatprep.subr.bf16.mxu1 %v5858_v47  ;;  %v1739_v39 = vld [vmem:[#allocation11 + $0x770] sm:$0xff]  ;;  %v1736_v47 = vld [vmem:[#allocation11 + $0x758] sm:$0xff] }
 0x334   : > { %v5912_v3 = vcombine.high %v1735_v38, %v1739_v39  ;;  %v5911_v55 = vcombine.low %v1735_v38, %v1739_v39  ;;  %v5913_v56 = vcombine.low %v1736_v47, %v1740_v43  ;;  %v1788_v38 = vld [vmem:[#allocation11 + $0x8f8] sm:$0xff] }
 0x335   : > { %4997 = vmatpush1.bf16.msra.mxu0 %v5855_v49  ;;  %v5914_v49 = vcombine.high %v1736_v47, %v1740_v43 }
 0x336   : > { %5161 = vmatpush1.bf16.msra.mxu1 %v5857_v50  ;;  %4998 = vmatprep.subr.bf16.mxu0 %v5864_v51  ;;  %v1743_v50 = vld [vmem:[#allocation11 + $0x790] sm:$0xff] }
 0x337   : > { %5162 = vmatprep.subr.bf16.mxu1 %v5866_v52  ;;  %v1747_v51 = vld [vmem:[#allocation11 + $0x7b0] sm:$0xff]  ;;  %v1744_v52 = vld [vmem:[#allocation11 + $0x798] sm:$0xff] }
 0x338   : > { %v5920_v57 = vcombine.high %v1743_v50, %v1747_v51  ;;  %v5919_v0 = vcombine.low %v1743_v50, %v1747_v51  ;;  %v5921_v61 = vcombine.low %v1744_v52, %v1748_v53 }
 0x339   : > { %4999 = vmatpush1.bf16.msra.mxu0 %v5863_v58  ;;  %v5922_v58 = vcombine.high %v1744_v52, %v1748_v53  ;;  %v1799_v53 = vld [vmem:[#allocation11 + $0x950] sm:$0xff] }
 0x33a   : > { %5163 = vmatpush1.bf16.msra.mxu1 %v5865_v59  ;;  %5000 = vmatprep.subr.bf16.mxu0 %v5872_v41  ;;  %v1751_v59 = vld [vmem:[#allocation11 + $0x7d0] sm:$0xff] }
 0x33b   : > { %5164 = vmatprep.subr.bf16.mxu1 %v5874_v60  ;;  %v1755_v41 = vld [vmem:[#allocation11 + $0x7f0] sm:$0xff]  ;;  %v1752_v60 = vld [vmem:[#allocation11 + $0x7d8] sm:$0xff] }
 0x33c   : > { %v5928_v62 = vcombine.high %v1751_v59, %v1755_v41  ;;  %v5927_v5 = vcombine.low %v1751_v59, %v1755_v41  ;;  %v5929_v11 = vcombine.low %v1752_v60, %v1756_v26 }
 0x33d   : > { %5001 = vmatpush1.bf16.msra.mxu0 %v5871_v54  ;;  %v5930_v54 = vcombine.high %v1752_v60, %v1756_v26  ;;  %v1807_v26 = vld [vmem:[#allocation11 + $0x990] sm:$0xff] }
 0x33e   : > { %5165 = vmatpush1.bf16.msra.mxu1 %v5873_v63  ;;  %5002 = vmatprep.subr.bf16.mxu0 %v5880_v1  ;;  %v1759_v63 = vld [vmem:[#allocation11 + $0x810] sm:$0xff] }
 0x33f   : > { %5166 = vmatprep.subr.bf16.mxu1 %v5882_v4  ;;  %v1763_v1 = vld [vmem:[#allocation11 + $0x830] sm:$0xff]  ;;  %v1760_v4 = vld [vmem:[#allocation11 + $0x818] sm:$0xff] }
 0x340   : > { %v5936_v6 = vcombine.high %v1759_v63, %v1763_v1  ;;  %v5937_v13 = vcombine.low %v1760_v4, %v1764_v48 }
 0x341   : > { %5003 = vmatpush1.bf16.msra.mxu0 %v5879_v45  ;;  %v5938_v45 = vcombine.high %v1760_v4, %v1764_v48  ;;  %v1815_v48 = vld [vmem:[#allocation11 + $0x9d0] sm:$0xff] }
 0x342   : > { %5167 = vmatpush1.bf16.msra.mxu1 %v5881_v12  ;;  %5004 = vmatprep.subr.bf16.mxu0 %v5888_v2  ;;  %v1767_v12 = vld [vmem:[#allocation11 + $0x850] sm:$0xff] }
 0x343   : > { %5168 = vmatprep.subr.bf16.mxu1 %v5890_v15  ;;  %v1771_v2 = vld [vmem:[#allocation11 + $0x870] sm:$0xff]  ;;  %v5935_v15 = vcombine.low %v1759_v63, %v1763_v1 }
 0x344   : > { %v5944_v14 = vcombine.high %v1767_v12, %v1771_v2  ;;  %v5943_v28 = vcombine.low %v1767_v12, %v1771_v2 }
 0x345   : > { %5005 = vmatpush1.bf16.msra.mxu0 %v5887_v16  ;;  %v1775_v16 = vld [vmem:[#allocation11 + $0x890] sm:$0xff] }
 0x346   : > { %5169 = vmatpush1.bf16.msra.mxu1 %v5889_v19  ;;  %5006 = vmatprep.subr.bf16.mxu0 %v5896_v20  ;;  %v1779_v19 = vld [vmem:[#allocation11 + $0x8b0] sm:$0xff]  ;;  %v5946_v20 = vcombine.high %v1768_v8, %v1772_v10 }
 0x347   : > { %5170 = vmatprep.subr.bf16.mxu1 %v5898_v21  ;;  %v1776_v21 = vld [vmem:[#allocation11 + $0x898] sm:$0xff]  ;;  %v5952_v23 = vcombine.high %v1775_v16, %v1779_v19  ;;  %v5951_v39 = vcombine.low %v1775_v16, %v1779_v19  ;;  %v1823_v8 = vld [vmem:[#allocation11 + $0xa10] sm:$0xff] }
 0x348   : > { %v1827_v10 = vld [vmem:[#allocation11 + $0xa30] sm:$0xff] }
 0x349   : > { %5007 = vmatpush1.bf16.msra.mxu0 %v5895_v32  ;;  %v5954_v32 = vcombine.high %v1776_v21, %v1780_v22 }
 0x34a   : > { %5171 = vmatpush1.bf16.msra.mxu1 %v5897_v34  ;;  %5008 = vmatprep.subr.bf16.mxu0 %v5904_v36  ;;  %v1783_v34 = vld [vmem:[#allocation11 + $0x8d0] sm:$0xff] }
 0x34b   : > { %5172 = vmatprep.subr.bf16.mxu1 %v5906_v37  ;;  %v1787_v36 = vld [vmem:[#allocation11 + $0x8f0] sm:$0xff]  ;;  %v1784_v37 = vld [vmem:[#allocation11 + $0x8d8] sm:$0xff] }
 0x34c   : > { %v5960_v47 = vcombine.high %v1783_v34, %v1787_v36  ;;  %v5962_v43 = vcombine.high %v1784_v37, %v1788_v38  ;;  %v5961_v50 = vcombine.low %v1784_v37, %v1788_v38  ;;  %v1839_v38 = vld [vmem:[#allocation11 + $0xa90] sm:$0xff] }
 0x34d   : > { %5009 = vmatpush1.bf16.msra.mxu0 %v5903_v44  ;;  %v1791_v44 = vld [vmem:[#allocation11 + $0x910] sm:$0xff] }
 0x34e   : > { %5173 = vmatpush1.bf16.msra.mxu1 %v5905_v46  ;;  %5010 = vmatprep.subr.bf16.mxu0 %v5912_v3  ;;  %v1795_v46 = vld [vmem:[#allocation11 + $0x930] sm:$0xff]  ;;  %v1792_v3 = vld [vmem:[#allocation11 + $0x918] sm:$0xff] }
 0x34f   : > { %5174 = vmatprep.subr.bf16.mxu1 %v5914_v49  ;;  %v1796_v49 = vld [vmem:[#allocation11 + $0x938] sm:$0xff]  ;;  %v5968_v51 = vcombine.high %v1791_v44, %v1795_v46 }
 0x350   : > { %v5970_v52 = vcombine.high %v1792_v3, %v1796_v49  ;;  %v5969_v59 = vcombine.low %v1792_v3, %v1796_v49  ;;  %v1847_v49 = vld [vmem:[#allocation11 + $0xad0] sm:$0xff] }
 0x351   : > { %5011 = vmatpush1.bf16.msra.mxu0 %v5911_v55  ;;  %v1803_v55 = vld [vmem:[#allocation11 + $0x970] sm:$0xff] }
 0x352   : > { %5175 = vmatpush1.bf16.msra.mxu1 %v5913_v56  ;;  %5012 = vmatprep.subr.bf16.mxu0 %v5920_v57  ;;  %v1800_v56 = vld [vmem:[#allocation11 + $0x958] sm:$0xff]  ;;  %v5976_v41 = vcombine.high %v1799_v53, %v1803_v55 }
 0x353   : > { %5176 = vmatprep.subr.bf16.mxu1 %v5922_v58  ;;  %v1804_v57 = vld [vmem:[#allocation11 + $0x978] sm:$0xff]  ;;  %v5967_v58 = vcombine.low %v1791_v44, %v1795_v46 }
 0x354   : > { %v5978_v60 = vcombine.high %v1800_v56, %v1804_v57  ;;  %v5977_v63 = vcombine.low %v1800_v56, %v1804_v57  ;;  %v1855_v57 = vld [vmem:[#allocation11 + $0xb10] sm:$0xff] }
 0x355   : > { %5013 = vmatpush1.bf16.msra.mxu0 %v5919_v0  ;;  %v1811_v0 = vld [vmem:[#allocation11 + $0x9b0] sm:$0xff] }
 0x356   : > { %5177 = vmatpush1.bf16.msra.mxu1 %v5921_v61  ;;  %5014 = vmatprep.subr.bf16.mxu0 %v5928_v62  ;;  %v1808_v61 = vld [vmem:[#allocation11 + $0x998] sm:$0xff]  ;;  %v5984_v1 = vcombine.high %v1807_v26, %v1811_v0 }
 0x357   : > { %5178 = vmatprep.subr.bf16.mxu1 %v5930_v54  ;;  %v1812_v62 = vld [vmem:[#allocation11 + $0x9b8] sm:$0xff]  ;;  %v5975_v54 = vcombine.low %v1799_v53, %v1803_v55 }
 0x358   : > { %v5986_v4 = vcombine.high %v1808_v61, %v1812_v62  ;;  %v5985_v12 = vcombine.low %v1808_v61, %v1812_v62  ;;  %v1863_v62 = vld [vmem:[#allocation11 + $0xb50] sm:$0xff] }
 0x359   : > { %5015 = vmatpush1.bf16.msra.mxu0 %v5927_v5  ;;  %v1819_v5 = vld [vmem:[#allocation11 + $0x9f0] sm:$0xff] }
 0x35a   : > { %5179 = vmatpush1.bf16.msra.mxu1 %v5929_v11  ;;  %5025 = vmatprep.subr.bf16.mxu0 %v5936_v6  ;;  %v1816_v11 = vld [vmem:[#allocation11 + $0x9d8] sm:$0xff]  ;;  %v5992_v2 = vcombine.high %v1815_v48, %v1819_v5  ;;  %v5991_v16 = vcombine.low %v1815_v48, %v1819_v5 }
 0x35b   : > { %5189 = vmatprep.subr.bf16.mxu1 %v5938_v45  ;;  %v1820_v6 = vld [vmem:[#allocation11 + $0x9f8] sm:$0xff]  ;;  %v5983_v45 = vcombine.low %v1807_v26, %v1811_v0 }
 0x35c   : > { %5017 = vmatmul.mubr.bf16.vlgmr.msra.gmra.mrb[12].mxu0 %v7097_v31  ;;  %v5993_v19 = vcombine.low %v1816_v11, %v1820_v6 }
 0x35d   : > { %5181 = vmatmul.mubr.bf16.vlgmr.msra.gmra.mrb[12].mxu1 %v7097_v31  ;;  %5026 = vmatpush1.bf16.msra.mxu0 %v5935_v15  ;;  %v5953_v31 = vcombine.low %v1776_v21, %v1780_v22  ;;  %v5994_v15 = vcombine.high %v1816_v11, %v1820_v6  ;;  %v1831_v22 = vld [vmem:[#allocation11 + $0xa50] sm:$0xff] }
 0x35e   : > { %5057 = vmatprep.mubr.bf16.mxu0 %v7099_v40  ;;  %5190 = vmatpush1.bf16.msra.mxu1 %v5937_v13  ;;  %v1824_v13 = vld [vmem:[#allocation11 + $0xa18] sm:$0xff]  ;;  %v1871_v6 = vld [vmem:[#allocation11 + $0xb90] sm:$0xff] }
 0x35f   : > { %5221 = vmatprep.mubr.bf16.mxu1 %v7099_v40  ;;  %5027 = vmatprep.subr.bf16.mxu0 %v5944_v14  ;;  %v5959_v40 = vcombine.low %v1783_v34, %v1787_v36  ;;  %v1828_v14 = vld [vmem:[#allocation11 + $0xa38] sm:$0xff] }
 0x360   : > { %5191 = vmatprep.subr.bf16.mxu1 %v5946_v20  ;;  %v6000_v20 = vcombine.high %v1823_v8, %v1827_v10  ;;  %v6002_v21 = vcombine.high %v1824_v13, %v1828_v14  ;;  %v6001_v34 = vcombine.low %v1824_v13, %v1828_v14  ;;  %v1879_v14 = vld [vmem:[#allocation11 + $0xbd0] sm:$0xff] }
 0x361   : > { %5028 = vmatpush1.bf16.msra.mxu0 %v5943_v28  ;;  %v1835_v28 = vld [vmem:[#allocation11 + $0xa70] sm:$0xff] }
 0x362   : > { %5192 = vmatpush1.bf16.msra.mxu1 %v5945_v29  ;;  %5029 = vmatprep.subr.bf16.mxu0 %v5952_v23  ;;  %v1832_v29 = vld [vmem:[#allocation11 + $0xa58] sm:$0xff]  ;;  %v6008_v36 = vcombine.high %v1831_v22, %v1835_v28 }
 0x363   : > { %5193 = vmatprep.subr.bf16.mxu1 %v5954_v32  ;;  %v1836_v23 = vld [vmem:[#allocation11 + $0xa78] sm:$0xff]  ;;  %v5999_v32 = vcombine.low %v1823_v8, %v1827_v10 }
 0x364   : > { %v6010_v37 = vcombine.high %v1832_v29, %v1836_v23  ;;  %v6009_v44 = vcombine.low %v1832_v29, %v1836_v23  ;;  %v1887_v23 = vld [vmem:[#allocation11 + $0xc10] sm:$0xff] }
 0x365   : > { %5030 = vmatpush1.bf16.msra.mxu0 %v5951_v39  ;;  %v1843_v39 = vld [vmem:[#allocation11 + $0xab0] sm:$0xff] }
 0x366   : > { %5194 = vmatpush1.bf16.msra.mxu1 %v5953_v31  ;;  %5031 = vmatprep.subr.bf16.mxu0 %v5960_v47  ;;  %v1840_v31 = vld [vmem:[#allocation11 + $0xa98] sm:$0xff]  ;;  %v6016_v46 = vcombine.high %v1839_v38, %v1843_v39 }
 0x367   : > { %5195 = vmatprep.subr.bf16.mxu1 %v5962_v43  ;;  %v1844_v47 = vld [vmem:[#allocation11 + $0xab8] sm:$0xff]  ;;  %v6007_v43 = vcombine.low %v1831_v22, %v1835_v28 }
 0x368   : > { %v6018_v3 = vcombine.high %v1840_v31, %v1844_v47  ;;  %v6017_v53 = vcombine.low %v1840_v31, %v1844_v47  ;;  %v1895_v47 = vld [vmem:[#allocation11 + $0xc50] sm:$0xff] }
 0x369   : > { %5032 = vmatpush1.bf16.msra.mxu0 %v5959_v40  ;;  %v1851_v40 = vld [vmem:[#allocation11 + $0xaf0] sm:$0xff] }
 0x36a   : > { %5196 = vmatpush1.bf16.msra.mxu1 %v5961_v50  ;;  %5033 = vmatprep.subr.bf16.mxu0 %v5968_v51  ;;  %v1848_v50 = vld [vmem:[#allocation11 + $0xad8] sm:$0xff]  ;;  %v6024_v55 = vcombine.high %v1847_v49, %v1851_v40 }
 0x36b   : > { %5197 = vmatprep.subr.bf16.mxu1 %v5970_v52  ;;  %v1852_v51 = vld [vmem:[#allocation11 + $0xaf8] sm:$0xff]  ;;  %v6015_v52 = vcombine.low %v1839_v38, %v1843_v39 }
 0x36c   : > { %v6026_v56 = vcombine.high %v1848_v50, %v1852_v51  ;;  %v6025_v26 = vcombine.low %v1848_v50, %v1852_v51  ;;  %v1903_v50 = vld [vmem:[#allocation11 + $0xc90] sm:$0xff] }
 0x36d   : > { %5034 = vmatpush1.bf16.msra.mxu0 %v5967_v58  ;;  %v1859_v58 = vld [vmem:[#allocation11 + $0xb30] sm:$0xff] }
 0x36e   : > { %5198 = vmatpush1.bf16.msra.mxu1 %v5969_v59  ;;  %5035 = vmatprep.subr.bf16.mxu0 %v5976_v41  ;;  %v1856_v59 = vld [vmem:[#allocation11 + $0xb18] sm:$0xff]  ;;  %v6032_v0 = vcombine.high %v1855_v57, %v1859_v58  ;;  %v1907_v51 = vld [vmem:[#allocation11 + $0xcb0] sm:$0xff] }
 0x36f   : > { %5199 = vmatprep.subr.bf16.mxu1 %v5978_v60  ;;  %v1860_v41 = vld [vmem:[#allocation11 + $0xb38] sm:$0xff]  ;;  %v6023_v60 = vcombine.low %v1847_v49, %v1851_v40 }
 0x370   : > { %v6034_v61 = vcombine.high %v1856_v59, %v1860_v41  ;;  %v6033_v48 = vcombine.low %v1856_v59, %v1860_v41  ;;  %v1911_v41 = vld [vmem:[#allocation11 + $0xcd0] sm:$0xff] }
 0x371   : > { %5036 = vmatpush1.bf16.msra.mxu0 %v5975_v54  ;;  %v1867_v54 = vld [vmem:[#allocation11 + $0xb70] sm:$0xff] }
 0x372   : > { %5200 = vmatpush1.bf16.msra.mxu1 %v5977_v63  ;;  %5037 = vmatprep.subr.bf16.mxu0 %v5984_v1  ;;  %v1864_v63 = vld [vmem:[#allocation11 + $0xb58] sm:$0xff]  ;;  %v6040_v5 = vcombine.high %v1863_v62, %v1867_v54 }
 0x373   : > { %5201 = vmatprep.subr.bf16.mxu1 %v5986_v4  ;;  %v1868_v1 = vld [vmem:[#allocation11 + $0xb78] sm:$0xff]  ;;  %v6031_v4 = vcombine.low %v1855_v57, %v1859_v58  ;;  %v6080_v58 = vcombine.high %v1903_v50, %v1907_v51 }
 0x374   : > { %v6042_v11 = vcombine.high %v1864_v63, %v1868_v1  ;;  %v6041_v8 = vcombine.low %v1864_v63, %v1868_v1  ;;  %v1919_v63 = vld [vmem:[#allocation11 + $0xd10] sm:$0xff] }
 0x375   : > { %5038 = vmatpush1.bf16.msra.mxu0 %v5983_v45  ;;  %v1875_v45 = vld [vmem:[#allocation11 + $0xbb0] sm:$0xff] }
 0x376   : > { %5202 = vmatpush1.bf16.msra.mxu1 %v5985_v12  ;;  %5039 = vmatprep.subr.bf16.mxu0 %v5992_v2  ;;  %v1872_v12 = vld [vmem:[#allocation11 + $0xb98] sm:$0xff]  ;;  %v6048_v10 = vcombine.high %v1871_v6, %v1875_v45  ;;  %v1923_v1 = vld [vmem:[#allocation11 + $0xd30] sm:$0xff] }
 0x377   : > { %5203 = vmatprep.subr.bf16.mxu1 %v5994_v15  ;;  %v1876_v2 = vld [vmem:[#allocation11 + $0xbb8] sm:$0xff]  ;;  %v6039_v15 = vcombine.low %v1863_v62, %v1867_v54 }
 0x378   : > { %v6050_v13 = vcombine.high %v1872_v12, %v1876_v2  ;;  %v6049_v22 = vcombine.low %v1872_v12, %v1876_v2  ;;  %v1931_v12 = vld [vmem:[#allocation11 + $0xd70] sm:$0xff]  ;;  %v1928_v2 = vld [vmem:[#allocation11 + $0xd58] sm:$0xff] }
 0x379   : > { %5040 = vmatpush1.bf16.msra.mxu0 %v5991_v16  ;;  %v1883_v16 = vld [vmem:[#allocation11 + $0xbf0] sm:$0xff] }
 0x37a   : > { %5204 = vmatpush1.bf16.msra.mxu1 %v5993_v19  ;;  %5041 = vmatprep.subr.bf16.mxu0 %v6000_v20  ;;  %v1880_v19 = vld [vmem:[#allocation11 + $0xbd8] sm:$0xff]  ;;  %v6056_v28 = vcombine.high %v1879_v14, %v1883_v16 }
 0x37b   : > { %5205 = vmatprep.subr.bf16.mxu1 %v6002_v21  ;;  %v1884_v20 = vld [vmem:[#allocation11 + $0xbf8] sm:$0xff]  ;;  %v6047_v21 = vcombine.low %v1871_v6, %v1875_v45  ;;  %v1927_v45 = vld [vmem:[#allocation11 + $0xd50] sm:$0xff] }
 0x37c   : > { %v6058_v29 = vcombine.high %v1880_v19, %v1884_v20  ;;  %v6057_v38 = vcombine.low %v1880_v19, %v1884_v20  ;;  %v1935_v19 = vld [vmem:[#allocation11 + $0xd90] sm:$0xff] }
 0x37d   : > { %5042 = vmatpush1.bf16.msra.mxu0 %v5999_v32  ;;  %v1891_v32 = vld [vmem:[#allocation11 + $0xc30] sm:$0xff] }
 0x37e   : > { %5206 = vmatpush1.bf16.msra.mxu1 %v6001_v34  ;;  %5043 = vmatprep.subr.bf16.mxu0 %v6008_v36  ;;  %v1888_v34 = vld [vmem:[#allocation11 + $0xc18] sm:$0xff]  ;;  %v6064_v39 = vcombine.high %v1887_v23, %v1891_v32  ;;  %v1939_v20 = vld [vmem:[#allocation11 + $0xdb0] sm:$0xff] }
 0x37f   : > { %5207 = vmatprep.subr.bf16.mxu1 %v6010_v37  ;;  %v1892_v36 = vld [vmem:[#allocation11 + $0xc38] sm:$0xff]  ;;  %v6055_v37 = vcombine.low %v1879_v14, %v1883_v16  ;;  %v6104_v14 = vcombine.high %v1927_v45, %v1931_v12 }
 0x380   : > { %v6066_v31 = vcombine.high %v1888_v34, %v1892_v36  ;;  %v6065_v49 = vcombine.low %v1888_v34, %v1892_v36  ;;  %v6103_v34 = vcombine.low %v1927_v45, %v1931_v12  ;;  %v7165_v36 = vld [vmem:[#allocation14] sm:$0xff]  ;;  %v1956_v45 = vld [vmem:[#allocation11 + $0xe38] sm:$0xff] }
 0x381   : > { %5044 = vmatpush1.bf16.msra.mxu0 %v6007_v43  ;;  %v1899_v43 = vld [vmem:[#allocation11 + $0xc70] sm:$0xff] }
 0x382   : > { %5208 = vmatpush1.bf16.msra.mxu1 %v6009_v44  ;;  %5045 = vmatprep.subr.bf16.mxu0 %v6016_v46  ;;  %v6063_v44 = vcombine.low %v1887_v23, %v1891_v32  ;;  %v1896_v46 = vld [vmem:[#allocation11 + $0xc58] sm:$0xff]  ;;  %v6072_v40 = vcombine.high %v1895_v47, %v1899_v43 }
 0x383   : > { %5209 = vmatprep.subr.bf16.mxu1 %v6018_v3  ;;  %v1900_v3 = vld [vmem:[#allocation11 + $0xc78] sm:$0xff] }
 0x384   : > { %v6073_v57 = vcombine.low %v1896_v46, %v1900_v3 }
 0x385   : > { %5046 = vmatpush1.bf16.msra.mxu0 %v6015_v52  ;;  %v6074_v52 = vcombine.high %v1896_v46, %v1900_v3 }
 0x386   : > { %5210 = vmatpush1.bf16.msra.mxu1 %v6017_v53  ;;  %5047 = vmatprep.subr.bf16.mxu0 %v6024_v55  ;;  %v1904_v53 = vld [vmem:[#allocation11 + $0xc98] sm:$0xff] }
 0x387   : > { %5211 = vmatprep.subr.bf16.mxu1 %v6026_v56  ;;  %v1908_v55 = vld [vmem:[#allocation11 + $0xcb8] sm:$0xff]  ;;  %v6071_v56 = vcombine.low %v1895_v47, %v1899_v43  ;;  %v1943_v43 = vld [vmem:[#allocation11 + $0xdd0] sm:$0xff] }
 0x388   : > { %v6082_v59 = vcombine.high %v1904_v53, %v1908_v55 }
 0x389   : > { %5048 = vmatpush1.bf16.msra.mxu0 %v6023_v60  ;;  %v1915_v60 = vld [vmem:[#allocation11 + $0xcf0] sm:$0xff] }
 0x38a   : > { %5212 = vmatpush1.bf16.msra.mxu1 %v6025_v26  ;;  %5049 = vmatprep.subr.bf16.mxu0 %v6032_v0  ;;  %v1912_v26 = vld [vmem:[#allocation11 + $0xcd8] sm:$0xff]  ;;  %v6088_v62 = vcombine.high %v1911_v41, %v1915_v60 }
 0x38b   : > { %5213 = vmatprep.subr.bf16.mxu1 %v6034_v61  ;;  %v1916_v0 = vld [vmem:[#allocation11 + $0xcf8] sm:$0xff]  ;;  %v6079_v61 = vcombine.low %v1903_v50, %v1907_v51 }
 0x38c   : > { %v6090_v54 = vcombine.high %v1912_v26, %v1916_v0  ;;  %v1944_v50 = vld [vmem:[#allocation11 + $0xdd8] sm:$0xff] }
 0x38d   : > { %5050 = vmatpush1.bf16.msra.mxu0 %v6031_v4  ;;  %v1920_v4 = vld [vmem:[#allocation11 + $0xd18] sm:$0xff] }
 0x38e   : > { %5214 = vmatpush1.bf16.msra.mxu1 %v6033_v48  ;;  %5051 = vmatprep.subr.bf16.mxu0 %v6040_v5  ;;  %v1924_v48 = vld [vmem:[#allocation11 + $0xd38] sm:$0xff]  ;;  %v6089_v5 = vcombine.low %v1912_v26, %v1916_v0  ;;  %v5281_v26 = vld [vmem:[%s6996_s17 + $0x10] sm:$0xff]  ;;  %v5280_v0 = vld [vmem:[%s6996_s17 + $0x8] sm:$0xff] }
 0x38f   : > { %5215 = vmatprep.subr.bf16.mxu1 %v6042_v11  ;;  %v6096_v11 = vcombine.high %v1919_v63, %v1923_v1  ;;  %v6098_v6 = vcombine.high %v1920_v4, %v1924_v48  ;;  %v1948_v51 = vld [vmem:[#allocation11 + $0xdf8] sm:$0xff] }
 0x391   : > { %5052 = vmatpush1.bf16.msra.mxu0 %v6039_v15  ;;  %v1932_v15 = vld [vmem:[#allocation11 + $0xd78] sm:$0xff] }
 0x392   : > { %5216 = vmatpush1.bf16.msra.mxu1 %v6041_v8  ;;  %5053 = vmatprep.subr.bf16.mxu0 %v6048_v10  ;;  %v6095_v8 = vcombine.low %v1919_v63, %v1923_v1  ;;  %v7155_v10 = vld [vmem:[#allocation13] sm:$0xff]  ;;  %v6106_v16 = vcombine.high %v1928_v2, %v1932_v15 }
 0x393   : > { %5217 = vmatprep.subr.bf16.mxu1 %v6050_v13  ;;  %v6097_v13 = vcombine.low %v1920_v4, %v1924_v48  ;;  %v2022_v23 = vrot.slane %v7155_v10, %v7048_v27  ;;  %v2030_v32 = vrot.slane %v7155_v10, %v7057_v42  ;;  %v6122_v4 = vcombine.high %v1944_v50, %v1948_v51  ;;  %v1951_v48 = vld [vmem:[#allocation11 + $0xe10] sm:$0xff] }
 0x395   : > { %5054 = vmatpush1.bf16.msra.mxu0 %v6047_v21  ;;  %v2018_v21 = vrot.slane %v7155_v10, %v7043_v25 }
 0x396   : > { %5218 = vmatpush1.bf16.msra.mxu1 %v6049_v22  ;;  %5055 = vmatprep.subr.bf16.mxu0 %v6056_v28  ;;  %v2026_v22 = vrot.slane %v7155_v10, %v7083_v30  ;;  %v1936_v28 = vld [vmem:[#allocation11 + $0xd98] sm:$0xff] }
 0x397   : > { %5219 = vmatprep.subr.bf16.mxu1 %v6058_v29  ;;  %v1940_v29 = vld [vmem:[#allocation11 + $0xdb8] sm:$0xff] }
 0x398   : > { %v6114_v47 = vcombine.high %v1936_v28, %v1940_v29 }
 0x399   : > { %5056 = vmatpush1.bf16.msra.mxu0 %v6055_v37  ;;  %v6105_v37 = vcombine.low %v1928_v2, %v1932_v15  ;;  %v5308_v2 = vrot.slane %v7165_v36, %v7083_v30 }
 0x39a   : > { %5220 = vmatpush1.bf16.msra.mxu1 %v6057_v38  ;;  %5066 = vmatprep.subr.bf16.mxu0 %v6064_v39  ;;  %v6112_v38 = vcombine.high %v1935_v19, %v1939_v20 }
 0x39b   : > { %5230 = vmatprep.subr.bf16.mxu1 %v6066_v31 }
 0x39c   : > { %5058 = vmatmul.mubr.bf16.vlgmr.msra.gmra.mrb[12].mxu0 %v7123_v18 }
 0x39d   : > { %5222 = vmatmul.mubr.bf16.vlgmr.msra.gmra.mrb[12].mxu1 %v7123_v18  ;;  %5067 = vmatpush1.bf16.msra.mxu0 %v6063_v44  ;;  %v6081_v18 = vcombine.low %v1904_v53, %v1908_v55  ;;  %v1947_v44 = vld [vmem:[#allocation11 + $0xdf0] sm:$0xff]  ;;  %v5300_v53 = vrot.slane %v7165_v36, %v7043_v25  ;;  %v5304_v25 = vrot.slane %v7165_v36, %v7048_v27 }
 0x39e   : > { %5098 = vmatprep.mubr.bf16.mxu0 %v7125_v35  ;;  %5231 = vmatpush1.bf16.msra.mxu1 %v6065_v49  ;;  %v6121_v27 = vcombine.low %v1944_v50, %v1948_v51 }
 0x39f   : > { %5262 = vmatprep.mubr.bf16.mxu1 %v7125_v35  ;;  %5068 = vmatprep.subr.bf16.mxu0 %v6072_v40  ;;  %v6087_v35 = vcombine.low %v1911_v41, %v1915_v60 }
 0x3a0   : > { %5232 = vmatprep.subr.bf16.mxu1 %v6074_v52  ;;  %v5279_v52 = vld [vmem:[%s6996_s17] sm:$0xff] }
 0x3a1   : > { %5069 = vmatpush1.bf16.msra.mxu0 %v6071_v56 }
 0x3a2   : > { %5233 = vmatpush1.bf16.msra.mxu1 %v6073_v57  ;;  %5070 = vmatprep.subr.bf16.mxu0 %v6080_v58 }
 0x3a3   : > { %5234 = vmatprep.subr.bf16.mxu1 %v6082_v59  ;;  %v6111_v59 = vcombine.low %v1935_v19, %v1939_v20  ;;  %v5312_v20 = vrot.slane %v7165_v36, %v7057_v42  ;;  %v1971_v42 = vld [vmem:[#allocation11 + $0xeb0] sm:$0xff] }
 0x3a5   : > { %5071 = vmatpush1.bf16.msra.mxu0 %v6079_v61 }
 0x3a6   : > { %5235 = vmatpush1.bf16.msra.mxu1 %v6081_v18  ;;  %5072 = vmatprep.subr.bf16.mxu0 %v6088_v62  ;;  %v6113_v62 = vcombine.low %v1936_v28, %v1940_v29  ;;  %v1963_v28 = vld [vmem:[#allocation11 + $0xe70] sm:$0xff]  ;;  %v1960_v29 = vld [vmem:[#allocation11 + $0xe58] sm:$0xff] }
 0x3a7   : > { %5236 = vmatprep.subr.bf16.mxu1 %v6090_v54  ;;  %v6120_v54 = vcombine.high %v1943_v43, %v1947_v44 }
 0x3a9   : > { %5073 = vmatpush1.bf16.msra.mxu0 %v6087_v35  ;;  %v1955_v35 = vld [vmem:[#allocation11 + $0xe30] sm:$0xff] }
 0x3aa   : > { %5237 = vmatpush1.bf16.msra.mxu1 %v6089_v5  ;;  %5074 = vmatprep.subr.bf16.mxu0 %v6096_v11  ;;  %v5282_v11 = vld [vmem:[%s6996_s17 + $0x18] sm:$0xff] }
 0x3ab   : > { %5238 = vmatprep.subr.bf16.mxu1 %v6098_v6  ;;  %v1952_v6 = vld [vmem:[#allocation11 + $0xe18] sm:$0xff] }
 0x3ad   : > { %5075 = vmatpush1.bf16.msra.mxu0 %v6095_v8  ;;  %v6119_v8 = vcombine.low %v1943_v43, %v1947_v44  ;;  %v1967_v43 = vld [vmem:[#allocation11 + $0xe90] sm:$0xff]  ;;  %v1968_v44 = vld [vmem:[#allocation11 + $0xe98] sm:$0xff] }
 0x3ae   : > { %5239 = vmatpush1.bf16.msra.mxu1 %v6097_v13  ;;  %5076 = vmatprep.subr.bf16.mxu0 %v6104_v14  ;;  %v6128_v14 = vcombine.high %v1951_v48, %v1955_v35  ;;  %v6144_v50 = vcombine.high %v1967_v43, %v1971_v42 }
 0x3af   : > { %v4772_v39 = vpop.f32.mrb[8].mxu0  ;;  %v4936_v31 = vpop.f32.mrb[8].mxu1  ;;  %5240 = vmatprep.subr.bf16.mxu1 %v6106_v16 }
 0x3b0   : > { %v6193_v46 = vadd.f32 %v4772_v39, %v2018_v21  ;;  %v6195_v3 = vadd.f32 %v4936_v31, %v2026_v22  ;;  %v4774_v49 = vpop.f32.mrb[9].mxu0  ;;  %v4938_v40 = vpop.f32.mrb[9].mxu1  ;;  %v6130_v21 = vcombine.high %v1952_v6, %v1956_v45  ;;  %v1959_v22 = vld [vmem:[#allocation11 + $0xe50] sm:$0xff] }
 0x3b1   : > { %v6194_v55 = vadd.f32 %v4774_v49, %v2022_v23  ;;  %v6196_v56 = vadd.f32 %v4938_v40, %v2030_v32  ;;  %v4776_v57 = vpop.f32.mrb[10].mxu0  ;;  %v4940_v58 = vpop.f32.mrb[10].mxu1  ;;  %5077 = vmatpush1.bf16.msra.mxu0 %v6103_v34  ;;  %v1964_v23 = vld [vmem:[#allocation11 + $0xe78] sm:$0xff]  ;;  %v6127_v34 = vcombine.low %v1951_v48, %v1955_v35  ;;  %v6135_v49 = vcombine.low %v1959_v22, %v1963_v28 }
 0x3b2   : > { %v5271_v41 = vmax.f32 %v6193_v46, 0.0  ;;  %v5273_v60 = vmax.f32 %v6195_v3, 0.0  ;;  %5241 = vmatpush1.bf16.msra.mxu1 %v6105_v37  ;;  %v4777_v61 = vpop.f32.mrb[11].mxu0  ;;  %v4941_v18 = vpop.f32.mrb[11].mxu1  ;;  %5078 = vmatprep.subr.bf16.mxu0 %v6112_v38  ;;  %v6129_v37 = vcombine.low %v1952_v6, %v1956_v45  ;;  %v6136_v38 = vcombine.high %v1959_v22, %v1963_v28  ;;  %v1972_v46 = vld [vmem:[#allocation11 + $0xeb8] sm:$0xff]  ;;  %v1999_v45 = vld [vmem:[#allocation11 + $0xf90] sm:$0xff] }
 0x3b3   : > { %v5272_v63 = vmax.f32 %v6194_v55, 0.0  ;;  %v5274_v1 = vmax.f32 %v6196_v56, 0.0  ;;  %5242 = vmatprep.subr.bf16.mxu1 %v6114_v47  ;;  %v6138_v47 = vcombine.high %v1960_v29, %v1964_v23  ;;  %v6137_v40 = vcombine.low %v1960_v29, %v1964_v23  ;;  %v1976_v55 = vld [vmem:[#allocation11 + $0xed8] sm:$0xff] }
 0x3b4   : > { %v5287_v5 = vmul.f32 %v5279_v52, %v5271_v41  ;;  %v5289_v12 = vmul.f32 %v5281_v26, %v5273_v60  ;;  %v6146_v51 = vcombine.high %v1968_v44, %v1972_v46  ;;  %v1975_v52 = vld [vmem:[#allocation11 + $0xed0] sm:$0xff]  ;;  %v1980_v56 = vld [vmem:[#allocation11 + $0xef8] sm:$0xff]  ;;  %v6143_v57 = vcombine.low %v1967_v43, %v1971_v42 }
 0x3b5   : > { %v5288_v15 = vmul.f32 %v5280_v0, %v5272_v63  ;;  %5079 = vmatpush1.bf16.msra.mxu0 %v6111_v59  ;;  %v5290_v19 = vmul.f32 %v5282_v11, %v5274_v1  ;;  %v6145_v58 = vcombine.low %v1968_v44, %v1972_v46  ;;  %v6154_v41 = vcombine.high %v1976_v55, %v1980_v56  ;;  %v1983_v60 = vld [vmem:[#allocation11 + $0xf10] sm:$0xff]  ;;  %v1984_v0 = vld [vmem:[#allocation11 + $0xf18] sm:$0xff] }
 0x3b6   : > { %v5337_v13 = vmul.f32 %v5300_v53, %v5287_v5  ;;  %5243 = vmatpush1.bf16.msra.mxu1 %v6113_v62  ;;  %5080 = vmatprep.subr.bf16.mxu0 %v6120_v54  ;;  %v5339_v30 = vmul.f32 %v5308_v2, %v5289_v12  ;;  %v1979_v53 = vld [vmem:[#allocation11 + $0xef0] sm:$0xff]  ;;  %v1988_v61 = vld [vmem:[#allocation11 + $0xf38] sm:$0xff]  ;;  %v6153_v62 = vcombine.low %v1976_v55, %v1980_v56 }
 0x3b7   : > { %v5338_v16 = vmul.f32 %v5304_v25, %v5288_v15  ;;  %5244 = vmatprep.subr.bf16.mxu1 %v6122_v4  ;;  %v5340_v39 = vmul.f32 %v5312_v20, %v5290_v19  ;;  %v6152_v59 = vcombine.high %v1975_v52, %v1979_v53  ;;  %v1987_v26 = vld [vmem:[#allocation11 + $0xf30] sm:$0xff]  ;;  %v6151_v18 = vcombine.low %v1975_v52, %v1979_v53  ;;  %v1992_v4 = vld [vmem:[#allocation11 + $0xf58] sm:$0xff]  ;;  %v5284_v52 = vld [vmem:[%s6996_s17 + $0x28] sm:$0xff] }
 0x3b8   : > { %v6160_v54 = vcombine.high %v1983_v60, %v1987_v26  ;;  %v6162_v63 = vcombine.high %v1984_v0, %v1988_v61  ;;  %v1991_v25 = vld [vmem:[#allocation11 + $0xf50] sm:$0xff]  ;;  %v1996_v48 = vld [vmem:[#allocation11 + $0xf78] sm:$0xff]  ;;  %v6159_v35 = vcombine.low %v1983_v60, %v1987_v26  ;;  %v6161_v5 = vcombine.low %v1984_v0, %v1988_v61 }
 0x3b9   : > { %v5345_v32 = vadd.f32 %v5338_v16, %v5337_v13  ;;  %5081 = vmatpush1.bf16.msra.mxu0 %v6119_v8  ;;  %v1995_v1 = vld [vmem:[#allocation11 + $0xf70] sm:$0xff]  ;;  %v6170_v6 = vcombine.high %v1992_v4, %v1996_v48  ;;  %v2000_v2 = vld [vmem:[#allocation11 + $0xf98] sm:$0xff]  ;;  %v6169_v13 = vcombine.low %v1992_v4, %v1996_v48 }
 0x3ba   : > { %5245 = vmatpush1.bf16.msra.mxu1 %v6121_v27  ;;  %5082 = vmatprep.subr.bf16.mxu0 %v6128_v14  ;;  %v6168_v11 = vcombine.high %v1991_v25, %v1995_v1  ;;  %v2003_v12 = vld [vmem:[#allocation11 + $0xfb0] sm:$0xff]  ;;  %v2004_v15 = vld [vmem:[#allocation11 + $0xfb8] sm:$0xff]  ;;  %v6167_v8 = vcombine.low %v1991_v25, %v1995_v1  ;;  %v5328_v25 = vrot.slane %v7165_v36, %v7113_v33 }
 0x3bb   : > { %v5346_v31 = vadd.f32 %v5345_v32, %v5339_v30  ;;  %5246 = vmatprep.subr.bf16.mxu1 %v6130_v21  ;;  %v6176_v27 = vcombine.high %v1999_v45, %v2003_v12  ;;  %v6178_v14 = vcombine.high %v2000_v2, %v2004_v15  ;;  %v2007_v16 = vld [vmem:[#allocation11 + $0xfd0] sm:$0xff]  ;;  %v2008_v20 = vld [vmem:[#allocation11 + $0xfd8] sm:$0xff]  ;;  %v6175_v22 = vcombine.low %v1999_v45, %v2003_v12 }
 0x3bc   : > { %v2011_v19 = vld [vmem:[#allocation11 + $0xff0] sm:$0xff]  ;;  %v2012_v21 = vld [vmem:[#allocation11 + $0xff8] sm:$0xff]  ;;  %v6177_v28 = vcombine.low %v2000_v2, %v2004_v15 }
 0x3bd   : > { %v7179_v3 = vadd.f32 %v5346_v31, %v5340_v39  ;;  %5083 = vmatpush1.bf16.msra.mxu0 %v6127_v34  ;;  %v6184_v29 = vcombine.high %v2007_v16, %v2011_v19  ;;  %v6186_v23 = vcombine.high %v2008_v20, %v2012_v21  ;;  %v6183_v30 = vcombine.low %v2007_v16, %v2011_v19  ;;  %v5283_v44 = vld [vmem:[%s6996_s17 + $0x20] sm:$0xff]  ;;  %v5286_v61 = vld [vmem:[%s6996_s17 + $0x38] sm:$0xff] }
 0x3be   : > { %5247 = vmatpush1.bf16.msra.mxu1 %v6129_v37  ;;  %5084 = vmatprep.subr.bf16.mxu0 %v6136_v38  ;;  %v6185_v32 = vcombine.low %v2008_v20, %v2012_v21  ;;  %v2034_v34 = vrot.slane %v7155_v10, %v7110_v17  ;;  %v2042_v37 = vrot.slane %v7155_v10, %v7132_v7 }
 0x3bf   : > { %5248 = vmatprep.subr.bf16.mxu1 %v6138_v47  ;;  %v2038_v38 = vrot.slane %v7155_v10, %v7088_v24  ;;  %v2046_v39 = vrot.slane %v7155_v10, %v7113_v33 }
 0x3c1   : > { %5085 = vmatpush1.bf16.msra.mxu0 %v6135_v49 }
 0x3c2   : > { %5249 = vmatpush1.bf16.msra.mxu1 %v6137_v40  ;;  %5086 = vmatprep.subr.bf16.mxu0 %v6144_v50 }
 0x3c3   : > { %5250 = vmatprep.subr.bf16.mxu1 %v6146_v51  ;;  %v5316_v51 = vrot.slane %v7165_v36, %v7110_v17  ;;  %v5324_v17 = vrot.slane %v7165_v36, %v7132_v7 }
 0x3c5   : > { %5087 = vmatpush1.bf16.msra.mxu0 %v6143_v57  ;;  %v5285_v57 = vld [vmem:[%s6996_s17 + $0x30] sm:$0xff] }
 0x3c6   : > { %5251 = vmatpush1.bf16.msra.mxu1 %v6145_v58  ;;  %5088 = vmatprep.subr.bf16.mxu0 %v6152_v59  ;;  %v5320_v59 = vrot.slane %v7165_v36, %v7088_v24 }
 0x3c7   : > { %5252 = vmatprep.subr.bf16.mxu1 %v6154_v41 }
 0x3c9   : > { %5089 = vmatpush1.bf16.msra.mxu0 %v6151_v18 }
 0x3ca   : > { %5253 = vmatpush1.bf16.msra.mxu1 %v6153_v62  ;;  %5090 = vmatprep.subr.bf16.mxu0 %v6160_v54 }
 0x3cb   : > { %5254 = vmatprep.subr.bf16.mxu1 %v6162_v63 }
 0x3cd   : > { %5091 = vmatpush1.bf16.msra.mxu0 %v6159_v35 }
 0x3ce   : > { %5255 = vmatpush1.bf16.msra.mxu1 %v6161_v5  ;;  %5092 = vmatprep.subr.bf16.mxu0 %v6168_v11  ;;  %v6187_v11 = vld [vmem:[#allocation2] ss:$0 sm:$0xff] }
 0x3cf   : > { %5256 = vmatprep.subr.bf16.mxu1 %v6170_v6 }
 0x3d1   : > { %5093 = vmatpush1.bf16.msra.mxu0 %v6167_v8 }
 0x3d2   : > { %5257 = vmatpush1.bf16.msra.mxu1 %v6169_v13  ;;  %5094 = vmatprep.subr.bf16.mxu0 %v6176_v27 }
 0x3d3   : > { %5258 = vmatprep.subr.bf16.mxu1 %v6178_v14 }
 0x3d5   : > { %5095 = vmatpush1.bf16.msra.mxu0 %v6175_v22 }
 0x3d6   : > { %5259 = vmatpush1.bf16.msra.mxu1 %v6177_v28  ;;  %5096 = vmatprep.subr.bf16.mxu0 %v6184_v29 }
 0x3d7   : > { %5260 = vmatprep.subr.bf16.mxu1 %v6186_v23 }
 0x3d9   : > { %5097 = vmatpush1.bf16.msra.mxu0 %v6183_v30 }
 0x3da   : > { %5261 = vmatpush1.bf16.msra.mxu1 %v6185_v32 }
 0x3dc   : > { %5099 = vmatmul.mubr.bf16.vlgmr.msra.gmra.mrb[12].mxu0 %v7137_v9 }
 0x3dd   : > { %5263 = vmatmul.mubr.bf16.vlgmr.msra.gmra.mrb[12].mxu1 %v7137_v9 }
 0x4af   : > { %v5100_v31 = vpop.f32.mrb[12].mxu0 }
 0x4b0   : > { %v6197_v47 = vadd.f32 %v5100_v31, %v2034_v34  ;;  %v5264_v43 = vpop.f32.mrb[12].mxu1  ;;  %v5102_v42 = vpop.f32.mrb[13].mxu0 }
 0x4b1   : > { %v6199_v9 = vadd.f32 %v5264_v43, %v2042_v37  ;;  %v6198_v46 = vadd.f32 %v5102_v42, %v2038_v38  ;;  %v5266_v49 = vpop.f32.mrb[13].mxu1  ;;  %v5104_v40 = vpop.f32.mrb[14].mxu0 }
 0x4b2   : > { %v5275_v50 = vmax.f32 %v6197_v47, 0.0  ;;  %v6200_v53 = vadd.f32 %v5266_v49, %v2046_v39  ;;  %v5268_v55 = vpop.f32.mrb[14].mxu1  ;;  %v5105_v56 = vpop.f32.mrb[15].mxu0 }
 0x4b3   : > { %v5277_v10 = vmax.f32 %v6199_v9, 0.0  ;;  %v5276_v58 = vmax.f32 %v6198_v46, 0.0  ;;  %v5269_v41 = vpop.f32.mrb[15].mxu1 }
 0x4b4   : > { %v5291_v60 = vmul.f32 %v5283_v44, %v5275_v50  ;;  %v5278_v26 = vmax.f32 %v6200_v53, 0.0 }
 0x4b5   : > { %v5292_v0 = vmul.f32 %v5284_v52, %v5276_v58  ;;  %v5293_v62 = vmul.f32 %v5285_v57, %v5277_v10 }
 0x4b6   : > { %v5341_v18 = vmul.f32 %v5316_v51, %v5291_v60  ;;  %v5294_v63 = vmul.f32 %v5286_v61, %v5278_v26 }
 0x4b7   : > { %v5342_v54 = vmul.f32 %v5320_v59, %v5292_v0  ;;  %v5343_v24 = vmul.f32 %v5324_v17, %v5293_v62 }
 0x4b8   : > { %v5348_v1 = vadd.f32 %v7179_v3, %v5341_v18  ;;  %v5344_v48 = vmul.f32 %v5328_v25, %v5294_v63 }
 0x4ba   : > { %v5349_v4 = vadd.f32 %v5348_v1, %v5342_v54 }
 0x4bc   : > { %v5350_v35 = vadd.f32 %v5349_v4, %v5343_v24 }
 0x4be   : > { %v5351_v5 = vadd.f32 %v5350_v35, %v5344_v48 }
 0x4c0   : > { %5352 = vadd.xlane.f32.xlu0 %v5351_v5 }
 0x54d   : > { %v5353_v7 = vpop.xlane.xlu0 %5352 }
 0x54e   : > { %v5361_v6 = vadd.f32 %v6187_v11, %v5353_v7 }
 0x550   : > { %5363 = vst.msk [vmem:[%s490_s1] sm:$0xff] %vm5362_vm0, %v5361_v6 }
 0x551 PF: > { %s7280_s14 = sld [smem:[#allocation22_spill]]  ;;  %s7281_s26 = sld [smem:[#allocation21_spill]] }
 0x552   : > { %s7282_s13 = sld [smem:[#allocation23_spill]]  ;;  %s7283_s11 = smov %s6624_s12 }
 0x557   : > { %p27_p7 = scmp.ge.s32.totalorder %s7280_s14, 4   ;;  %s7284_s12 = smov %s7281_s26 }
 0x559   :  { %29 = sbr.rel (!%p27_p7) target bundleno = 13 (0xd), region = 140 }
 0x560   :  { %5383 = vsyncpa [#allocation4], 1 }
 0x561   :  { %5385 = vsyncpa [#allocation4 + $0x1], 1 }
 0x562   :  { %5386 = vsyncpa [#allocation6], 1 }
 0x563   :  { %5388 = vsyncpa [#allocation6 + $0x1], 1 }
 0x564   :  { %5389 = vsyncpa [#allocation9], 1 }
 0x565   :  { %5390 = vsyncpa [#allocation12], 1 }
 0x566   :  { %5391 = vsyncpa [#allocation15], 1 }

</bundles_post_ra>
